<compile_context>
chip_gen: v7x
topology: tpu7x:2x2x1
jax: 0.10.0
libtpu: 0.0.40
codegen_flags: <defaults>
</compile_context>

<pallas_src>
import functools

import numpy as np
import jax
import jax.numpy as jnp
from jax.experimental import pallas as pl
from jax.experimental.pallas import tpu as pltpu

WIN = 11            # SSIM gaussian window size
SIGMA = 1.5         # SSIM gaussian sigma
ALPHA, BETA, GAMMA = 0.6, 0.2, 0.2
C1 = 0.01 ** 2
C2 = 0.03 ** 2


# --------------------------------------------------------------------------
# Constant conv operators (built once per (H, W) in numpy, cached).
# --------------------------------------------------------------------------
def _gauss1d(window_size=WIN, sigma=SIGMA):
    x = np.arange(window_size, dtype=np.float32) - window_size // 2
    if window_size % 2 == 0:
        x = x + 0.5
    g = np.exp(-(x ** 2) / (2.0 * sigma ** 2)).astype(np.float32)
    return (g / g.sum()).astype(np.float32)


def _band_matrix(n, taps, center, pad_mode):
    """M such that out[i] = sum_d taps[d] * x[i + d - center] (cross-correlation),
    with 'zero' padding (out-of-range taps dropped) or PyTorch-style 'reflect'
    padding (mirror excluding the edge pixel)."""
    m = np.zeros((n, n), dtype=np.float32)
    for i in range(n):
        for d in range(len(taps)):
            j = i + d - center
            if 0 <= j < n:
                m[i, j] += taps[d]
            elif pad_mode == "reflect":
                j = -j if j < 0 else 2 * (n - 1) - j
                m[i, j] += taps[d]
            # zero pad: drop the tap
    return m


@functools.lru_cache(maxsize=8)
def _make_operators(h, w):
    """Returns (gop, sop):
       gop : (HW, HW)   x_flat @ gop == 11x11 gaussian conv, zero padding
       sop : (HW, 2*HW) d_flat @ sop == [sobel_x | sobel_y], reflect padding
    """
    g = _gauss1d(WIN, SIGMA)
    ah = _band_matrix(h, g, WIN // 2, "zero")          # (H, H)
    bw = _band_matrix(w, g, WIN // 2, "zero")          # (W, W)
    gop = np.kron(ah, bw).T.astype(np.float32)         # (HW, HW)

    smooth = np.array([1.0, 2.0, 1.0], dtype=np.float32)
    diff = np.array([-1.0, 0.0, 1.0], dtype=np.float32)
    sx = np.kron(_band_matrix(h, smooth, 1, "reflect"),
                 _band_matrix(w, diff, 1, "reflect"))   # sobel_x operator
    sy = np.kron(_band_matrix(h, diff, 1, "reflect"),
                 _band_matrix(w, smooth, 1, "reflect")) # sobel_y operator
    sop = np.concatenate([sx.T, sy.T], axis=1).astype(np.float32)  # (HW, 2HW)
    return jnp.asarray(gop), jnp.asarray(sop)


def _pick_block_bc(bc_total, hw):
    """Channels per grid step: must divide B*C and be a multiple of 8
    (sublane tiling) unless it covers the full extent."""
    cap_rows = max(1, (1 << 20) // max(hw, 1))   # ~4 MiB f32 per input block
    if bc_total <= cap_rows:
        return bc_total
    cands = [d for d in range(8, bc_total, 8)
             if bc_total % d == 0 and d <= cap_rows]
    return max(cands) if cands else bc_total


# --------------------------------------------------------------------------
# Kernel: one block of channels -> one row of partial sums.
# --------------------------------------------------------------------------
def _combined_loss_kernel(pred_ref, target_ref, gop_ref, sop_ref, out_ref):
    p = pred_ref[...]            # (bc, HW) f32, lane axis = H*W (lane dense)
    t = target_ref[...]
    bc, hw = p.shape
    n = float(hw)

    d = p - t

    # ---------------- L1 partial sum ----------------
    l1_sum = jnp.sum(jnp.abs(d))

    # ------- per-channel mean / unbiased std, single pass (sum & sumsq) -------
    sp = jnp.sum(p, axis=1, keepdims=True)            # (bc, 1)
    st = jnp.sum(t, axis=1, keepdims=True)
    spp = jnp.sum(p * p, axis=1, keepdims=True)
    stt = jnp.sum(t * t, axis=1, keepdims=True)
    mean_p = sp * (1.0 / n)
    mean_t = st * (1.0 / n)
    var_p = (spp - sp * sp * (1.0 / n)) * (1.0 / (n - 1.0))
    var_t = (stt - st * st * (1.0 / n)) * (1.0 / (n - 1.0))
    std_p = jnp.sqrt(jnp.maximum(var_p, 0.0))
    std_t = jnp.sqrt(jnp.maximum(var_t, 0.0))
    mean_sq_sum = jnp.sum((mean_p - mean_t) ** 2)
    std_sq_sum = jnp.sum((std_p - std_t) ** 2)

    # ------- Sobel gradient loss: |sobel(pred)-sobel(target)| = |sobel(d)| -------
    # sop = [Sx^T | Sy^T] with reflect padding folded in; one MXU matmul.
    grads = jnp.dot(d, sop_ref[...],
                    preferred_element_type=jnp.float32,
                    precision=jax.lax.Precision.HIGHEST)   # (bc, 2*HW)
    grad_abs_sum = jnp.sum(jnp.abs(grads))

    # ------- SSIM: depthwise 11x11 gaussian conv (zero pad) as ONE matmul -------
    x5 = jnp.concatenate([p, t, p * p, t * t, p * t], axis=0)   # (5*bc, HW)
    c5 = jnp.dot(x5, gop_ref[...],
                 preferred_element_type=jnp.float32,
                 precision=jax.lax.Precision.HIGHEST)           # (5*bc, HW)
    mu1 = c5[0 * bc:1 * bc]
    mu2 = c5[1 * bc:2 * bc]
    e11 = c5[2 * bc:3 * bc]
    e22 = c5[3 * bc:4 * bc]
    e12 = c5[4 * bc:5 * bc]
    mu1_sq = mu1 * mu1
    mu2_sq = mu2 * mu2
    mu1_mu2 = mu1 * mu2
    sigma1_sq = e11 - mu1_sq
    sigma2_sq = e22 - mu2_sq
    sigma12 = e12 - mu1_mu2
    num = (2.0 * mu1_mu2 + C1) * (2.0 * sigma12 + C2)
    den = (mu1_sq + mu2_sq + C1) * (sigma1_sq + sigma2_sq + C2)
    ssim_sum = jnp.sum(num / den)

    # ------- emit per-tile partial sums on lanes 0..4 of a lane-dense row -------
    lane = jax.lax.broadcasted_iota(jnp.int32, out_ref.shape, 2)
    out_ref[...] = (jnp.where(lane == 0, l1_sum, 0.0)
                    + jnp.where(lane == 1, mean_sq_sum, 0.0)
                    + jnp.where(lane == 2, std_sq_sum, 0.0)
                    + jnp.where(lane == 3, grad_abs_sum, 0.0)
                    + jnp.where(lane == 4, ssim_sum, 0.0))


# --------------------------------------------------------------------------
# Wrapper
# --------------------------------------------------------------------------
def combined_loss(pred, target):
    """pred, target: (B, C, H, W) float32. Returns scalar total loss."""
    pred = pred.astype(jnp.float32)
    target = target.astype(jnp.float32)
    b, c, h, w = pred.shape
    bc, hw = b * c, h * w

    gop, sop = _make_operators(h, w)
    block_bc = _pick_block_bc(bc, hw)
    num_tiles = bc // block_bc

    # Free row-major reshape: lane axis becomes H*W (dense), rows are channels.
    p2 = pred.reshape(bc, hw)
    t2 = target.reshape(bc, hw)

    partials = pl.pallas_call(
        _combined_loss_kernel,
        out_shape=jax.ShapeDtypeStruct((num_tiles, 8, 128), jnp.float32),
        grid=(num_tiles,),
        in_specs=[
            pl.BlockSpec((block_bc, hw), lambda i: (i, 0)),
            pl.BlockSpec((block_bc, hw), lambda i: (i, 0)),
            pl.BlockSpec((hw, hw), lambda i: (0, 0)),        # resident constant
            pl.BlockSpec((hw, 2 * hw), lambda i: (0, 0)),    # resident constant
        ],
        out_specs=pl.BlockSpec((1, 8, 128), lambda i: (i, 0, 0)),
        compiler_params=pltpu.CompilerParams(
            dimension_semantics=("parallel",),
            vmem_limit_bytes=32 * 1024 * 1024),
    )(p2, t2, gop, sop)

    # Tiny cross-tile reduction + loss weighting in plain JAX.
    sums = jnp.sum(partials[:, 0, :], axis=0)       # (128,)
    l1 = sums[0] / (bc * hw)
    mean_loss = sums[1] / bc
    std_loss = sums[2] / bc
    gradient_loss = sums[3] / (bc * hw)
    ssim_val = sums[4] / (bc * hw)
    perceptual_loss = mean_loss + std_loss + 0.5 * gradient_loss
    ssim_loss = 1.0 - ssim_val
    return ALPHA * l1 + BETA * perceptual_loss + GAMMA * ssim_loss


if __name__ == "__main__":
    key = jax.random.PRNGKey(0)
    k1, k2 = jax.random.split(key)
    B, C, H, W = 2, 4, 16, 16
    pred = jax.random.uniform(k1, (B, C, H, W), dtype=jnp.float32)
    target = jax.random.uniform(k2, (B, C, H, W), dtype=jnp.float32)

    loss = combined_loss(pred, target)
    jax.block_until_ready(loss)
    print("KERNEL_OK")
</pallas_src>

<mosaic_0001>
module attributes {stable_mosaic.version = 11 : i64} {
  func.func @_combined_loss_kernel(%arg0: i32, %arg1: memref<8x256xf32, #tpu.memory_space<vmem>>, %arg2: memref<8x256xf32, #tpu.memory_space<vmem>>, %arg3: memref<256x256xf32, #tpu.memory_space<vmem>>, %arg4: memref<256x512xf32, #tpu.memory_space<vmem>>, %arg5: memref<1x8x128xf32, #tpu.memory_space<vmem>>) attributes {dimension_semantics = [#tpu.dimension_semantics<parallel>], iteration_bounds = array<i64: 1>, scalar_prefetch = 0 : i64, scratch_operands = 0 : i64, tpu.core_type = #tpu.core_type<tc>, window_params = [{transform_indices = @transform_0, window_bounds = array<i64: 8, 256>}, {transform_indices = @transform_1, window_bounds = array<i64: 8, 256>}, {pipeline_mode = #tpu.pipeline_mode<synchronous>, transform_indices = @transform_2, window_bounds = array<i64: 256, 256>}, {pipeline_mode = #tpu.pipeline_mode<synchronous>, transform_indices = @transform_3, window_bounds = array<i64: 256, 512>}, {transform_indices = @transform_4, window_bounds = array<i64: 1, 8, 128>}]} {
    %c0 = arith.constant 0 : index
    %c0_0 = arith.constant 0 : index
    %0 = vector.load %arg1[%c0, %c0_0] : memref<8x256xf32, #tpu.memory_space<vmem>>, vector<8x256xf32>
    %c0_1 = arith.constant 0 : index
    %c0_2 = arith.constant 0 : index
    %1 = vector.load %arg2[%c0_1, %c0_2] : memref<8x256xf32, #tpu.memory_space<vmem>>, vector<8x256xf32>
    %2 = arith.subf %0, %1 : vector<8x256xf32>
    %3 = math.absf %2 : vector<8x256xf32>
    %4 = vector.shape_cast %3 : vector<8x256xf32> to vector<1x8x256xf32>
    %cst = arith.constant dense<0.000000e+00> : vector<1xf32>
    %5 = vector.multi_reduction <add>, %4, %cst [1, 2] : vector<1x8x256xf32> to vector<1xf32>
    %6 = vector.shape_cast %5 : vector<1xf32> to vector<1x1x1xf32>
    %7 = vector.extract %6[0, 0, 0] : f32 from vector<1x1x1xf32>
    %cst_3 = arith.constant dense<0.000000e+00> : vector<8xf32>
    %8 = vector.multi_reduction <add>, %0, %cst_3 [1] : vector<8x256xf32> to vector<8xf32>
    %9 = vector.shape_cast %8 : vector<8xf32> to vector<8x1xf32>
    %cst_4 = arith.constant dense<0.000000e+00> : vector<8xf32>
    %10 = vector.multi_reduction <add>, %1, %cst_4 [1] : vector<8x256xf32> to vector<8xf32>
    %11 = vector.shape_cast %10 : vector<8xf32> to vector<8x1xf32>
    %12 = arith.mulf %0, %0 : vector<8x256xf32>
    %cst_5 = arith.constant dense<0.000000e+00> : vector<8xf32>
    %13 = vector.multi_reduction <add>, %12, %cst_5 [1] : vector<8x256xf32> to vector<8xf32>
    %14 = vector.shape_cast %13 : vector<8xf32> to vector<8x1xf32>
    %15 = arith.mulf %1, %1 : vector<8x256xf32>
    %cst_6 = arith.constant dense<0.000000e+00> : vector<8xf32>
    %16 = vector.multi_reduction <add>, %15, %cst_6 [1] : vector<8x256xf32> to vector<8xf32>
    %17 = vector.shape_cast %16 : vector<8xf32> to vector<8x1xf32>
    %cst_7 = arith.constant 3.906250e-03 : f32
    %18 = vector.broadcast %cst_7 : f32 to vector<8x1xf32>
    %19 = arith.mulf %9, %18 : vector<8x1xf32>
    %cst_8 = arith.constant 3.906250e-03 : f32
    %20 = vector.broadcast %cst_8 : f32 to vector<8x1xf32>
    %21 = arith.mulf %11, %20 : vector<8x1xf32>
    %22 = arith.mulf %9, %9 : vector<8x1xf32>
    %cst_9 = arith.constant 3.906250e-03 : f32
    %23 = vector.broadcast %cst_9 : f32 to vector<8x1xf32>
    %24 = arith.mulf %22, %23 : vector<8x1xf32>
    %25 = arith.subf %14, %24 : vector<8x1xf32>
    %cst_10 = arith.constant 0.00392156886 : f32
    %26 = vector.broadcast %cst_10 : f32 to vector<8x1xf32>
    %27 = arith.mulf %25, %26 : vector<8x1xf32>
    %28 = arith.mulf %11, %11 : vector<8x1xf32>
    %cst_11 = arith.constant 3.906250e-03 : f32
    %29 = vector.broadcast %cst_11 : f32 to vector<8x1xf32>
    %30 = arith.mulf %28, %29 : vector<8x1xf32>
    %31 = arith.subf %17, %30 : vector<8x1xf32>
    %cst_12 = arith.constant 0.00392156886 : f32
    %32 = vector.broadcast %cst_12 : f32 to vector<8x1xf32>
    %33 = arith.mulf %31, %32 : vector<8x1xf32>
    %cst_13 = arith.constant 0.000000e+00 : f32
    %34 = vector.broadcast %cst_13 : f32 to vector<8x1xf32>
    %35 = arith.maximumf %27, %34 : vector<8x1xf32>
    %36 = math.sqrt %35 : vector<8x1xf32>
    %cst_14 = arith.constant 0.000000e+00 : f32
    %37 = vector.broadcast %cst_14 : f32 to vector<8x1xf32>
    %38 = arith.maximumf %33, %37 : vector<8x1xf32>
    %39 = math.sqrt %38 : vector<8x1xf32>
    %40 = arith.subf %19, %21 : vector<8x1xf32>
    %41 = arith.mulf %40, %40 : vector<8x1xf32>
    %42 = vector.shape_cast %41 : vector<8x1xf32> to vector<1x8x1xf32>
    %cst_15 = arith.constant dense<0.000000e+00> : vector<1xf32>
    %43 = vector.multi_reduction <add>, %42, %cst_15 [1, 2] : vector<1x8x1xf32> to vector<1xf32>
    %44 = vector.shape_cast %43 : vector<1xf32> to vector<1x1x1xf32>
    %45 = vector.extract %44[0, 0, 0] : f32 from vector<1x1x1xf32>
    %46 = arith.subf %36, %39 : vector<8x1xf32>
    %47 = arith.mulf %46, %46 : vector<8x1xf32>
    %48 = vector.shape_cast %47 : vector<8x1xf32> to vector<1x8x1xf32>
    %cst_16 = arith.constant dense<0.000000e+00> : vector<1xf32>
    %49 = vector.multi_reduction <add>, %48, %cst_16 [1, 2] : vector<1x8x1xf32> to vector<1xf32>
    %50 = vector.shape_cast %49 : vector<1xf32> to vector<1x1x1xf32>
    %51 = vector.extract %50[0, 0, 0] : f32 from vector<1x1x1xf32>
    %c0_17 = arith.constant 0 : index
    %c0_18 = arith.constant 0 : index
    %52 = vector.load %arg4[%c0_17, %c0_18] : memref<256x512xf32, #tpu.memory_space<vmem>>, vector<256x512xf32>
    %cst_19 = arith.constant dense<0.000000e+00> : vector<8x512xf32>
    %53 = tpu.matmul %2, %52, %cst_19 {dimension_numbers = #tpu.dot_dimension_numbers<[1], [0], [0], [1], [0, 0, 1, 1], [], []>, precision = #tpu.contract_precision<fp32>} : vector<8x256xf32>, vector<256x512xf32>, vector<8x512xf32> -> vector<8x512xf32>
    %54 = math.absf %53 : vector<8x512xf32>
    %55 = vector.shape_cast %54 : vector<8x512xf32> to vector<1x8x512xf32>
    %cst_20 = arith.constant dense<0.000000e+00> : vector<1xf32>
    %56 = vector.multi_reduction <add>, %55, %cst_20 [1, 2] : vector<1x8x512xf32> to vector<1xf32>
    %57 = vector.shape_cast %56 : vector<1xf32> to vector<1x1x1xf32>
    %58 = vector.extract %57[0, 0, 0] : f32 from vector<1x1x1xf32>
    %59 = arith.mulf %0, %0 : vector<8x256xf32>
    %60 = arith.mulf %1, %1 : vector<8x256xf32>
    %61 = arith.mulf %0, %1 : vector<8x256xf32>
    %62 = tpu.concatenate %0, %1, %59, %60, %61 in 0 : vector<8x256xf32>, vector<8x256xf32>, vector<8x256xf32>, vector<8x256xf32>, vector<8x256xf32> -> vector<40x256xf32>
    %c0_21 = arith.constant 0 : index
    %c0_22 = arith.constant 0 : index
    %63 = vector.load %arg3[%c0_21, %c0_22] : memref<256x256xf32, #tpu.memory_space<vmem>>, vector<256x256xf32>
    %cst_23 = arith.constant dense<0.000000e+00> : vector<40x256xf32>
    %64 = tpu.matmul %62, %63, %cst_23 {dimension_numbers = #tpu.dot_dimension_numbers<[1], [0], [0], [1], [0, 0, 1, 1], [], []>, precision = #tpu.contract_precision<fp32>} : vector<40x256xf32>, vector<256x256xf32>, vector<40x256xf32> -> vector<40x256xf32>
    %65 = vector.extract_strided_slice %64 {offsets = [0, 0], sizes = [8, 256], strides = [1, 1]} : vector<40x256xf32> to vector<8x256xf32>
    %66 = vector.extract_strided_slice %64 {offsets = [8, 0], sizes = [8, 256], strides = [1, 1]} : vector<40x256xf32> to vector<8x256xf32>
    %67 = vector.extract_strided_slice %64 {offsets = [16, 0], sizes = [8, 256], strides = [1, 1]} : vector<40x256xf32> to vector<8x256xf32>
    %68 = vector.extract_strided_slice %64 {offsets = [24, 0], sizes = [8, 256], strides = [1, 1]} : vector<40x256xf32> to vector<8x256xf32>
    %69 = vector.extract_strided_slice %64 {offsets = [32, 0], sizes = [8, 256], strides = [1, 1]} : vector<40x256xf32> to vector<8x256xf32>
    %70 = arith.mulf %65, %65 : vector<8x256xf32>
    %71 = arith.mulf %66, %66 : vector<8x256xf32>
    %72 = arith.mulf %65, %66 : vector<8x256xf32>
    %73 = arith.subf %67, %70 : vector<8x256xf32>
    %74 = arith.subf %68, %71 : vector<8x256xf32>
    %75 = arith.subf %69, %72 : vector<8x256xf32>
    %cst_24 = arith.constant 2.000000e+00 : f32
    %76 = vector.broadcast %cst_24 : f32 to vector<8x256xf32>
    %77 = arith.mulf %76, %72 : vector<8x256xf32>
    %cst_25 = arith.constant 9.99999974E-5 : f32
    %78 = vector.broadcast %cst_25 : f32 to vector<8x256xf32>
    %79 = arith.addf %77, %78 : vector<8x256xf32>
    %cst_26 = arith.constant 2.000000e+00 : f32
    %80 = vector.broadcast %cst_26 : f32 to vector<8x256xf32>
    %81 = arith.mulf %80, %75 : vector<8x256xf32>
    %cst_27 = arith.constant 8.99999984E-4 : f32
    %82 = vector.broadcast %cst_27 : f32 to vector<8x256xf32>
    %83 = arith.addf %81, %82 : vector<8x256xf32>
    %84 = arith.mulf %79, %83 : vector<8x256xf32>
    %85 = arith.addf %70, %71 : vector<8x256xf32>
    %cst_28 = arith.constant 9.99999974E-5 : f32
    %86 = vector.broadcast %cst_28 : f32 to vector<8x256xf32>
    %87 = arith.addf %85, %86 : vector<8x256xf32>
    %88 = arith.addf %73, %74 : vector<8x256xf32>
    %cst_29 = arith.constant 8.99999984E-4 : f32
    %89 = vector.broadcast %cst_29 : f32 to vector<8x256xf32>
    %90 = arith.addf %88, %89 : vector<8x256xf32>
    %91 = arith.mulf %87, %90 : vector<8x256xf32>
    %92 = arith.divf %84, %91 : vector<8x256xf32>
    %93 = vector.shape_cast %92 : vector<8x256xf32> to vector<1x8x256xf32>
    %cst_30 = arith.constant dense<0.000000e+00> : vector<1xf32>
    %94 = vector.multi_reduction <add>, %93, %cst_30 [1, 2] : vector<1x8x256xf32> to vector<1xf32>
    %95 = vector.shape_cast %94 : vector<1xf32> to vector<1x1x1xf32>
    %96 = vector.extract %95[0, 0, 0] : f32 from vector<1x1x1xf32>
    %97 = tpu.iota {dimensions = array<i32: 2>} : vector<1x8x128xi32>
    %c0_i32 = arith.constant 0 : i32
    %98 = vector.broadcast %c0_i32 : i32 to vector<1x8x128xi32>
    %99 = arith.cmpi eq, %97, %98 : vector<1x8x128xi32>
    %cst_31 = arith.constant 0.000000e+00 : f32
    %100 = vector.broadcast %7 : f32 to vector<1x8x128xf32>
    %101 = vector.broadcast %cst_31 : f32 to vector<1x8x128xf32>
    %102 = arith.select %99, %100, %101 : vector<1x8x128xi1>, vector<1x8x128xf32>
    %c1_i32 = arith.constant 1 : i32
    %103 = vector.broadcast %c1_i32 : i32 to vector<1x8x128xi32>
    %104 = arith.cmpi eq, %97, %103 : vector<1x8x128xi32>
    %cst_32 = arith.constant 0.000000e+00 : f32
    %105 = vector.broadcast %45 : f32 to vector<1x8x128xf32>
    %106 = vector.broadcast %cst_32 : f32 to vector<1x8x128xf32>
    %107 = arith.select %104, %105, %106 : vector<1x8x128xi1>, vector<1x8x128xf32>
    %108 = arith.addf %102, %107 : vector<1x8x128xf32>
    %c2_i32 = arith.constant 2 : i32
    %109 = vector.broadcast %c2_i32 : i32 to vector<1x8x128xi32>
    %110 = arith.cmpi eq, %97, %109 : vector<1x8x128xi32>
    %cst_33 = arith.constant 0.000000e+00 : f32
    %111 = vector.broadcast %51 : f32 to vector<1x8x128xf32>
    %112 = vector.broadcast %cst_33 : f32 to vector<1x8x128xf32>
    %113 = arith.select %110, %111, %112 : vector<1x8x128xi1>, vector<1x8x128xf32>
    %114 = arith.addf %108, %113 : vector<1x8x128xf32>
    %c3_i32 = arith.constant 3 : i32
    %115 = vector.broadcast %c3_i32 : i32 to vector<1x8x128xi32>
    %116 = arith.cmpi eq, %97, %115 : vector<1x8x128xi32>
    %cst_34 = arith.constant 0.000000e+00 : f32
    %117 = vector.broadcast %58 : f32 to vector<1x8x128xf32>
    %118 = vector.broadcast %cst_34 : f32 to vector<1x8x128xf32>
    %119 = arith.select %116, %117, %118 : vector<1x8x128xi1>, vector<1x8x128xf32>
    %120 = arith.addf %114, %119 : vector<1x8x128xf32>
    %c4_i32 = arith.constant 4 : i32
    %121 = vector.broadcast %c4_i32 : i32 to vector<1x8x128xi32>
    %122 = arith.cmpi eq, %97, %121 : vector<1x8x128xi32>
    %cst_35 = arith.constant 0.000000e+00 : f32
    %123 = vector.broadcast %96 : f32 to vector<1x8x128xf32>
    %124 = vector.broadcast %cst_35 : f32 to vector<1x8x128xf32>
    %125 = arith.select %122, %123, %124 : vector<1x8x128xi1>, vector<1x8x128xf32>
    %126 = arith.addf %120, %125 : vector<1x8x128xf32>
    %c0_36 = arith.constant 0 : index
    %c0_37 = arith.constant 0 : index
    %c0_38 = arith.constant 0 : index
    %127 = vector.load %arg5[%c0_36, %c0_37, %c0_38] : memref<1x8x128xf32, #tpu.memory_space<vmem>>, vector<1x8x128xf32>
    tpu.vector_store %arg5[%c0_36, %c0_37, %c0_38], %126 {strides = array<i32>} : memref<1x8x128xf32, #tpu.memory_space<vmem>>, vector<1x8x128xf32>,
    return
  }
  func.func @transform_0(%arg0: i32) -> (i32, i32) {
    %c0_i32 = arith.constant 0 : i32
    %c0_i32_0 = arith.constant 0 : i32
    return %arg0, %c0_i32 : i32, i32
  }
  func.func @transform_1(%arg0: i32) -> (i32, i32) {
    %c0_i32 = arith.constant 0 : i32
    %c0_i32_0 = arith.constant 0 : i32
    return %arg0, %c0_i32 : i32, i32
  }
  func.func @transform_2(%arg0: i32) -> (i32, i32) {
    %c0_i32 = arith.constant 0 : i32
    %c0_i32_0 = arith.constant 0 : i32
    %c0_i32_1 = arith.constant 0 : i32
    return %c0_i32, %c0_i32_0 : i32, i32
  }
  func.func @transform_3(%arg0: i32) -> (i32, i32) {
    %c0_i32 = arith.constant 0 : i32
    %c0_i32_0 = arith.constant 0 : i32
    %c0_i32_1 = arith.constant 0 : i32
    return %c0_i32, %c0_i32_0 : i32, i32
  }
  func.func @transform_4(%arg0: i32) -> (i32, i32, i32) {
    %c0_i32 = arith.constant 0 : i32
    %c0_i32_0 = arith.constant 0 : i32
    %c0_i32_1 = arith.constant 0 : i32
    return %arg0, %c0_i32, %c0_i32_0 : i32, i32, i32
  }
}

</mosaic_0001>

<bundles_post_ra>
// kernel: tpu_custom_call.1
= control target key start
LH: loop header
LB: loop body
LE: loop exit
PB: predicated region body
PF: predicated region fallthrough
CT: control target
= control target key end

     0   :  { %9 = vsyncpa [#allocation3], 0  ;;  %s8758_s0 = inlined_call_operand.hbm [shape: f32[8,256], index: 0, kind: input, shape index: {}]   ;;  %s8759_s1 = inlined_call_operand.hbm [shape: f32[8,256], index: 1, kind: input, shape index: {}]   ;;  %s8760_s2 = inlined_call_operand.hbm [shape: f32[256,256], index: 2, kind: input, shape index: {}]   ;;  %s8761_s3 = inlined_call_operand.hbm [shape: f32[256,512], index: 3, kind: input, shape index: {}]   ;;  %s8762_s4 = inlined_call_operand.hbm [shape: f32[1,8,128], index: 4, kind: output, shape index: {}]  }
   0x1   :  { %10 = vsyncpa [#allocation6], 0 }
   0x2   :  { %11 = vsyncpa [#allocation9], 0 }
   0x3   :  { %12 = vsyncpa [#allocation4], 0  ;;  %s5922_s15 = smov [#allocation5]   ;;  %s5923_s17 = smov [#allocation2]  }
   0x4   :  { %s29_s16 = sshll.u32 %s5922_s15, 4  ;;  %s19_s18 = sshll.u32 %s5923_s17, 4  ;;  %s30_s16 = int_to_ptr.vmem [resolvable:$true] %s29_s16  ;;  %s20_s18 = int_to_ptr.vmem [resolvable:$true] %s19_s18 }
   0x5   :  { %s5804_s21 = scalar_lea.hbm %s8759_s1, 256 }
   0x6   :  { %p5805_p0 = scmp.ne.s32.totalorder %s8759_s1, %s5804_s21  ;;  %p5808_p1 = scmp.lt.u32.totalorder %s5804_s21, %s8759_s1 }
   0x8   :  { %p5810_p2 = pnand %p5808_p1, %p5805_p0 }
   0xa   :  { %5813 = shalt.err (!%p5810_p2)
}
   0xb   :  { %s5814_s26 = scalar_lea.vmem %s30_s16, 256  ;;  %p5819_p4 = scmp.lt.s32.totalorder %s30_s16, %s30_s16 }
   0xc   :  { %p5815_p3 = scmp.ne.s32.totalorder %s30_s16, %s5814_s26  ;;  %p5820_p5 = scmp.lt.s32.totalorder %s5814_s26, %s5814_s26 }
   0xe   :  { %p5821_p6 = por %p5820_p5, %p5819_p4 }
  0x10   :  { %p5822_p7 = pnand %p5821_p6, %p5815_p3 }
  0x12   :  { %5825 = shalt.err (!%p5822_p7)
}
  0x13   :  { %32 = dma.hbm_to_vmem [thread:$0]  %s8759_s1, 256, %s30_s16, [#allocation6]  }
  0x14   :  { %s5826_s5 = scalar_lea.hbm %s8758_s0, 256 }
  0x15   :  { %p5827_p8 = scmp.ne.s32.totalorder %s8758_s0, %s5826_s5  ;;  %p5830_p9 = scmp.lt.u32.totalorder %s5826_s5, %s8758_s0 }
  0x17   :  { %p5832_p10 = pnand %p5830_p9, %p5827_p8 }
  0x19   :  { %5835 = shalt.err (!%p5832_p10)
}
  0x1a   :  { %s5836_s10 = scalar_lea.vmem %s20_s18, 256  ;;  %p5841_p12 = scmp.lt.s32.totalorder %s20_s18, %s20_s18 }
  0x1b   :  { %p5837_p11 = scmp.ne.s32.totalorder %s20_s18, %s5836_s10  ;;  %p5842_p13 = scmp.lt.s32.totalorder %s5836_s10, %s5836_s10 }
  0x1d   :  { %p5843_p0 = por %p5842_p13, %p5841_p12 }
  0x1f   :  { %p5844_p1 = pnand %p5843_p0, %p5837_p11 }
  0x21   :  { %5847 = shalt.err (!%p5844_p1)
}
  0x22   :  { %22 = dma.hbm_to_vmem [thread:$0]  %s8758_s0, 256, %s20_s18, [#allocation3]  }
  0x23   :  { %s5924_s12 = smov [#allocation7]   ;;  %s5848_s16 = scalar_lea.hbm %s8760_s2, 8192 }
  0x24   :  { %s38_s13 = sshll.u32 %s5924_s12, 4  ;;  %p5849_p2 = scmp.ne.s32.totalorder %s8760_s2, %s5848_s16  ;;  %s39_s13 = int_to_ptr.vmem [resolvable:$true] %s38_s13 }
  0x25   :  { %p5852_p3 = scmp.lt.u32.totalorder %s5848_s16, %s8760_s2 }
  0x27   :  { %p5854_p4 = pnand %p5852_p3, %p5849_p2 }
  0x29   :  { %5857 = shalt.err (!%p5854_p4)
}
  0x2a   :  { %s5858_s22 = scalar_lea.vmem %s39_s13, 8192  ;;  %p5863_p6 = scmp.lt.s32.totalorder %s39_s13, %s39_s13 }
  0x2b   :  { %p5859_p5 = scmp.ne.s32.totalorder %s39_s13, %s5858_s22  ;;  %p5864_p7 = scmp.lt.s32.totalorder %s5858_s22, %s5858_s22 }
  0x2d   :  { %p5865_p8 = por %p5864_p7, %p5863_p6 }
  0x2f   :  { %p5866_p9 = pnand %p5865_p8, %p5859_p5 }
  0x31   :  { %5869 = shalt.err (!%p5866_p9)
}
  0x32   :  { %s5925_s0 = smov 256   ;;  %s5926_s18 = smov 16  }
  0x33   :  { %44 = dma.hbm_to_vmem [thread:$0]  %s8760_s2, 8192, %s39_s13, [#allocation6], %s5925_s0, %s5925_s0, %s5926_s18  }
  0x34   :  { %s5927_s25 = smov [#allocation8]   ;;  %s5870_s29 = scalar_lea.hbm %s8761_s3, 16384 }
  0x35   :  { %s50_s26 = sshll.u32 %s5927_s25, 4  ;;  %p5871_p10 = scmp.ne.s32.totalorder %s8761_s3, %s5870_s29  ;;  %s51_s26 = int_to_ptr.vmem [resolvable:$true] %s50_s26 }
  0x36   :  { %p5874_p11 = scmp.lt.u32.totalorder %s5870_s29, %s8761_s3 }
  0x38   :  { %p5876_p12 = pnand %p5874_p11, %p5871_p10 }
  0x3a   :  { %5879 = shalt.err (!%p5876_p12)
}
  0x3b   :  { %s5880_s8 = scalar_lea.vmem %s51_s26, 16384  ;;  %p5885_p0 = scmp.lt.s32.totalorder %s51_s26, %s51_s26 }
  0x3c   :  { %p5881_p13 = scmp.ne.s32.totalorder %s51_s26, %s5880_s8  ;;  %p5886_p1 = scmp.lt.s32.totalorder %s5880_s8, %s5880_s8 }
  0x3e   :  { %p5887_p2 = por %p5886_p1, %p5885_p0 }
  0x40   :  { %p5888_p3 = pnand %p5887_p2, %p5881_p13 }
  0x42   :  { %5891 = shalt.err (!%p5888_p3)
}
  0x43   :  { %s5928_s2 = smov 512   ;;  %s5929_s9 = smov 32  }
  0x44   :  { %56 = dma.hbm_to_vmem [thread:$0]  %s8761_s3, 16384, %s51_s26, [#allocation9], %s5928_s2, %s5928_s2, %s5929_s9  }
  0x45   :  { %5914 = dma.done.wait [#allocation3], 256  }
  0x46   :  { %5915 = vsyncadd [#allocation3], 4294967040 }
  0x47   :  { %5916 = dma.done.wait [#allocation6], 8448  }
  0x48   :  { %5917 = vsyncadd [#allocation6], 4294958848 }
  0x49   :  { %5918 = dma.done.wait [#allocation9], 16384  }
  0x4a   :  { %5919 = vsyncadd [#allocation9], 4294950912  ;;  %v155_v0 = vld [vmem:[#allocation8 + $0x8] sm:$0xff]  ;;  %v154_v2 = vld [vmem:[#allocation8] sm:$0xff]  ;;  %vm131_vm0 = vcmask 7168   ;;  %s5930_s15 = smov [#allocation10]  }
  0x4b   :  { %v159_v1 = vld [vmem:[#allocation8 + $0x28] sm:$0xff]  ;;  %v282_v3 = vand.u32 4294901760, %v155_v0  ;;  %v158_v5 = vld [vmem:[#allocation8 + $0x20] sm:$0xff]  ;;  %v284_v6 = vand.u32 4294901760, %v154_v2  ;;  %s4538_s16 = sshll.u32 %s5930_s15, 4  ;;  %s4539_s16 = int_to_ptr.vmem [resolvable:$true] %s4538_s16 }
  0x4c   :  { %v286_v4 = vand.u32 4294901760, %v159_v1  ;;  %v163_v7 = vld [vmem:[#allocation8 + $0x48] sm:$0xff]  ;;  %v288_v9 = vand.u32 4294901760, %v158_v5  ;;  %v162_v12 = vld [vmem:[#allocation8 + $0x40] sm:$0xff]  ;;  %s5892_s17 = scalar_lea.vmem %s4539_s16, 128  ;;  %p5897_p5 = scmp.lt.s32.totalorder %s4539_s16, %s4539_s16 }
  0x4d   :  { %v167_v8 = vld [vmem:[#allocation8 + $0x68] sm:$0xff]  ;;  %v290_v10 = vand.u32 4294901760, %v163_v7  ;;  %v166_v13 = vld [vmem:[#allocation8 + $0x60] sm:$0xff]  ;;  %v6006_v16 = vsub.f32 %v155_v0, %v282_v3  ;;  %v6010_v18 = vsub.f32 %v154_v2, %v284_v6  ;;  %v292_v29 = vand.u32 4294901760, %v162_v12  ;;  %p5893_p4 = scmp.ne.s32.totalorder %s4539_s16, %s5892_s17  ;;  %p5898_p6 = scmp.lt.s32.totalorder %s5892_s17, %s5892_s17 }
  0x4e   :  { %v294_v11 = vand.u32 4294901760, %v167_v8  ;;  %v171_v14 = vld [vmem:[#allocation8 + $0x88] sm:$0xff]  ;;  %v6004_v15 = vpack.c.bf16 %v286_v4, %v282_v3  ;;  %v6008_v17 = vsub.f32 %v159_v1, %v286_v4  ;;  %v170_v20 = vld [vmem:[#allocation8 + $0x80] sm:$0xff]  ;;  %v6012_v22 = vpack.c.bf16 %v288_v9, %v284_v6 }
  0x4f   :  { %9427 = vst [vmem:[#allocation16_spill] sm:$0xff] %v6006_v16  ;;  %v175_v19 = vld [vmem:[#allocation8 + $0xa8] sm:$0xff]  ;;  %v174_v21 = vld [vmem:[#allocation8 + $0xa0] sm:$0xff]  ;;  %v6014_v23 = vsub.f32 %v158_v5, %v288_v9  ;;  %v6018_v25 = vsub.f32 %v163_v7, %v290_v10  ;;  %v296_v30 = vand.u32 4294901760, %v166_v13  ;;  %v298_v31 = vand.u32 4294901760, %v171_v14  ;;  %p5899_p7 = por %p5898_p6, %p5897_p5 }
  0x50   :  { %9426 = vst [vmem:[#allocation15_spill] sm:$0xff] %v6004_v15  ;;  %9428 = vst [vmem:[#allocation17_spill] sm:$0xff] %v6008_v17  ;;  %v6016_v24 = vpack.c.bf16 %v294_v11, %v290_v10  ;;  %v179_v26 = vld [vmem:[#allocation8 + $0xc8] sm:$0xff]  ;;  %4550 = vmatprep.subr.bf16.mxu1 %v6004_v15  ;;  %4742 = vmatprep.subr.bf16.mxu0 %v6004_v15  ;;  %v6022_v28 = vsub.f32 %v167_v8, %v294_v11  ;;  %v302_v32 = vand.u32 4294901760, %v175_v19  ;;  %v178_v36 = vld [vmem:[#allocation8 + $0xc0] sm:$0xff] }
  0x51   :  { %9429 = vst [vmem:[#allocation18_spill] sm:$0xff] %v6012_v22  ;;  %9430 = vst [vmem:[#allocation19_spill] sm:$0xff] %v6014_v23  ;;  %v183_v27 = vld [vmem:[#allocation8 + $0xe8] sm:$0xff]  ;;  %4552 = vmatpush1.bf16.msra.mxu1 %v6012_v22  ;;  %4744 = vmatpush1.bf16.msra.mxu0 %v6012_v22  ;;  %v300_v33 = vand.u32 4294901760, %v170_v20  ;;  %v304_v34 = vand.u32 4294901760, %v174_v21  ;;  %v306_v35 = vand.u32 4294901760, %v179_v26  ;;  %v6028_v37 = vpack.c.bf16 %v296_v30, %v292_v29  ;;  %p5900_p8 = pnand %p5899_p7, %p5893_p4 }
  0x52   :  { %9431 = vst [vmem:[#allocation20_spill] sm:$0xff] %v6016_v24  ;;  %9432 = vst [vmem:[#allocation21_spill] sm:$0xff] %v6022_v28  ;;  %4554 = vmatprep.subr.bf16.mxu1 %v6016_v24  ;;  %4746 = vmatprep.subr.bf16.mxu0 %v6016_v24  ;;  %v6030_v38 = vsub.f32 %v162_v12, %v292_v29  ;;  %v6032_v39 = vsub.f32 %v166_v13, %v296_v30  ;;  %v310_v40 = vand.u32 4294901760, %v183_v27  ;;  %v182_v41 = vld [vmem:[#allocation8 + $0xe0] sm:$0xff]  ;;  %v187_v42 = vld [vmem:[#allocation8 + $0x108] sm:$0xff] }
  0x53   :  { %9433 = vst [vmem:[#allocation22_spill] sm:$0xff] %v6028_v37  ;;  %v191_v43 = vld [vmem:[#allocation8 + $0x128] sm:$0xff]  ;;  %v6034_v44 = vpack.c.bf16 %v302_v32, %v298_v31  ;;  %v6036_v45 = vsub.f32 %v171_v14, %v298_v31  ;;  %v6038_v46 = vsub.f32 %v175_v19, %v302_v32  ;;  %v6040_v47 = vpack.c.bf16 %v304_v34, %v300_v33  ;;  %v186_v48 = vld [vmem:[#allocation8 + $0x100] sm:$0xff] }
  0x54   :  { %9434 = vst [vmem:[#allocation23_spill] sm:$0xff] %v6030_v38  ;;  %9435 = vst [vmem:[#allocation24_spill] sm:$0xff] %v6032_v39  ;;  %v190_v49 = vld [vmem:[#allocation8 + $0x120] sm:$0xff]  ;;  %v195_v50 = vld [vmem:[#allocation8 + $0x148] sm:$0xff]  ;;  %v6042_v51 = vsub.f32 %v170_v20, %v300_v33  ;;  %v6044_v52 = vsub.f32 %v174_v21, %v304_v34  ;;  %v6046_v53 = vpack.c.bf16 %v310_v40, %v306_v35  ;;  %v308_v56 = vand.u32 4294901760, %v178_v36 }
  0x55   :  { %9436 = vst [vmem:[#allocation25_spill] sm:$0xff] %v6034_v44  ;;  %9437 = vst [vmem:[#allocation26_spill] sm:$0xff] %v6036_v45  ;;  %v6048_v54 = vsub.f32 %v179_v26, %v306_v35  ;;  %4556 = vmatpush1.bf16.msra.mxu1 %v6028_v37  ;;  %4748 = vmatpush1.bf16.msra.mxu0 %v6028_v37  ;;  %v6052_v55 = vsub.f32 %v183_v27, %v310_v40  ;;  %v312_v57 = vand.u32 4294901760, %v182_v41  ;;  %v199_v59 = vld [vmem:[#allocation8 + $0x168] sm:$0xff]  ;;  %v194_v0 = vld [vmem:[#allocation8 + $0x140] sm:$0xff] }
  0x56   :  { %9438 = vst [vmem:[#allocation27_spill] sm:$0xff] %v6038_v46  ;;  %9439 = vst [vmem:[#allocation28_spill] sm:$0xff] %v6040_v47  ;;  %v314_v58 = vand.u32 4294901760, %v187_v42  ;;  %4558 = vmatprep.subr.bf16.mxu1 %v6034_v44  ;;  %4750 = vmatprep.subr.bf16.mxu0 %v6034_v44  ;;  %v318_v60 = vand.u32 4294901760, %v191_v43  ;;  %v316_v61 = vand.u32 4294901760, %v186_v48  ;;  %v320_v62 = vand.u32 4294901760, %v190_v49 }
  0x57   :  { %9440 = vst [vmem:[#allocation29_spill] sm:$0xff] %v6042_v51  ;;  %9441 = vst [vmem:[#allocation30_spill] sm:$0xff] %v6046_v53  ;;  %v322_v63 = vand.u32 4294901760, %v195_v50  ;;  %v198_v1 = vld [vmem:[#allocation8 + $0x160] sm:$0xff]  ;;  %v6056_v2 = vpack.c.bf16 %v312_v57, %v308_v56  ;;  %v6058_v3 = vsub.f32 %v178_v36, %v308_v56  ;;  %v6060_v4 = vsub.f32 %v182_v41, %v312_v57  ;;  %v203_v6 = vld [vmem:[#allocation8 + $0x188] sm:$0xff] }
  0x58   :  { %9442 = vst [vmem:[#allocation31_spill] sm:$0xff] %v6048_v54  ;;  %9443 = vst [vmem:[#allocation32_spill] sm:$0xff] %v6052_v55  ;;  %v6062_v5 = vsub.f32 %v187_v42, %v314_v58  ;;  %v207_v7 = vld [vmem:[#allocation8 + $0x1a8] sm:$0xff]  ;;  %v202_v8 = vld [vmem:[#allocation8 + $0x180] sm:$0xff]  ;;  %v6064_v9 = vpack.c.bf16 %v318_v60, %v314_v58  ;;  %v6066_v10 = vsub.f32 %v191_v43, %v318_v60  ;;  %v326_v19 = vand.u32 4294901760, %v199_v59 }
  0x59   :  { %9444 = vst [vmem:[#allocation33_spill] sm:$0xff] %v6056_v2  ;;  %9445 = vst [vmem:[#allocation34_spill] sm:$0xff] %v6058_v3  ;;  %v6068_v11 = vpack.c.bf16 %v320_v62, %v316_v61  ;;  %v6070_v12 = vsub.f32 %v186_v48, %v316_v61  ;;  %v206_v13 = vld [vmem:[#allocation8 + $0x1a0] sm:$0xff]  ;;  %4560 = vmatpush1.bf16.msra.mxu1 %v6040_v47  ;;  %4752 = vmatpush1.bf16.msra.mxu0 %v6040_v47  ;;  %v324_v21 = vand.u32 4294901760, %v194_v0  ;;  %v211_v31 = vld [vmem:[#allocation8 + $0x1c8] sm:$0xff] }
  0x5a   :  { %9446 = vst [vmem:[#allocation35_spill] sm:$0xff] %v6060_v4  ;;  %9447 = vst [vmem:[#allocation36_spill] sm:$0xff] %v6062_v5  ;;  %v6074_v14 = vsub.f32 %v190_v49, %v320_v62  ;;  %v6076_v20 = vsub.f32 %v195_v50, %v322_v63  ;;  %4562 = vmatprep.subr.bf16.mxu1 %v6046_v53  ;;  %4754 = vmatprep.subr.bf16.mxu0 %v6046_v53  ;;  %v328_v26 = vand.u32 4294901760, %v198_v1  ;;  %v215_v36 = vld [vmem:[#allocation8 + $0x1e8] sm:$0xff]  ;;  %v210_v40 = vld [vmem:[#allocation8 + $0x1c0] sm:$0xff] }
  0x5b   :  { %9448 = vst [vmem:[#allocation37_spill] sm:$0xff] %v6064_v9  ;;  %9449 = vst [vmem:[#allocation38_spill] sm:$0xff] %v6066_v10  ;;  %v330_v27 = vand.u32 4294901760, %v203_v6  ;;  %v334_v29 = vand.u32 4294901760, %v207_v7  ;;  %v332_v30 = vand.u32 4294901760, %v202_v8  ;;  %v6080_v32 = vpack.c.bf16 %v326_v19, %v322_v63  ;;  %v214_v41 = vld [vmem:[#allocation8 + $0x1e0] sm:$0xff] }
  0x5c   :  { %9450 = vst [vmem:[#allocation39_spill] sm:$0xff] %v6068_v11  ;;  %9451 = vst [vmem:[#allocation40_spill] sm:$0xff] %v6070_v12  ;;  %v6082_v33 = vsub.f32 %v199_v59, %v326_v19  ;;  %v6084_v34 = vsub.f32 %v194_v0, %v324_v21  ;;  %v336_v35 = vand.u32 4294901760, %v206_v13  ;;  %v6086_v42 = vpack.c.bf16 %v328_v26, %v324_v21  ;;  %v219_v50 = vld [vmem:[#allocation8 + $0x208] sm:$0xff]  ;;  %v218_v57 = vld [vmem:[#allocation8 + $0x200] sm:$0xff] }
  0x5d   :  { %9452 = vst [vmem:[#allocation41_spill] sm:$0xff] %v6074_v14  ;;  %9453 = vst [vmem:[#allocation42_spill] sm:$0xff] %v6076_v20  ;;  %v6088_v43 = vsub.f32 %v198_v1, %v328_v26  ;;  %v6090_v48 = vpack.c.bf16 %v334_v29, %v330_v27  ;;  %v6092_v49 = vsub.f32 %v203_v6, %v330_v27  ;;  %v223_v56 = vld [vmem:[#allocation8 + $0x228] sm:$0xff]  ;;  %4564 = vmatpush1.bf16.msra.mxu1 %v6056_v2  ;;  %v222_v6 = vld [vmem:[#allocation8 + $0x220] sm:$0xff] }
  0x5e   :  { %9454 = vst [vmem:[#allocation43_spill] sm:$0xff] %v6080_v32  ;;  %9455 = vst [vmem:[#allocation44_spill] sm:$0xff] %v6082_v33  ;;  %4756 = vmatpush1.bf16.msra.mxu0 %v6056_v2  ;;  %v6096_v58 = vsub.f32 %v207_v7, %v334_v29  ;;  %v6098_v59 = vpack.c.bf16 %v336_v35, %v332_v30  ;;  %v6100_v60 = vsub.f32 %v202_v8, %v332_v30  ;;  %v227_v27 = vld [vmem:[#allocation8 + $0x248] sm:$0xff]  ;;  %v238_v24 = vld [vmem:[#allocation8 + $0x2a0] sm:$0xff] }
  0x5f   :  { %9456 = vst [vmem:[#allocation45_spill] sm:$0xff] %v6084_v34  ;;  %9457 = vst [vmem:[#allocation46_spill] sm:$0xff] %v6086_v42  ;;  %v338_v61 = vand.u32 4294901760, %v211_v31  ;;  %4566 = vmatprep.subr.bf16.mxu1 %v6064_v9  ;;  %4758 = vmatprep.subr.bf16.mxu0 %v6064_v9  ;;  %v6104_v62 = vsub.f32 %v206_v13, %v336_v35  ;;  %v342_v63 = vand.u32 4294901760, %v215_v36  ;;  %v340_v0 = vand.u32 4294901760, %v210_v40  ;;  %v231_v29 = vld [vmem:[#allocation8 + $0x268] sm:$0xff] }
  0x60   :  { %9458 = vst [vmem:[#allocation47_spill] sm:$0xff] %v6088_v43  ;;  %9459 = vst [vmem:[#allocation48_spill] sm:$0xff] %v6090_v48  ;;  %v344_v1 = vand.u32 4294901760, %v214_v41  ;;  %v346_v21 = vand.u32 4294901760, %v219_v50  ;;  %v350_v7 = vand.u32 4294901760, %v223_v56  ;;  %v348_v26 = vand.u32 4294901760, %v218_v57 }
  0x61   :  { %9460 = vst [vmem:[#allocation49_spill] sm:$0xff] %v6092_v49  ;;  %9461 = vst [vmem:[#allocation50_spill] sm:$0xff] %v6096_v58  ;;  %v6106_v19 = vsub.f32 %v211_v31, %v338_v61  ;;  %v6108_v8 = vpack.c.bf16 %v342_v63, %v338_v61  ;;  %v6110_v30 = vsub.f32 %v215_v36, %v342_v63  ;;  %v226_v13 = vld [vmem:[#allocation8 + $0x240] sm:$0xff]  ;;  %4568 = vmatpush1.bf16.msra.mxu1 %v6068_v11  ;;  %v235_v44 = vld [vmem:[#allocation8 + $0x288] sm:$0xff] }
  0x62   :  { %9462 = vst [vmem:[#allocation51_spill] sm:$0xff] %v6098_v59  ;;  %9463 = vst [vmem:[#allocation52_spill] sm:$0xff] %v6104_v62  ;;  %v6112_v2 = vpack.c.bf16 %v344_v1, %v340_v0  ;;  %v6114_v9 = vsub.f32 %v210_v40, %v340_v0  ;;  %v230_v35 = vld [vmem:[#allocation8 + $0x260] sm:$0xff]  ;;  %4760 = vmatpush1.bf16.msra.mxu0 %v6068_v11  ;;  %v6118_v31 = vsub.f32 %v214_v41, %v344_v1  ;;  %v239_v37 = vld [vmem:[#allocation8 + $0x2a8] sm:$0xff] }
  0x63   :  { %9464 = vst [vmem:[#allocation53_spill] sm:$0xff] %v6106_v19  ;;  %9465 = vst [vmem:[#allocation54_spill] sm:$0xff] %v6108_v8  ;;  %v6120_v53 = vpack.c.bf16 %v350_v7, %v346_v21  ;;  %v6122_v47 = vsub.f32 %v219_v50, %v346_v21  ;;  %v352_v61 = vand.u32 4294901760, %v222_v6  ;;  %4570 = vmatprep.subr.bf16.mxu1 %v6080_v32  ;;  %4762 = vmatprep.subr.bf16.mxu0 %v6080_v32  ;;  %v234_v21 = vld [vmem:[#allocation8 + $0x280] sm:$0xff]  ;;  %v243_v22 = vld [vmem:[#allocation8 + $0x2c8] sm:$0xff] }
  0x64   :  { %9466 = vst [vmem:[#allocation55_spill] sm:$0xff] %v6110_v30  ;;  %9467 = vst [vmem:[#allocation56_spill] sm:$0xff] %v6112_v2  ;;  %v6126_v36 = vsub.f32 %v223_v56, %v350_v7  ;;  %v6128_v40 = vsub.f32 %v218_v57, %v348_v26  ;;  %v354_v63 = vand.u32 4294901760, %v227_v27  ;;  %v358_v0 = vand.u32 4294901760, %v231_v29  ;;  %v247_v7 = vld [vmem:[#allocation8 + $0x2e8] sm:$0xff]  ;;  %v242_v32 = vld [vmem:[#allocation8 + $0x2c0] sm:$0xff] }
  0x65   :  { %9468 = vst [vmem:[#allocation57_spill] sm:$0xff] %v6114_v9  ;;  %9469 = vst [vmem:[#allocation58_spill] sm:$0xff] %v6118_v31  ;;  %v6130_v11 = vpack.c.bf16 %v352_v61, %v348_v26  ;;  %v6132_v41 = vsub.f32 %v222_v6, %v352_v61  ;;  %v356_v1 = vand.u32 4294901760, %v226_v13  ;;  %v360_v50 = vand.u32 4294901760, %v230_v35  ;;  %4572 = vmatpush1.bf16.msra.mxu1 %v6086_v42  ;;  %v263_v31 = vld [vmem:[#allocation8 + $0x368] sm:$0xff]  ;;  %v266_v9 = vld [vmem:[#allocation8 + $0x380] sm:$0xff] }
  0x66   :  { %9470 = vst [vmem:[#allocation59_spill] sm:$0xff] %v6120_v53  ;;  %9471 = vst [vmem:[#allocation60_spill] sm:$0xff] %v6122_v47  ;;  %v6134_v15 = vpack.c.bf16 %v358_v0, %v354_v63  ;;  %v6136_v47 = vsub.f32 %v227_v27, %v354_v63  ;;  %v6138_v56 = vsub.f32 %v231_v29, %v358_v0  ;;  %v362_v57 = vand.u32 4294901760, %v235_v44  ;;  %v270_v30 = vld [vmem:[#allocation8 + $0x3a0] sm:$0xff] }
  0x67   :  { %9472 = vst [vmem:[#allocation61_spill] sm:$0xff] %v6126_v36  ;;  %9473 = vst [vmem:[#allocation62_spill] sm:$0xff] %v6128_v40  ;;  %4764 = vmatpush1.bf16.msra.mxu0 %v6086_v42  ;;  %v6142_v6 = vpack.c.bf16 %v360_v50, %v356_v1  ;;  %v6144_v26 = vsub.f32 %v226_v13, %v356_v1  ;;  %v6146_v61 = vsub.f32 %v230_v35, %v360_v50  ;;  %v255_v35 = vld [vmem:[#allocation8 + $0x328] sm:$0xff]  ;;  %v250_v50 = vld [vmem:[#allocation8 + $0x300] sm:$0xff] }
  0x68   :  { %9474 = vst [vmem:[#allocation63_spill] sm:$0xff] %v6130_v11  ;;  %9475 = vst [vmem:[#allocation64_spill] sm:$0xff] %v6132_v41  ;;  %v366_v41 = vand.u32 4294901760, %v239_v37  ;;  %4574 = vmatprep.subr.bf16.mxu1 %v6090_v48  ;;  %4766 = vmatprep.subr.bf16.mxu0 %v6090_v48  ;;  %v6150_v27 = vsub.f32 %v235_v44, %v362_v57  ;;  %v364_v29 = vand.u32 4294901760, %v234_v21  ;;  %v368_v63 = vand.u32 4294901760, %v238_v24 }
  0x69   :  { %9476 = vst [vmem:[#allocation65_spill] sm:$0xff] %v6134_v15  ;;  %9477 = vst [vmem:[#allocation66_spill] sm:$0xff] %v6136_v47  ;;  %v370_v0 = vand.u32 4294901760, %v243_v22  ;;  %v251_v47 = vld [vmem:[#allocation8 + $0x308] sm:$0xff]  ;;  %v374_v13 = vand.u32 4294901760, %v247_v7  ;;  %v372_v1 = vand.u32 4294901760, %v242_v32  ;;  %4576 = vmatpush1.bf16.msra.mxu1 %v6098_v59 }
  0x6a   :  { %9478 = vst [vmem:[#allocation67_spill] sm:$0xff] %v6138_v56  ;;  %9479 = vst [vmem:[#allocation68_spill] sm:$0xff] %v6142_v6  ;;  %v246_v56 = vld [vmem:[#allocation8 + $0x2e0] sm:$0xff]  ;;  %v6152_v40 = vpack.c.bf16 %v366_v41, %v362_v57  ;;  %v6154_v42 = vsub.f32 %v239_v37, %v366_v41  ;;  %v6158_v36 = vsub.f32 %v234_v21, %v364_v29  ;;  %4578 = vmatprep.subr.bf16.mxu1 %v6108_v8 }
  0x6b   :  { %9480 = vst [vmem:[#allocation69_spill] sm:$0xff] %v6144_v26  ;;  %9481 = vst [vmem:[#allocation70_spill] sm:$0xff] %v6146_v61  ;;  %v254_v61 = vld [vmem:[#allocation8 + $0x320] sm:$0xff]  ;;  %v6156_v26 = vpack.c.bf16 %v368_v63, %v364_v29  ;;  %v6160_v44 = vsub.f32 %v238_v24, %v368_v63  ;;  %v6162_v48 = vsub.f32 %v243_v22, %v370_v0  ;;  %4768 = vmatpush1.bf16.msra.mxu0 %v6098_v59 }
  0x6c   :  { %9482 = vst [vmem:[#allocation71_spill] sm:$0xff] %v6150_v27  ;;  %9483 = vst [vmem:[#allocation72_spill] sm:$0xff] %v6152_v40  ;;  %v259_v27 = vld [vmem:[#allocation8 + $0x348] sm:$0xff]  ;;  %v6166_v37 = vpack.c.bf16 %v374_v13, %v370_v0  ;;  %v6168_v41 = vsub.f32 %v247_v7, %v374_v13  ;;  %v376_v57 = vand.u32 4294901760, %v246_v56  ;;  %4770 = vmatprep.subr.bf16.mxu0 %v6108_v8  ;;  %v378_v24 = vand.u32 4294901760, %v251_v47  ;;  %v258_v63 = vld [vmem:[#allocation8 + $0x340] sm:$0xff] }
  0x6d   :  { %9484 = vst [vmem:[#allocation73_spill] sm:$0xff] %v6154_v42  ;;  %9485 = vst [vmem:[#allocation74_spill] sm:$0xff] %v6156_v26  ;;  %v6170_v42 = vsub.f32 %v242_v32, %v372_v1  ;;  %v382_v22 = vand.u32 4294901760, %v255_v35  ;;  %v380_v21 = vand.u32 4294901760, %v250_v50  ;;  %v384_v29 = vand.u32 4294901760, %v254_v61  ;;  %v262_v7 = vld [vmem:[#allocation8 + $0x360] sm:$0xff]  ;;  %4580 = vmatpush1.bf16.msra.mxu1 %v6112_v2 }
  0x6e   :  { %9486 = vst [vmem:[#allocation75_spill] sm:$0xff] %v6158_v36  ;;  %9487 = vst [vmem:[#allocation76_spill] sm:$0xff] %v6160_v44  ;;  %v6176_v44 = vsub.f32 %v246_v56, %v376_v57  ;;  %v386_v0 = vand.u32 4294901760, %v259_v27  ;;  %v390_v59 = vand.u32 4294901760, %v263_v31  ;;  %v267_v13 = vld [vmem:[#allocation8 + $0x388] sm:$0xff]  ;;  %v6180_v32 = vsub.f32 %v251_v47, %v378_v24  ;;  %4582 = vmatprep.subr.bf16.mxu1 %v6120_v53 }
  0x6f   :  { %9488 = vst [vmem:[#allocation77_spill] sm:$0xff] %v6162_v48  ;;  %9489 = vst [vmem:[#allocation78_spill] sm:$0xff] %v6166_v37  ;;  %v6174_v48 = vpack.c.bf16 %v376_v57, %v372_v1  ;;  %v6184_v8 = vpack.c.bf16 %v384_v29, %v380_v21  ;;  %v271_v36 = vld [vmem:[#allocation8 + $0x3a8] sm:$0xff]  ;;  %4772 = vmatpush1.bf16.msra.mxu0 %v6112_v2  ;;  %v6188_v56 = vsub.f32 %v250_v50, %v380_v21 }
  0x70   :  { %9490 = vst [vmem:[#allocation79_spill] sm:$0xff] %v6168_v41  ;;  %9491 = vst [vmem:[#allocation80_spill] sm:$0xff] %v6170_v42  ;;  %v6178_v41 = vpack.c.bf16 %v382_v22, %v378_v24  ;;  %v6182_v42 = vsub.f32 %v255_v35, %v382_v22  ;;  %v6190_v1 = vsub.f32 %v254_v61, %v384_v29  ;;  %v275_v47 = vld [vmem:[#allocation8 + $0x3c8] sm:$0xff]  ;;  %4774 = vmatprep.subr.bf16.mxu0 %v6120_v53  ;;  %v274_v29 = vld [vmem:[#allocation8 + $0x3c0] sm:$0xff] }
  0x71   :  { %9492 = vst [vmem:[#allocation81_spill] sm:$0xff] %v6174_v48  ;;  %9493 = vst [vmem:[#allocation82_spill] sm:$0xff] %v6176_v44  ;;  %v6192_v57 = vpack.c.bf16 %v390_v59, %v386_v0  ;;  %v388_v44 = vand.u32 4294901760, %v258_v63  ;;  %v6196_v35 = vsub.f32 %v259_v27, %v386_v0  ;;  %v6198_v24 = vsub.f32 %v263_v31, %v390_v59  ;;  %v278_v27 = vld [vmem:[#allocation8 + $0x3e0] sm:$0xff]  ;;  %v70_v0 = vld [vmem:[#allocation2 + $0x8] sm:$0xff] }
  0x72   :  { %9494 = vst [vmem:[#allocation83_spill] sm:$0xff] %v6178_v41  ;;  %9495 = vst [vmem:[#allocation84_spill] sm:$0xff] %v6180_v32  ;;  %v392_v22 = vand.u32 4294901760, %v262_v7  ;;  %v279_v32 = vld [vmem:[#allocation8 + $0x3e8] sm:$0xff]  ;;  %v398_v50 = vand.u32 4294901760, %v271_v36  ;;  %v396_v61 = vand.u32 4294901760, %v266_v9  ;;  %4584 = vmatpush1.bf16.msra.mxu1 %v6130_v11 }
  0x73   :  { %9496 = vst [vmem:[#allocation85_spill] sm:$0xff] %v6182_v42  ;;  %9497 = vst [vmem:[#allocation86_spill] sm:$0xff] %v6184_v8  ;;  %v394_v42 = vand.u32 4294901760, %v267_v13  ;;  %v6200_v2 = vsub.f32 %v258_v63, %v388_v44  ;;  %v400_v21 = vand.u32 4294901760, %v270_v30  ;;  %v402_v53 = vand.u32 4294901760, %v275_v47  ;;  %v72_v59 = vld [vmem:[#allocation5 + $0x8] sm:$0xff]  ;;  %4776 = vmatpush1.bf16.msra.mxu0 %v6130_v11  ;;  %4586 = vmatprep.subr.bf16.mxu1 %v6134_v15 }
  0x74   :  { %9498 = vst [vmem:[#allocation87_spill] sm:$0xff] %v6188_v56  ;;  %9499 = vst [vmem:[#allocation88_spill] sm:$0xff] %v6190_v1  ;;  %v6202_v1 = vpack.c.bf16 %v392_v22, %v388_v44  ;;  %v6204_v56 = vsub.f32 %v262_v7, %v392_v22  ;;  %v6212_v63 = vsub.f32 %v271_v36, %v398_v50  ;;  %v406_v44 = vand.u32 4294901760, %v279_v32  ;;  %v71_v7 = vld [vmem:[#allocation5] sm:$0xff] }
  0x75   :  { %9500 = vst [vmem:[#allocation89_spill] sm:$0xff] %v6192_v57  ;;  %9501 = vst [vmem:[#allocation90_spill] sm:$0xff] %v6196_v35  ;;  %v6206_v19 = vsub.f32 %v267_v13, %v394_v42  ;;  %v6210_v31 = vpack.c.bf16 %v398_v50, %v394_v42  ;;  %4778 = vmatprep.subr.bf16.mxu0 %v6134_v15  ;;  %v6218_v13 = vsub.f32 %v266_v9, %v396_v61 }
  0x76   :  { %9502 = vst [vmem:[#allocation91_spill] sm:$0xff] %v6198_v24  ;;  %9503 = vst [vmem:[#allocation92_spill] sm:$0xff] %v6200_v2  ;;  %v6214_v2 = vpack.c.bf16 %v400_v21, %v396_v61  ;;  %v69_v24 = vld [vmem:[#allocation2] sm:$0xff]  ;;  %v6220_v22 = vsub.f32 %v270_v30, %v400_v21  ;;  %v404_v11 = vand.u32 4294901760, %v274_v29  ;;  %v6224_v42 = vpack.c.bf16 %v406_v44, %v402_v53 }
  0x77   :  { %9504 = vst [vmem:[#allocation93_spill] sm:$0xff] %v6202_v1  ;;  %9505 = vst [vmem:[#allocation94_spill] sm:$0xff] %v6204_v56  ;;  %v6226_v36 = vsub.f32 %v279_v32, %v406_v44  ;;  %v408_v50 = vand.u32 4294901760, %v278_v27  ;;  %v429_v35 = vand.u32 4294901760, %v6006_v16  ;;  %v441_v15 = vand.u32 4294901760, %v6008_v17  ;;  %4588 = vmatpush1.bf16.msra.mxu1 %v6142_v6  ;;  %4780 = vmatpush1.bf16.msra.mxu0 %v6142_v6 }
  0x78   :  { %9506 = vst [vmem:[#allocation95_spill] sm:$0xff] %v6206_v19  ;;  %9507 = vst [vmem:[#allocation96_spill] sm:$0xff] %v6210_v31  ;;  %v6222_v19 = vsub.f32 %v275_v47, %v402_v53  ;;  %v6230_v56 = vsub.f32 %v274_v29, %v404_v11  ;;  %v6234_v9 = vsub.f32 %v69_v24, %v71_v7  ;;  %v435_v47 = vand.u32 4294901760, %v6010_v18 }
  0x79   :  { %9508 = vst [vmem:[#allocation97_spill] sm:$0xff] %v6212_v63  ;;  %9509 = vst [vmem:[#allocation98_spill] sm:$0xff] %v6214_v2  ;;  %v6228_v63 = vsub.f32 %v70_v0, %v72_v59  ;;  %v6238_v30 = vpack.c.bf16 %v408_v50, %v404_v11  ;;  %v6240_v53 = vsub.f32 %v278_v27, %v408_v50  ;;  %4590 = vmatprep.subr.bf16.mxu1 %v6152_v40 }
  0x7a   :  { %9510 = vst [vmem:[#allocation99_spill] sm:$0xff] %v6218_v13  ;;  %9511 = vst [vmem:[#allocation100_spill] sm:$0xff] %v6224_v42  ;;  %4782 = vmatprep.subr.bf16.mxu0 %v6152_v40  ;;  %v430_v24 = vsub.f32 %v6006_v16, %v429_v35  ;;  %v442_v61 = vsub.f32 %v6008_v17, %v441_v15  ;;  %v6250_v21 = vpack.c.bf16 %v441_v15, %v429_v35  ;;  %v9563_v17 = vld [vmem:[#allocation29_spill] sm:$0xff] }
  0x7b   :  { %9512 = vst [vmem:[#allocation101_spill] sm:$0xff] %v6228_v63  ;;  %9513 = vst [vmem:[#allocation102_spill] sm:$0xff] %v6230_v56  ;;  %v6243_v32 = vand.u32 4294901760, %v6228_v63  ;;  %v6253_v11 = vand.u32 4294901760, %v6234_v9  ;;  %v436_v27 = vsub.f32 %v6010_v18, %v435_v47  ;;  %v447_v0 = vand.u32 4294901760, %v6014_v23  ;;  %4592 = vmatpush1.bf16.msra.mxu1 %v6156_v26  ;;  %4784 = vmatpush1.bf16.msra.mxu0 %v6156_v26 }
  0x7c   :  { %9514 = vst [vmem:[#allocation103_spill] sm:$0xff] %v6234_v9  ;;  %9515 = vst [vmem:[#allocation104_spill] sm:$0xff] %v6238_v30  ;;  %v453_v59 = vand.u32 4294901760, %v6018_v25  ;;  %v431_v44 = vand.u32 4294901760, %v430_v24  ;;  %v443_v7 = vand.u32 4294901760, %v442_v61  ;;  %v465_v15 = vand.u32 4294901760, %v6022_v28  ;;  %4594 = vmatprep.subr.bf16.mxu1 %v6166_v37  ;;  %4786 = vmatprep.subr.bf16.mxu0 %v6166_v37 }
  0x7d   :  { %9516 = vst [vmem:[#allocation105_spill] sm:$0xff] %v6243_v32  ;;  %9517 = vst [vmem:[#allocation106_spill] sm:$0xff] %v6253_v11  ;;  %v6257_v29 = vsub.f32 %v6228_v63, %v6243_v32  ;;  %v6264_v50 = vsub.f32 %v6234_v9, %v6253_v11  ;;  %v437_v63 = vand.u32 4294901760, %v436_v27  ;;  %v448_v40 = vsub.f32 %v6014_v23, %v447_v0 }
  0x7e   :  { %v6273_v6 = vpack.c.bf16 %v447_v0, %v435_v47  ;;  %v6277_v24 = vpack.c.bf16 %v443_v7, %v431_v44  ;;  %v454_v9 = vsub.f32 %v6018_v25, %v453_v59  ;;  %v466_v26 = vsub.f32 %v6022_v28, %v465_v15 }
  0x7f   :  { %9518 = vst [vmem:[#allocation107_spill] sm:$0xff] %v6257_v29  ;;  %9519 = vst [vmem:[#allocation108_spill] sm:$0xff] %v6264_v50  ;;  %v6270_v35 = vand.u32 4294901760, %v6257_v29  ;;  %v6280_v61 = vand.u32 4294901760, %v6264_v50  ;;  %v449_v47 = vand.u32 4294901760, %v448_v40  ;;  %v6287_v0 = vpack.c.bf16 %v465_v15, %v453_v59  ;;  %4596 = vmatpush1.bf16.msra.mxu1 %v6174_v48  ;;  %4788 = vmatpush1.bf16.msra.mxu0 %v6174_v48 }
  0x80   :  { %v459_v11 = vand.u32 4294901760, %v6030_v38  ;;  %v455_v7 = vand.u32 4294901760, %v454_v9  ;;  %v467_v37 = vand.u32 4294901760, %v466_v26  ;;  %v471_v23 = vand.u32 4294901760, %v6032_v39  ;;  %4598 = vmatprep.subr.bf16.mxu1 %v6178_v41  ;;  %4790 = vmatprep.subr.bf16.mxu0 %v6178_v41 }
  0x81   :  { %9520 = vst [vmem:[#allocation109_spill] sm:$0xff] %v6270_v35  ;;  %9521 = vst [vmem:[#allocation110_spill] sm:$0xff] %v6280_v61  ;;  %v413_v27 = vsub.f32 %v6257_v29, %v6270_v35  ;;  %1154 = vmatprep.mubr.f32.mxu0 %v6270_v35  ;;  %v419_v44 = vsub.f32 %v6264_v50, %v6280_v61  ;;  %v6297_v29 = vpack.c.bf16 %v449_v47, %v437_v63 }
  0x82   :  { %v460_v40 = vsub.f32 %v6030_v38, %v459_v11  ;;  %v477_v59 = vand.u32 4294901760, %v6036_v45  ;;  %v6305_v26 = vpack.c.bf16 %v467_v37, %v455_v7  ;;  %v472_v15 = vsub.f32 %v6032_v39, %v471_v23 }
  0x83   :  { %v6295_v28 = vand.u32 4294901760, %v413_v27  ;;  %v6303_v9 = vand.u32 4294901760, %v419_v44  ;;  %v6308_v35 = vpack.c.bf16 %v471_v23, %v459_v11  ;;  %v489_v47 = vand.u32 4294901760, %v6038_v46  ;;  %4600 = vmatpush1.bf16.msra.mxu1 %v6184_v8  ;;  %4792 = vmatpush1.bf16.msra.mxu0 %v6184_v8 }
  0x84   :  { %v461_v63 = vand.u32 4294901760, %v460_v40  ;;  %v478_v27 = vsub.f32 %v6036_v45, %v477_v59  ;;  %v483_v50 = vand.u32 4294901760, %v6042_v51  ;;  %v473_v48 = vand.u32 4294901760, %v472_v15  ;;  %4602 = vmatprep.subr.bf16.mxu1 %v6192_v57  ;;  %4794 = vmatprep.subr.bf16.mxu0 %v6192_v57 }
  0x85   :  { %9522 = vst [vmem:[#allocation111_spill] sm:$0xff] %v6295_v28  ;;  %9523 = vst [vmem:[#allocation112_spill] sm:$0xff] %v6303_v9  ;;  %415 = vmatprep.mubr.f32.mxu1 %v6295_v28  ;;  %v495_v41 = vand.u32 4294901760, %v6044_v52  ;;  %v501_v44 = vand.u32 4294901760, %v6048_v54  ;;  %v513_v37 = vand.u32 4294901760, %v6052_v55  ;;  %v490_v11 = vsub.f32 %v6038_v46, %v489_v47 }
  0x86   :  { %v479_v23 = vand.u32 4294901760, %v478_v27  ;;  %v6320_v7 = vpack.c.bf16 %v489_v47, %v477_v59  ;;  %v484_v40 = vsub.f32 %v6042_v51, %v483_v50  ;;  %v6325_v15 = vpack.c.bf16 %v473_v48, %v461_v63 }
  0x87   :  { %v496_v28 = vsub.f32 %v6044_v52, %v495_v41  ;;  %v6328_v45 = vpack.c.bf16 %v495_v41, %v483_v50  ;;  %v507_v39 = vand.u32 4294901760, %v6058_v3  ;;  %v491_v8 = vand.u32 4294901760, %v490_v11  ;;  %4604 = vmatpush1.bf16.msra.mxu1 %v6202_v1  ;;  %4796 = vmatpush1.bf16.msra.mxu0 %v6202_v1 }
  0x88   :  { %v485_v27 = vand.u32 4294901760, %v484_v40  ;;  %v502_v46 = vsub.f32 %v6048_v54, %v501_v44  ;;  %v514_v59 = vsub.f32 %v6052_v55, %v513_v37  ;;  %v6333_v51 = vpack.c.bf16 %v513_v37, %v501_v44  ;;  %4606 = vmatprep.subr.bf16.mxu1 %v6210_v31  ;;  %4798 = vmatprep.subr.bf16.mxu0 %v6210_v31  ;;  %v9579_v54 = vld [vmem:[#allocation67_spill] sm:$0xff]  ;;  %v2868_v55 = vld [vmem:[#allocation7] sm:$0xff] }
  0x89   :  { %v497_v47 = vand.u32 4294901760, %v496_v28  ;;  %v508_v38 = vsub.f32 %v6058_v3, %v507_v39  ;;  %v519_v48 = vand.u32 4294901760, %v6060_v4  ;;  %v6339_v41 = vpack.c.bf16 %v491_v8, %v479_v23  ;;  %v2871_v3 = vld [vmem:[#allocation7 + $0x18] sm:$0xff] }
  0x8a   :  { %v503_v50 = vand.u32 4294901760, %v502_v46  ;;  %v515_v63 = vand.u32 4294901760, %v514_v59  ;;  %v525_v11 = vand.u32 4294901760, %v6062_v5  ;;  %v537_v46 = vand.u32 4294901760, %v6066_v10 }
  0x8b   :  { %v6344_v28 = vpack.c.bf16 %v497_v47, %v485_v27  ;;  %v509_v44 = vand.u32 4294901760, %v508_v38  ;;  %v520_v37 = vsub.f32 %v6060_v4, %v519_v48  ;;  %v6347_v40 = vpack.c.bf16 %v519_v48, %v507_v39  ;;  %4608 = vmatpush1.bf16.msra.mxu1 %v6214_v2  ;;  %4800 = vmatpush1.bf16.msra.mxu0 %v6214_v2 }
  0x8c   :  { %v6349_v57 = vpack.c.bf16 %v515_v63, %v503_v50  ;;  %v526_v8 = vsub.f32 %v6062_v5, %v525_v11  ;;  %v531_v23 = vand.u32 4294901760, %v6070_v12  ;;  %v543_v1 = vand.u32 4294901760, %v6074_v14  ;;  %4610 = vmatprep.subr.bf16.mxu1 %v6224_v42  ;;  %4802 = vmatprep.subr.bf16.mxu0 %v6224_v42 }
  0x8d   :  { %v521_v59 = vand.u32 4294901760, %v520_v37  ;;  %v549_v31 = vand.u32 4294901760, %v6076_v20  ;;  %v561_v27 = vand.u32 4294901760, %v6082_v33  ;;  %v538_v39 = vsub.f32 %v6066_v10, %v537_v46 }
  0x8e   :  { %v527_v38 = vand.u32 4294901760, %v526_v8  ;;  %v6360_v47 = vpack.c.bf16 %v537_v46, %v525_v11  ;;  %v532_v48 = vsub.f32 %v6070_v12, %v531_v23  ;;  %v544_v63 = vsub.f32 %v6074_v14, %v543_v1 }
  0x8f   :  { %v6365_v50 = vpack.c.bf16 %v521_v59, %v509_v44  ;;  %v6368_v37 = vpack.c.bf16 %v543_v1, %v531_v23  ;;  %v555_v5 = vand.u32 4294901760, %v6084_v34  ;;  %v539_v2 = vand.u32 4294901760, %v538_v39  ;;  %4612 = vmatpush1.bf16.msra.mxu1 %v6238_v30  ;;  %4804 = vmatpush1.bf16.msra.mxu0 %v6238_v30 }
  0x90   :  { %v533_v8 = vand.u32 4294901760, %v532_v48  ;;  %v550_v10 = vsub.f32 %v6076_v20, %v549_v31  ;;  %v562_v11 = vsub.f32 %v6082_v33, %v561_v27  ;;  %v545_v46 = vand.u32 4294901760, %v544_v63  ;;  %4614 = vmatprep.subr.bf16.mxu1 %v6277_v24  ;;  %4806 = vmatprep.subr.bf16.mxu0 %v6250_v21  ;;  %v9576_v33 = vld [vmem:[#allocation62_spill] sm:$0xff]  ;;  %v9586_v20 = vld [vmem:[#allocation77_spill] sm:$0xff] }
  0x91   :  { %v6373_v12 = vpack.c.bf16 %v561_v27, %v549_v31  ;;  %v556_v4 = vsub.f32 %v6084_v34, %v555_v5  ;;  %v567_v44 = vand.u32 4294901760, %v6088_v43  ;;  %v6379_v1 = vpack.c.bf16 %v539_v2, %v527_v38 }
  0x92   :  { %v551_v23 = vand.u32 4294901760, %v550_v10  ;;  %v563_v59 = vand.u32 4294901760, %v562_v11  ;;  %v573_v39 = vand.u32 4294901760, %v6092_v49  ;;  %v6384_v31 = vpack.c.bf16 %v545_v46, %v533_v8  ;;  %421 = vmatmul.mubr.f32.vlgmr.msra.gmra.mrb[0].mxu1 %v6303_v9  ;;  %1158 = vmatmul.mubr.f32.vlgmr.msra.gmra.mrb[0].mxu0 %v6280_v61  ;;  %v9525_v11 = vld [vmem:[#allocation55_spill] sm:$0xff] }
  0x93   :  { %v557_v27 = vand.u32 4294901760, %v556_v4  ;;  %v568_v48 = vsub.f32 %v6088_v43, %v567_v44  ;;  %v6387_v63 = vpack.c.bf16 %v567_v44, %v555_v5  ;;  %v585_v10 = vand.u32 4294901760, %v6096_v58  ;;  %v9524_v4 = vld [vmem:[#allocation53_spill] sm:$0xff]  ;;  %4616 = vmatpush1.bf16.msra.mxu1 %v6297_v29  ;;  %4808 = vmatpush1.bf16.msra.mxu0 %v6273_v6 }
  0x94   :  { %v6389_v42 = vpack.c.bf16 %v563_v59, %v551_v23  ;;  %v574_v2 = vsub.f32 %v6092_v49, %v573_v39  ;;  %v579_v38 = vand.u32 4294901760, %v6100_v60  ;;  %v591_v24 = vand.u32 4294901760, %v6104_v62  ;;  %4618 = vmatprep.subr.bf16.mxu1 %v6305_v26  ;;  %4810 = vmatprep.subr.bf16.mxu0 %v6287_v0  ;;  %v9526_v29 = vld [vmem:[#allocation57_spill] sm:$0xff] }
  0x95   :  { %v569_v21 = vand.u32 4294901760, %v568_v48  ;;  %v597_v8 = vand.u32 4294901760, %v9524_v4  ;;  %v609_v5 = vand.u32 4294901760, %v9525_v11  ;;  %v586_v44 = vsub.f32 %v6096_v58, %v585_v10  ;;  %812 = vmatprep.mubr.f32.mxu1 %v6243_v32  ;;  %1421 = vmatprep.mubr.f32.mxu0 %v6243_v32  ;;  %v9591_v49 = vld [vmem:[#allocation85_spill] sm:$0xff] }
  0x96   :  { %v575_v46 = vand.u32 4294901760, %v574_v2  ;;  %v6402_v23 = vpack.c.bf16 %v585_v10, %v573_v39  ;;  %v580_v59 = vsub.f32 %v6100_v60, %v579_v38  ;;  %v592_v61 = vsub.f32 %v6104_v62, %v591_v24  ;;  %v9527_v10 = vld [vmem:[#allocation58_spill] sm:$0xff] }
  0x97   :  { %v6407_v48 = vpack.c.bf16 %v569_v21, %v557_v27  ;;  %v6410_v9 = vpack.c.bf16 %v591_v24, %v579_v38  ;;  %v603_v30 = vand.u32 4294901760, %v9526_v29  ;;  %v587_v6 = vand.u32 4294901760, %v586_v44  ;;  %4620 = vmatpush1.bf16.msra.mxu1 %v6325_v15  ;;  %4812 = vmatpush1.bf16.msra.mxu0 %v6308_v35  ;;  %v9532_v62 = vld [vmem:[#allocation66_spill] sm:$0xff] }
  0x98   :  { %v581_v2 = vand.u32 4294901760, %v580_v59  ;;  %v598_v58 = vsub.f32 %v9524_v4, %v597_v8  ;;  %v610_v39 = vsub.f32 %v9525_v11, %v609_v5  ;;  %v593_v26 = vand.u32 4294901760, %v592_v61  ;;  %v9528_v59 = vld [vmem:[#allocation60_spill] sm:$0xff]  ;;  %4622 = vmatprep.subr.bf16.mxu1 %v6339_v41  ;;  %4814 = vmatprep.subr.bf16.mxu0 %v6320_v7 }
  0x99   :  { %v6417_v0 = vpack.c.bf16 %v609_v5, %v597_v8  ;;  %v604_v27 = vsub.f32 %v9526_v29, %v603_v30  ;;  %v615_v38 = vand.u32 4294901760, %v9527_v10  ;;  %v6423_v21 = vpack.c.bf16 %v587_v6, %v575_v46  ;;  %v9529_v46 = vld [vmem:[#allocation61_spill] sm:$0xff]  ;;  %v9530_v6 = vld [vmem:[#allocation62_spill] sm:$0xff]  ;;  %v9531_v4 = vld [vmem:[#allocation64_spill] sm:$0xff] }
  0x9a   :  { %v599_v24 = vand.u32 4294901760, %v598_v58  ;;  %v611_v44 = vand.u32 4294901760, %v610_v39  ;;  %v621_v11 = vand.u32 4294901760, %v9528_v59  ;;  %v6428_v61 = vpack.c.bf16 %v593_v26, %v581_v2  ;;  %v9533_v2 = vld [vmem:[#allocation67_spill] sm:$0xff] }
  0x9b   :  { %v605_v8 = vand.u32 4294901760, %v604_v27  ;;  %v616_v5 = vsub.f32 %v9527_v10, %v615_v38  ;;  %v6431_v32 = vpack.c.bf16 %v615_v38, %v603_v30  ;;  %v633_v58 = vand.u32 4294901760, %v9529_v46  ;;  %4624 = vmatpush1.bf16.msra.mxu1 %v6344_v28  ;;  %4816 = vmatpush1.bf16.msra.mxu0 %v6328_v45  ;;  %v9534_v28 = vld [vmem:[#allocation69_spill] sm:$0xff] }
  0x9c   :  { %v6433_v15 = vpack.c.bf16 %v611_v44, %v599_v24  ;;  %v622_v35 = vsub.f32 %v9528_v59, %v621_v11  ;;  %v627_v39 = vand.u32 4294901760, %v9530_v6  ;;  %v639_v41 = vand.u32 4294901760, %v9531_v4  ;;  %4626 = vmatprep.subr.bf16.mxu1 %v6349_v57  ;;  %4818 = vmatprep.subr.bf16.mxu0 %v6333_v51  ;;  %v9535_v51 = vld [vmem:[#allocation70_spill] sm:$0xff] }
  0x9d   :  { %v617_v29 = vand.u32 4294901760, %v616_v5  ;;  %v645_v7 = vand.u32 4294901760, %v9532_v62  ;;  %v657_v26 = vand.u32 4294901760, %v9533_v2  ;;  %v634_v27 = vsub.f32 %v9529_v46, %v633_v58 }
  0x9e   :  { %v623_v30 = vand.u32 4294901760, %v622_v35  ;;  %v6444_v38 = vpack.c.bf16 %v633_v58, %v621_v11  ;;  %v628_v24 = vsub.f32 %v9530_v6, %v627_v39  ;;  %v640_v5 = vsub.f32 %v9531_v4, %v639_v41  ;;  %v9540_v4 = vld [vmem:[#allocation77_spill] sm:$0xff] }
  0x9f   :  { %v6449_v44 = vpack.c.bf16 %v617_v29, %v605_v8  ;;  %v6452_v59 = vpack.c.bf16 %v639_v41, %v627_v39  ;;  %v651_v10 = vand.u32 4294901760, %v9534_v28  ;;  %v635_v45 = vand.u32 4294901760, %v634_v27  ;;  %4628 = vmatpush1.bf16.msra.mxu1 %v6365_v50  ;;  %4820 = vmatpush1.bf16.msra.mxu0 %v6347_v40  ;;  %v9536_v27 = vld [vmem:[#allocation71_spill] sm:$0xff] }
  0xa0   :  { %v629_v35 = vand.u32 4294901760, %v628_v24  ;;  %v646_v46 = vsub.f32 %v9532_v62, %v645_v7  ;;  %v658_v11 = vsub.f32 %v9533_v2, %v657_v26  ;;  %v641_v58 = vand.u32 4294901760, %v640_v5  ;;  %4630 = vmatprep.subr.bf16.mxu1 %v6379_v1  ;;  %4822 = vmatprep.subr.bf16.mxu0 %v6360_v47  ;;  %v9539_v62 = vld [vmem:[#allocation76_spill] sm:$0xff] }
  0xa1   :  { %v6457_v6 = vpack.c.bf16 %v657_v26, %v645_v7  ;;  %v652_v57 = vsub.f32 %v9534_v28, %v651_v10  ;;  %v663_v29 = vand.u32 4294901760, %v9535_v51  ;;  %v6463_v8 = vpack.c.bf16 %v635_v45, %v623_v30  ;;  %v9537_v30 = vld [vmem:[#allocation73_spill] sm:$0xff]  ;;  %v9538_v45 = vld [vmem:[#allocation75_spill] sm:$0xff] }
  0xa2   :  { %v647_v39 = vand.u32 4294901760, %v646_v46  ;;  %v659_v41 = vand.u32 4294901760, %v658_v11  ;;  %v669_v24 = vand.u32 4294901760, %v9536_v27  ;;  %v6468_v7 = vpack.c.bf16 %v641_v58, %v629_v35  ;;  %v9541_v35 = vld [vmem:[#allocation79_spill] sm:$0xff] }
  0xa3   :  { %v653_v26 = vand.u32 4294901760, %v652_v57  ;;  %v664_v5 = vsub.f32 %v9535_v51, %v663_v29  ;;  %v6471_v28 = vpack.c.bf16 %v663_v29, %v651_v10  ;;  %v681_v46 = vand.u32 4294901760, %v9537_v30  ;;  %4632 = vmatpush1.bf16.msra.mxu1 %v6384_v31  ;;  %4824 = vmatpush1.bf16.msra.mxu0 %v6368_v37  ;;  %v9542_v31 = vld [vmem:[#allocation80_spill] sm:$0xff] }
  0xa4   :  { %v6473_v50 = vpack.c.bf16 %v659_v41, %v647_v39  ;;  %v670_v40 = vsub.f32 %v9536_v27, %v669_v24  ;;  %v675_v11 = vand.u32 4294901760, %v9538_v45  ;;  %v687_v1 = vand.u32 4294901760, %v9539_v62  ;;  %4634 = vmatprep.subr.bf16.mxu1 %v6389_v42  ;;  %4826 = vmatprep.subr.bf16.mxu0 %v6373_v12  ;;  %v9543_v12 = vld [vmem:[#allocation82_spill] sm:$0xff] }
  0xa5   :  { %v665_v2 = vand.u32 4294901760, %v664_v5  ;;  %v693_v47 = vand.u32 4294901760, %v9540_v4  ;;  %v705_v58 = vand.u32 4294901760, %v9541_v35  ;;  %v682_v57 = vsub.f32 %v9537_v30, %v681_v46 }
  0xa6   :  { %v671_v10 = vand.u32 4294901760, %v670_v40  ;;  %v6484_v29 = vpack.c.bf16 %v681_v46, %v669_v24  ;;  %v676_v39 = vsub.f32 %v9538_v45, %v675_v11  ;;  %v688_v5 = vsub.f32 %v9539_v62, %v687_v1  ;;  %v9548_v62 = vld [vmem:[#allocation90_spill] sm:$0xff] }
  0xa7   :  { %v6489_v41 = vpack.c.bf16 %v665_v2, %v653_v26  ;;  %v6492_v27 = vpack.c.bf16 %v687_v1, %v675_v11  ;;  %v699_v51 = vand.u32 4294901760, %v9542_v31  ;;  %v683_v37 = vand.u32 4294901760, %v682_v57  ;;  %4636 = vmatpush1.bf16.msra.mxu1 %v6407_v48  ;;  %4828 = vmatpush1.bf16.msra.mxu0 %v6387_v63  ;;  %v9544_v57 = vld [vmem:[#allocation84_spill] sm:$0xff] }
  0xa8   :  { %v677_v40 = vand.u32 4294901760, %v676_v39  ;;  %v694_v30 = vsub.f32 %v9540_v4, %v693_v47  ;;  %v706_v24 = vsub.f32 %v9541_v35, %v705_v58  ;;  %v689_v46 = vand.u32 4294901760, %v688_v5  ;;  %4638 = vmatprep.subr.bf16.mxu1 %v6423_v21  ;;  %4830 = vmatprep.subr.bf16.mxu0 %v6402_v23  ;;  %v9547_v4 = vld [vmem:[#allocation88_spill] sm:$0xff] }
  0xa9   :  { %v6497_v45 = vpack.c.bf16 %v705_v58, %v693_v47  ;;  %v700_v42 = vsub.f32 %v9542_v31, %v699_v51  ;;  %v711_v2 = vand.u32 4294901760, %v9543_v12  ;;  %v6503_v26 = vpack.c.bf16 %v683_v37, %v671_v10  ;;  %v9545_v10 = vld [vmem:[#allocation85_spill] sm:$0xff]  ;;  %v9546_v37 = vld [vmem:[#allocation87_spill] sm:$0xff] }
  0xaa   :  { %v695_v11 = vand.u32 4294901760, %v694_v30  ;;  %v707_v1 = vand.u32 4294901760, %v706_v24  ;;  %v717_v39 = vand.u32 4294901760, %v9544_v57  ;;  %v6508_v47 = vpack.c.bf16 %v689_v46, %v677_v40  ;;  %v9549_v40 = vld [vmem:[#allocation91_spill] sm:$0xff] }
  0xab   :  { %v701_v58 = vand.u32 4294901760, %v700_v42  ;;  %v712_v5 = vsub.f32 %v9543_v12, %v711_v2  ;;  %v6511_v31 = vpack.c.bf16 %v711_v2, %v699_v51  ;;  %v729_v30 = vand.u32 4294901760, %v9545_v10  ;;  %4640 = vmatpush1.bf16.msra.mxu1 %v6428_v61  ;;  %4832 = vmatpush1.bf16.msra.mxu0 %v6410_v9  ;;  %v9550_v61 = vld [vmem:[#allocation92_spill] sm:$0xff] }
  0xac   :  { %v6513_v48 = vpack.c.bf16 %v707_v1, %v695_v11  ;;  %v718_v63 = vsub.f32 %v9544_v57, %v717_v39  ;;  %v723_v24 = vand.u32 4294901760, %v9546_v37  ;;  %v735_v21 = vand.u32 4294901760, %v9547_v4  ;;  %4642 = vmatprep.subr.bf16.mxu1 %v6433_v15  ;;  %4834 = vmatprep.subr.bf16.mxu0 %v6417_v0  ;;  %v9552_v0 = vld [vmem:[#allocation94_spill] sm:$0xff] }
  0xad   :  { %v713_v35 = vand.u32 4294901760, %v712_v5  ;;  %v741_v23 = vand.u32 4294901760, %v9548_v62  ;;  %v753_v46 = vand.u32 4294901760, %v9549_v40  ;;  %v730_v42 = vsub.f32 %v9545_v10, %v729_v30 }
  0xae   :  { %v719_v51 = vand.u32 4294901760, %v718_v63  ;;  %v6524_v2 = vpack.c.bf16 %v729_v30, %v717_v39  ;;  %v724_v11 = vsub.f32 %v9546_v37, %v723_v24  ;;  %v736_v5 = vsub.f32 %v9547_v4, %v735_v21 }
  0xaf   :  { %v6529_v1 = vpack.c.bf16 %v713_v35, %v701_v58  ;;  %v6532_v57 = vpack.c.bf16 %v735_v21, %v723_v24  ;;  %v747_v12 = vand.u32 4294901760, %v9550_v61  ;;  %v731_v9 = vand.u32 4294901760, %v730_v42  ;;  %4644 = vmatpush1.bf16.msra.mxu1 %v6449_v44  ;;  %4836 = vmatpush1.bf16.msra.mxu0 %v6431_v32  ;;  %v9553_v42 = vld [vmem:[#allocation95_spill] sm:$0xff] }
  0xb0   :  { %v725_v63 = vand.u32 4294901760, %v724_v11  ;;  %v742_v10 = vsub.f32 %v9548_v62, %v741_v23  ;;  %v754_v39 = vsub.f32 %v9549_v40, %v753_v46  ;;  %v737_v30 = vand.u32 4294901760, %v736_v5  ;;  %4646 = vmatprep.subr.bf16.mxu1 %v6463_v8  ;;  %4838 = vmatprep.subr.bf16.mxu0 %v6444_v38 }
  0xb1   :  { %v6537_v37 = vpack.c.bf16 %v753_v46, %v741_v23  ;;  %v748_v15 = vsub.f32 %v9550_v61, %v747_v12  ;;  %v759_v35 = vand.u32 4294901760, %v9552_v0  ;;  %v6543_v58 = vpack.c.bf16 %v731_v9, %v719_v51  ;;  %v9555_v51 = vld [vmem:[#allocation97_spill] sm:$0xff] }
  0xb2   :  { %v743_v24 = vand.u32 4294901760, %v742_v10  ;;  %v755_v21 = vand.u32 4294901760, %v754_v39  ;;  %v765_v11 = vand.u32 4294901760, %v9553_v42  ;;  %v6548_v23 = vpack.c.bf16 %v737_v30, %v725_v63  ;;  %v169_v61 = vld [vmem:[#allocation8 + $0x78] sm:$0xff] }
  0xb3   :  { %9551 = vst [vmem:[#allocation90_spill] sm:$0xff] %v6537_v37  ;;  %v749_v46 = vand.u32 4294901760, %v748_v15  ;;  %v760_v5 = vsub.f32 %v9552_v0, %v759_v35  ;;  %v6551_v37 = vpack.c.bf16 %v759_v35, %v747_v12  ;;  %v777_v10 = vand.u32 4294901760, %v9555_v51  ;;  %4648 = vmatpush1.bf16.msra.mxu1 %v6468_v7  ;;  %4840 = vmatpush1.bf16.msra.mxu0 %v6452_v59  ;;  %v2873_v0 = vld [vmem:[#allocation7 + $0x28] sm:$0xff] }
  0xb4   :  { %v6553_v44 = vpack.c.bf16 %v755_v21, %v743_v24  ;;  %v766_v32 = vsub.f32 %v9553_v42, %v765_v11  ;;  %v771_v9 = vand.u32 4294901760, %v6218_v13  ;;  %v783_v8 = vand.u32 4294901760, %v6220_v22  ;;  %4650 = vmatprep.subr.bf16.mxu1 %v6473_v50  ;;  %4842 = vmatprep.subr.bf16.mxu0 %v6457_v6 }
  0xb5   :  { %9554 = vst [vmem:[#allocation91_spill] sm:$0xff] %v6551_v37  ;;  %v761_v39 = vand.u32 4294901760, %v760_v5  ;;  %v789_v38 = vand.u32 4294901760, %v6222_v19  ;;  %v801_v63 = vand.u32 4294901760, %v6226_v36  ;;  %v778_v30 = vsub.f32 %v9555_v51, %v777_v10 }
  0xb6   :  { %v767_v12 = vand.u32 4294901760, %v766_v32  ;;  %v6564_v15 = vpack.c.bf16 %v777_v10, %v765_v11  ;;  %v772_v35 = vsub.f32 %v6218_v13, %v771_v9  ;;  %v784_v21 = vsub.f32 %v6220_v22, %v783_v8 }
  0xb7   :  { %v6569_v24 = vpack.c.bf16 %v761_v39, %v749_v46  ;;  %v6572_v5 = vpack.c.bf16 %v783_v8, %v771_v9  ;;  %v795_v7 = vand.u32 4294901760, %v6230_v56  ;;  %v779_v59 = vand.u32 4294901760, %v778_v30  ;;  %4652 = vmatpush1.bf16.msra.mxu1 %v6489_v41  ;;  %4844 = vmatpush1.bf16.msra.mxu0 %v6471_v28  ;;  %v157_v41 = vld [vmem:[#allocation8 + $0x18] sm:$0xff] }
  0xb8   :  { %9556 = vst [vmem:[#allocation95_spill] sm:$0xff] %v6564_v15  ;;  %v773_v32 = vand.u32 4294901760, %v772_v35  ;;  %v790_v37 = vsub.f32 %v6222_v19, %v789_v38  ;;  %v802_v11 = vsub.f32 %v6226_v36, %v801_v63  ;;  %v785_v10 = vand.u32 4294901760, %v784_v21  ;;  %4654 = vmatprep.subr.bf16.mxu1 %v6503_v26  ;;  %4846 = vmatprep.subr.bf16.mxu0 %v6484_v29  ;;  %v9558_v21 = vld [vmem:[#allocation21_spill] sm:$0xff]  ;;  %v9560_v26 = vld [vmem:[#allocation24_spill] sm:$0xff] }
  0xb9   :  { %v6577_v15 = vpack.c.bf16 %v801_v63, %v789_v38  ;;  %v796_v50 = vsub.f32 %v6230_v56, %v795_v7  ;;  %v807_v6 = vand.u32 4294901760, %v6240_v53  ;;  %v6583_v46 = vpack.c.bf16 %v779_v59, %v767_v12  ;;  %v161_v29 = vld [vmem:[#allocation8 + $0x38] sm:$0xff]  ;;  %v9589_v12 = vld [vmem:[#allocation82_spill] sm:$0xff]  ;;  %v160_v59 = vld [vmem:[#allocation8 + $0x30] sm:$0xff] }
  0xba   :  { %v791_v9 = vand.u32 4294901760, %v790_v37  ;;  %v803_v39 = vand.u32 4294901760, %v802_v11  ;;  %v6589_v38 = vpack.c.bf16 %v785_v10, %v773_v32  ;;  %v9557_v37 = vld [vmem:[#allocation19_spill] sm:$0xff]  ;;  %v9561_v10 = vld [vmem:[#allocation26_spill] sm:$0xff]  ;;  %v1566_v16 = vand.u32 4294901760, %v157_v41  ;;  %v9569_v11 = vld [vmem:[#allocation52_spill] sm:$0xff] }
  0xbb   :  { %v797_v63 = vand.u32 4294901760, %v796_v50  ;;  %v808_v30 = vsub.f32 %v6240_v53, %v807_v6  ;;  %v6592_v35 = vpack.c.bf16 %v807_v6, %v795_v7  ;;  %v9562_v50 = vld [vmem:[#allocation27_spill] sm:$0xff]  ;;  %4656 = vmatpush1.bf16.msra.mxu1 %v6508_v47  ;;  %4848 = vmatpush1.bf16.msra.mxu0 %v6492_v27  ;;  %v9577_v27 = vld [vmem:[#allocation64_spill] sm:$0xff]  ;;  %v2936_v8 = vand.u32 4294901760, %v2871_v3  ;;  %v165_v47 = vld [vmem:[#allocation8 + $0x58] sm:$0xff] }
  0xbc   :  { %v6594_v28 = vpack.c.bf16 %v803_v39, %v791_v9  ;;  %4658 = vmatprep.subr.bf16.mxu1 %v6513_v48  ;;  %4850 = vmatprep.subr.bf16.mxu0 %v6497_v45  ;;  %v1570_v39 = vand.u32 4294901760, %v161_v29  ;;  %v2869_v6 = vld [vmem:[#allocation7 + $0x8] sm:$0xff]  ;;  %v6670_v14 = vsub.f32 %v157_v41, %v1566_v16  ;;  %v9598_v43 = vld [vmem:[#allocation90_spill] sm:$0xff]  ;;  %v1572_v41 = vand.u32 4294901760, %v160_v59  ;;  %v2875_v56 = vld [vmem:[#allocation7 + $0x38] sm:$0xff] }
  0xbd   :  { %v809_v32 = vand.u32 4294901760, %v808_v30  ;;  %v9571_v48 = vld [vmem:[#allocation55_spill] sm:$0xff]  ;;  %v2932_v34 = vand.u32 4294901760, %v2869_v6  ;;  %v156_v30 = vld [vmem:[#allocation8 + $0x10] sm:$0xff] }
  0xbe   :  { %v9584_v45 = vld [vmem:[#allocation75_spill] sm:$0xff]  ;;  %v6668_v4 = vpack.c.bf16 %v1570_v39, %v1566_v16  ;;  %9594 = vst [vmem:[#allocation19_spill] sm:$0xff] %v6670_v14  ;;  %v6682_v16 = vsub.f32 %v2871_v3, %v2936_v8  ;;  %v2934_v14 = vand.u32 4294901760, %v2868_v55  ;;  %v2872_v3 = vld [vmem:[#allocation7 + $0x20] sm:$0xff] }
  0xbf   :  { %v6618_v7 = vpack.c.bf16 %v809_v32, %v797_v63  ;;  %4660 = vmatpush1.bf16.msra.mxu1 %v6529_v1  ;;  %4852 = vmatpush1.bf16.msra.mxu0 %v6511_v31  ;;  %v9585_v63 = vld [vmem:[#allocation76_spill] sm:$0xff]  ;;  %v9587_v9 = vld [vmem:[#allocation79_spill] sm:$0xff]  ;;  %v6678_v13 = vsub.f32 %v2869_v6, %v2932_v34  ;;  %v1568_v32 = vand.u32 4294901760, %v156_v30  ;;  %v6688_v6 = vsub.f32 %v160_v59, %v1572_v41 }
  0xc0   :  { %4662 = vmatprep.subr.bf16.mxu1 %v6543_v58  ;;  %4854 = vmatprep.subr.bf16.mxu0 %v6524_v2  ;;  %v9590_v1 = vld [vmem:[#allocation84_spill] sm:$0xff]  ;;  %9593 = vst [vmem:[#allocation97_spill] sm:$0xff] %v6668_v4  ;;  %v6674_v58 = vsub.f32 %v161_v29, %v1570_v39  ;;  %v6676_v2 = vpack.c.bf16 %v2936_v8, %v2932_v34  ;;  %9599 = vst [vmem:[#allocation27_spill] sm:$0xff] %v6682_v16  ;;  %v1578_v29 = vand.u32 4294901760, %v169_v61  ;;  %v9605_v16 = vld [vmem:[#allocation91_spill] sm:$0xff] }
  0xc1   :  { %v2870_v31 = vld [vmem:[#allocation7 + $0x10] sm:$0xff]  ;;  %9597 = vst [vmem:[#allocation26_spill] sm:$0xff] %v6678_v13  ;;  %v2940_v39 = vand.u32 4294901760, %v2873_v0  ;;  %v6686_v34 = vpack.c.bf16 %v1572_v41, %v1568_v32  ;;  %9602 = vst [vmem:[#allocation55_spill] sm:$0xff] %v6688_v6  ;;  %v9609_v59 = vld [vmem:[#allocation95_spill] sm:$0xff] }
  0xc2   :  { %9595 = vst [vmem:[#allocation21_spill] sm:$0xff] %v6674_v58  ;;  %9596 = vst [vmem:[#allocation24_spill] sm:$0xff] %v6676_v2  ;;  %v2938_v4 = vand.u32 4294901760, %v2870_v31  ;;  %v164_v58 = vld [vmem:[#allocation8 + $0x50] sm:$0xff] }
  0xc3   :  { %4664 = vmatpush1.bf16.msra.mxu1 %v6548_v23  ;;  %4856 = vmatpush1.bf16.msra.mxu0 %v6532_v57  ;;  %v6684_v23 = vsub.f32 %v156_v30, %v1568_v32  ;;  %v1574_v57 = vand.u32 4294901760, %v165_v47  ;;  %v168_v2 = vld [vmem:[#allocation8 + $0x70] sm:$0xff]  ;;  %9601 = vst [vmem:[#allocation52_spill] sm:$0xff] %v6686_v34  ;;  %v2944_v32 = vand.u32 4294901760, %v2875_v56  ;;  %v173_v34 = vld [vmem:[#allocation8 + $0x98] sm:$0xff]  ;;  %v1576_v41 = vand.u32 4294901760, %v164_v58 }
  0xc4   :  { %4666 = vmatprep.subr.bf16.mxu1 %v6553_v44  ;;  %4858 = vmatprep.subr.bf16.mxu0 %v9598_v43  ;;  %v6690_v44 = vpack.c.bf16 %v2938_v4, %v2934_v14  ;;  %v6692_v43 = vsub.f32 %v2868_v55, %v2934_v14  ;;  %v2874_v8 = vld [vmem:[#allocation7 + $0x30] sm:$0xff]  ;;  %v6696_v30 = vsub.f32 %v2870_v31, %v2938_v4  ;;  %v2942_v31 = vand.u32 4294901760, %v2872_v3 }
  0xc5   :  { %9600 = vst [vmem:[#allocation29_spill] sm:$0xff] %v6684_v23  ;;  %v6698_v23 = vpack.c.bf16 %v1578_v29, %v1574_v57  ;;  %v6700_v13 = vsub.f32 %v165_v47, %v1574_v57  ;;  %v6704_v55 = vsub.f32 %v169_v61, %v1578_v29  ;;  %v6706_v14 = vsub.f32 %v2873_v0, %v2940_v39  ;;  %v2877_v57 = vld [vmem:[#allocation7 + $0x48] sm:$0xff]  ;;  %v176_v29 = vld [vmem:[#allocation8 + $0xb0] sm:$0xff] }
  0xc6   :  { %9603 = vst [vmem:[#allocation62_spill] sm:$0xff] %v6690_v44  ;;  %9604 = vst [vmem:[#allocation64_spill] sm:$0xff] %v6692_v43  ;;  %v177_v43 = vld [vmem:[#allocation8 + $0xb8] sm:$0xff]  ;;  %v6710_v4 = vsub.f32 %v2875_v56, %v2944_v32  ;;  %v2946_v47 = vand.u32 4294901760, %v2874_v8  ;;  %v1582_v0 = vand.u32 4294901760, %v173_v34 }
  0xc7   :  { %4668 = vmatpush1.bf16.msra.mxu1 %v6569_v24  ;;  %4860 = vmatpush1.bf16.msra.mxu0 %v9605_v16  ;;  %9606 = vst [vmem:[#allocation67_spill] sm:$0xff] %v6696_v30  ;;  %9607 = vst [vmem:[#allocation75_spill] sm:$0xff] %v6698_v23  ;;  %v1580_v24 = vand.u32 4294901760, %v168_v2  ;;  %v6708_v16 = vpack.c.bf16 %v2944_v32, %v2940_v39  ;;  %v172_v30 = vld [vmem:[#allocation8 + $0x90] sm:$0xff]  ;;  %v6722_v39 = vsub.f32 %v2872_v3, %v2942_v31 }
  0xc8   :  { %9608 = vst [vmem:[#allocation76_spill] sm:$0xff] %v6700_v13  ;;  %4670 = vmatprep.subr.bf16.mxu1 %v6583_v46  ;;  %4862 = vmatprep.subr.bf16.mxu0 %v9609_v59  ;;  %9610 = vst [vmem:[#allocation77_spill] sm:$0xff] %v6704_v55  ;;  %v2879_v13 = vld [vmem:[#allocation7 + $0x58] sm:$0xff]  ;;  %v6714_v46 = vsub.f32 %v164_v58, %v1576_v41  ;;  %v2876_v59 = vld [vmem:[#allocation7 + $0x40] sm:$0xff]  ;;  %v6720_v56 = vpack.c.bf16 %v2946_v47, %v2942_v31  ;;  %v2948_v58 = vand.u32 4294901760, %v2877_v57 }
  0xc9   :  { %9611 = vst [vmem:[#allocation79_spill] sm:$0xff] %v6706_v14  ;;  %9612 = vst [vmem:[#allocation82_spill] sm:$0xff] %v6708_v16  ;;  %v6712_v6 = vpack.c.bf16 %v1580_v24, %v1576_v41  ;;  %v6716_v61 = vsub.f32 %v168_v2, %v1580_v24  ;;  %v6724_v32 = vsub.f32 %v2874_v8, %v2946_v47  ;;  %v2952_v41 = vand.u32 4294901760, %v2879_v13  ;;  %v185_v8 = vld [vmem:[#allocation8 + $0xf8] sm:$0xff]  ;;  %v2881_v47 = vld [vmem:[#allocation7 + $0x68] sm:$0xff] }
  0xca   :  { %9613 = vst [vmem:[#allocation84_spill] sm:$0xff] %v6710_v4  ;;  %9615 = vst [vmem:[#allocation90_spill] sm:$0xff] %v6714_v46  ;;  %v1586_v4 = vand.u32 4294901760, %v177_v43  ;;  %v6728_v2 = vsub.f32 %v173_v34, %v1582_v0  ;;  %v1584_v24 = vand.u32 4294901760, %v172_v30  ;;  %v1588_v3 = vand.u32 4294901760, %v176_v29  ;;  %v184_v14 = vld [vmem:[#allocation8 + $0xf0] sm:$0xff] }
  0xcb   :  { %9614 = vst [vmem:[#allocation85_spill] sm:$0xff] %v6712_v6  ;;  %9616 = vst [vmem:[#allocation91_spill] sm:$0xff] %v6716_v61  ;;  %4672 = vmatpush1.bf16.msra.mxu1 %v6589_v38  ;;  %4864 = vmatpush1.bf16.msra.mxu0 %v6572_v5  ;;  %v2878_v61 = vld [vmem:[#allocation7 + $0x50] sm:$0xff]  ;;  %v181_v38 = vld [vmem:[#allocation8 + $0xd8] sm:$0xff]  ;;  %v2950_v31 = vand.u32 4294901760, %v2876_v59 }
  0xcc   :  { %9617 = vst [vmem:[#allocation95_spill] sm:$0xff] %v6720_v56  ;;  %9618 = vst [vmem:[#allocation113_spill] sm:$0xff] %v6722_v39  ;;  %4674 = vmatprep.subr.bf16.mxu1 %v6594_v28  ;;  %4866 = vmatprep.subr.bf16.mxu0 %v6577_v15  ;;  %v6730_v46 = vpack.c.bf16 %v1586_v4, %v1582_v0  ;;  %v6732_v5 = vsub.f32 %v177_v43, %v1586_v4  ;;  %v2954_v0 = vand.u32 4294901760, %v2878_v61  ;;  %v2880_v55 = vld [vmem:[#allocation7 + $0x60] sm:$0xff] }
  0xcd   :  { %9619 = vst [vmem:[#allocation114_spill] sm:$0xff] %v6724_v32  ;;  %9620 = vst [vmem:[#allocation115_spill] sm:$0xff] %v6728_v2  ;;  %v2883_v32 = vld [vmem:[#allocation7 + $0x78] sm:$0xff]  ;;  %v6734_v39 = vpack.c.bf16 %v2952_v41, %v2948_v58  ;;  %v6736_v28 = vsub.f32 %v2877_v57, %v2948_v58  ;;  %v6738_v15 = vsub.f32 %v2879_v13, %v2952_v41  ;;  %v180_v2 = vld [vmem:[#allocation8 + $0xd0] sm:$0xff]  ;;  %v1590_v41 = vand.u32 4294901760, %v181_v38 }
  0xce   :  { %9621 = vst [vmem:[#allocation116_spill] sm:$0xff] %v6730_v46  ;;  %9622 = vst [vmem:[#allocation117_spill] sm:$0xff] %v6732_v5  ;;  %v6740_v34 = vsub.f32 %v172_v30, %v1584_v24  ;;  %v6744_v43 = vpack.c.bf16 %v1588_v3, %v1584_v24  ;;  %v6746_v4 = vsub.f32 %v176_v29, %v1588_v3  ;;  %v9630_v57 = vld [vmem:[#allocation17_spill] sm:$0xff]  ;;  %v9631_v58 = vld [vmem:[#allocation16_spill] sm:$0xff]  ;;  %v1592_v29 = vand.u32 4294901760, %v180_v2 }
  0xcf   :  { %9623 = vst [vmem:[#allocation118_spill] sm:$0xff] %v6734_v39  ;;  %9624 = vst [vmem:[#allocation119_spill] sm:$0xff] %v6736_v28  ;;  %4676 = vmatpush1.bf16.msra.mxu1 %v6618_v7  ;;  %4868 = vmatpush1.bf16.msra.mxu0 %v6592_v35  ;;  %v6748_v5 = vsub.f32 %v2876_v59, %v2950_v31  ;;  %v9632_v13 = vpack.c.bf16 %v9630_v57, %v9631_v58  ;;  %v9633_v30 = vld [vmem:[#allocation15_spill] sm:$0xff]  ;;  %v2960_v7 = vand.u32 4294901760, %v2883_v32  ;;  %v2882_v28 = vld [vmem:[#allocation7 + $0x70] sm:$0xff] }
  0xd0   :  { %9625 = vst [vmem:[#allocation120_spill] sm:$0xff] %v6738_v15  ;;  %9626 = vst [vmem:[#allocation121_spill] sm:$0xff] %v6740_v34  ;;  %4870 = vmatprep.subr.bf16.mxu0 %v9633_v30  ;;  %v1594_v34 = vand.u32 4294901760, %v185_v8  ;;  %v2956_v15 = vand.u32 4294901760, %v2881_v47  ;;  %v6754_v35 = vpack.c.bf16 %v2954_v0, %v2950_v31  ;;  %v6756_v24 = vsub.f32 %v2878_v61, %v2954_v0  ;;  %v189_v59 = vld [vmem:[#allocation8 + $0x118] sm:$0xff]  ;;  %v9641_v61 = vld [vmem:[#allocation18_spill] sm:$0xff] }
  0xd1   :  { %9627 = vst [vmem:[#allocation122_spill] sm:$0xff] %v6744_v43  ;;  %9628 = vst [vmem:[#allocation123_spill] sm:$0xff] %v6746_v4  ;;  %4678 = vmatprep.subr.bf16.mxu1 %v9632_v13  ;;  %v1596_v3 = vand.u32 4294901760, %v184_v14  ;;  %v6762_v58 = vsub.f32 %v181_v38, %v1590_v41  ;;  %v2958_v30 = vand.u32 4294901760, %v2880_v55  ;;  %v193_v4 = vld [vmem:[#allocation8 + $0x138] sm:$0xff]  ;;  %v9640_v31 = vpack.c.bf16 %v9557_v37, %v6010_v18 }
  0xd2   :  { %9629 = vst [vmem:[#allocation124_spill] sm:$0xff] %v6748_v5  ;;  %9634 = vst [vmem:[#allocation17_spill] sm:$0xff] %v6754_v35  ;;  %v9636_v5 = vld [vmem:[#allocation106_spill] sm:$0xff]  ;;  %v6760_v57 = vpack.c.bf16 %v1594_v34, %v1590_v41  ;;  %v6764_v13 = vsub.f32 %v185_v8, %v1594_v34  ;;  %v6770_v0 = vpack.c.bf16 %v2960_v7, %v2956_v15  ;;  %v2962_v43 = vand.u32 4294901760, %v2882_v28  ;;  %v2887_v38 = vld [vmem:[#allocation7 + $0x98] sm:$0xff] }
  0xd3   :  { %9635 = vst [vmem:[#allocation16_spill] sm:$0xff] %v6756_v24  ;;  %814 = vmatmul.mubr.f32.vlgmr.msra.gmra.mrb[0].mxu1 %v9636_v5  ;;  %1423 = vmatmul.mubr.f32.vlgmr.msra.gmra.mrb[0].mxu0 %v9636_v5  ;;  %9638 = vst [vmem:[#allocation125_spill] sm:$0xff] %v6762_v58  ;;  %v6772_v24 = vsub.f32 %v2881_v47, %v2956_v15  ;;  %v6774_v35 = vsub.f32 %v2883_v32, %v2960_v7  ;;  %v188_v41 = vld [vmem:[#allocation8 + $0x110] sm:$0xff]  ;;  %v1598_v47 = vand.u32 4294901760, %v189_v59  ;;  %v2884_v32 = vld [vmem:[#allocation7 + $0x80] sm:$0xff] }
  0xd4   :  { %9637 = vst [vmem:[#allocation15_spill] sm:$0xff] %v6760_v57  ;;  %9639 = vst [vmem:[#allocation126_spill] sm:$0xff] %v6764_v13  ;;  %4680 = vmatpush1.bf16.msra.mxu1 %v9640_v31  ;;  %4872 = vmatpush1.bf16.msra.mxu0 %v9641_v61  ;;  %v2885_v57 = vld [vmem:[#allocation7 + $0x88] sm:$0xff]  ;;  %v9645_v8 = vpack.c.bf16 %v9558_v21, %v6018_v25  ;;  %v9646_v34 = vld [vmem:[#allocation20_spill] sm:$0xff]  ;;  %v6780_v18 = vpack.c.bf16 %v1596_v3, %v1592_v29  ;;  %v1602_v21 = vand.u32 4294901760, %v193_v4 }
  0xd5   :  { %9642 = vst [vmem:[#allocation18_spill] sm:$0xff] %v6770_v0  ;;  %9643 = vst [vmem:[#allocation127_spill] sm:$0xff] %v6772_v24  ;;  %4874 = vmatprep.subr.bf16.mxu0 %v9646_v34  ;;  %v6782_v37 = vsub.f32 %v180_v2, %v1592_v29  ;;  %v6784_v31 = vsub.f32 %v184_v14, %v1596_v3  ;;  %v192_v15 = vld [vmem:[#allocation8 + $0x130] sm:$0xff]  ;;  %v9650_v7 = vld [vmem:[#allocation107_spill] sm:$0xff]  ;;  %v6790_v24 = vsub.f32 %v2880_v55, %v2958_v30 }
  0xd6   :  { %9644 = vst [vmem:[#allocation128_spill] sm:$0xff] %v6774_v35  ;;  %4682 = vmatprep.subr.bf16.mxu1 %v9645_v8  ;;  %9647 = vst [vmem:[#allocation20_spill] sm:$0xff] %v6780_v18  ;;  %1014 = vmatprep.mubr.f32.mxu1 %v9650_v7  ;;  %v9651_v61 = vld [vmem:[#allocation105_spill] sm:$0xff]  ;;  %v6788_v35 = vpack.c.bf16 %v2962_v43, %v2958_v30  ;;  %v6792_v25 = vsub.f32 %v2882_v28, %v2962_v43  ;;  %v2886_v8 = vld [vmem:[#allocation7 + $0x90] sm:$0xff]  ;;  %v2964_v2 = vand.u32 4294901760, %v2885_v57 }
  0xd7   :  { %9648 = vst [vmem:[#allocation129_spill] sm:$0xff] %v6782_v37  ;;  %9649 = vst [vmem:[#allocation130_spill] sm:$0xff] %v6784_v31  ;;  %1558 = vmatprep.mubr.f32.mxu0 %v9651_v61  ;;  %v6794_v34 = vsub.f32 %v189_v59, %v1598_v47  ;;  %v2968_v14 = vand.u32 4294901760, %v2887_v38  ;;  %v1600_v29 = vand.u32 4294901760, %v188_v41  ;;  %v9656_v3 = vld [vmem:[#allocation23_spill] sm:$0xff]  ;;  %v9658_v7 = vld [vmem:[#allocation22_spill] sm:$0xff]  ;;  %v6800_v61 = vpack.c.bf16 %v1602_v21, %v1598_v47 }
  0xd8   :  { %9652 = vst [vmem:[#allocation131_spill] sm:$0xff] %v6788_v35  ;;  %9653 = vst [vmem:[#allocation132_spill] sm:$0xff] %v6790_v24  ;;  %v9657_v31 = vpack.c.bf16 %v9560_v26, %v9656_v3  ;;  %4876 = vmatpush1.bf16.msra.mxu0 %v9658_v7  ;;  %v6802_v37 = vsub.f32 %v193_v4, %v1602_v21  ;;  %v1604_v55 = vand.u32 4294901760, %v192_v15  ;;  %v2966_v28 = vand.u32 4294901760, %v2884_v32  ;;  %v197_v43 = vld [vmem:[#allocation8 + $0x158] sm:$0xff]  ;;  %v196_v7 = vld [vmem:[#allocation8 + $0x150] sm:$0xff] }
  0xd9   :  { %9654 = vst [vmem:[#allocation133_spill] sm:$0xff] %v6792_v25  ;;  %9655 = vst [vmem:[#allocation134_spill] sm:$0xff] %v6794_v34  ;;  %v201_v30 = vld [vmem:[#allocation8 + $0x178] sm:$0xff]  ;;  %v2889_v25 = vld [vmem:[#allocation7 + $0xa8] sm:$0xff]  ;;  %v9661_v59 = vpack.c.bf16 %v9562_v50, %v9561_v10  ;;  %v6808_v24 = vpack.c.bf16 %v2968_v14, %v2964_v2  ;;  %v6810_v26 = vsub.f32 %v2885_v57, %v2964_v2  ;;  %v2970_v47 = vand.u32 4294901760, %v2886_v8 }
  0xda   :  { %4684 = vmatpush1.bf16.msra.mxu1 %v9657_v31  ;;  %9659 = vst [vmem:[#allocation23_spill] sm:$0xff] %v6800_v61  ;;  %9660 = vst [vmem:[#allocation22_spill] sm:$0xff] %v6802_v37  ;;  %v9662_v34 = vld [vmem:[#allocation25_spill] sm:$0xff]  ;;  %v6812_v31 = vsub.f32 %v2887_v38, %v2968_v14  ;;  %v200_v21 = vld [vmem:[#allocation8 + $0x170] sm:$0xff]  ;;  %v6814_v3 = vpack.c.bf16 %v1604_v55, %v1600_v29  ;;  %v6816_v37 = vsub.f32 %v188_v41, %v1600_v29 }
  0xdb   :  { %4686 = vmatprep.subr.bf16.mxu1 %v9661_v59  ;;  %4878 = vmatprep.subr.bf16.mxu0 %v9662_v34  ;;  %9663 = vst [vmem:[#allocation25_spill] sm:$0xff] %v6808_v24  ;;  %9664 = vst [vmem:[#allocation135_spill] sm:$0xff] %v6810_v26  ;;  %v2891_v4 = vld [vmem:[#allocation7 + $0xb8] sm:$0xff]  ;;  %v6818_v13 = vsub.f32 %v192_v15, %v1604_v55  ;;  %v6820_v10 = vsub.f32 %v2884_v32, %v2966_v28  ;;  %v2888_v50 = vld [vmem:[#allocation7 + $0xa0] sm:$0xff]  ;;  %v1606_v57 = vand.u32 4294901760, %v197_v43 }
  0xdc   :  { %9665 = vst [vmem:[#allocation136_spill] sm:$0xff] %v6812_v31  ;;  %9666 = vst [vmem:[#allocation137_spill] sm:$0xff] %v6814_v3  ;;  %v6822_v34 = vpack.c.bf16 %v2970_v47, %v2966_v28  ;;  %v6824_v59 = vsub.f32 %v2886_v8, %v2970_v47  ;;  %v1610_v38 = vand.u32 4294901760, %v201_v30  ;;  %v9672_v2 = vpack.c.bf16 %v6044_v52, %v9563_v17  ;;  %v9673_v14 = vld [vmem:[#allocation28_spill] sm:$0xff]  ;;  %v205_v32 = vld [vmem:[#allocation8 + $0x198] sm:$0xff] }
  0xdd   :  { %9667 = vst [vmem:[#allocation138_spill] sm:$0xff] %v6816_v37  ;;  %9668 = vst [vmem:[#allocation139_spill] sm:$0xff] %v6818_v13  ;;  %4880 = vmatpush1.bf16.msra.mxu0 %v9673_v14  ;;  %v2972_v31 = vand.u32 4294901760, %v2889_v25  ;;  %v2976_v41 = vand.u32 4294901760, %v2891_v4  ;;  %v1608_v29 = vand.u32 4294901760, %v196_v7  ;;  %v1612_v15 = vand.u32 4294901760, %v200_v21 }
  0xde   :  { %9669 = vst [vmem:[#allocation140_spill] sm:$0xff] %v6820_v10  ;;  %9670 = vst [vmem:[#allocation141_spill] sm:$0xff] %v6822_v34  ;;  %4688 = vmatpush1.bf16.msra.mxu1 %v9672_v2  ;;  %v2890_v55 = vld [vmem:[#allocation7 + $0xb0] sm:$0xff]  ;;  %v9675_v13 = vld [vmem:[#allocation31_spill] sm:$0xff]  ;;  %v6834_v47 = vpack.c.bf16 %v1610_v38, %v1606_v57  ;;  %v6838_v17 = vsub.f32 %v201_v30, %v1610_v38  ;;  %v2974_v52 = vand.u32 4294901760, %v2888_v50 }
  0xdf   :  { %9671 = vst [vmem:[#allocation142_spill] sm:$0xff] %v6824_v59  ;;  %v9674_v10 = vld [vmem:[#allocation32_spill] sm:$0xff]  ;;  %v9677_v8 = vld [vmem:[#allocation30_spill] sm:$0xff]  ;;  %v6836_v59 = vsub.f32 %v197_v43, %v1606_v57  ;;  %v209_v2 = vld [vmem:[#allocation8 + $0x1b8] sm:$0xff]  ;;  %v6840_v26 = vpack.c.bf16 %v2976_v41, %v2972_v31  ;;  %v6842_v58 = vsub.f32 %v2889_v25, %v2972_v31  ;;  %v6844_v34 = vsub.f32 %v2891_v4, %v2976_v41 }
  0xe0   :  { %v9676_v28 = vpack.c.bf16 %v9674_v10, %v9675_v13  ;;  %4882 = vmatprep.subr.bf16.mxu0 %v9677_v8  ;;  %9678 = vst [vmem:[#allocation28_spill] sm:$0xff] %v6834_v47  ;;  %9680 = vst [vmem:[#allocation31_spill] sm:$0xff] %v6838_v17  ;;  %v2893_v14 = vld [vmem:[#allocation7 + $0xc8] sm:$0xff]  ;;  %v2895_v37 = vld [vmem:[#allocation7 + $0xd8] sm:$0xff]  ;;  %v6846_v13 = vpack.c.bf16 %v1612_v15, %v1608_v29  ;;  %v6848_v8 = vsub.f32 %v196_v7, %v1608_v29 }
  0xe1   :  { %9679 = vst [vmem:[#allocation32_spill] sm:$0xff] %v6836_v59  ;;  %9681 = vst [vmem:[#allocation30_spill] sm:$0xff] %v6840_v26  ;;  %v204_v10 = vld [vmem:[#allocation8 + $0x190] sm:$0xff]  ;;  %v6850_v43 = vsub.f32 %v200_v21, %v1612_v15  ;;  %v2978_v30 = vand.u32 4294901760, %v2890_v55  ;;  %v6852_v57 = vsub.f32 %v2888_v50, %v2974_v52  ;;  %v9688_v38 = vld [vmem:[#allocation35_spill] sm:$0xff]  ;;  %v1614_v25 = vand.u32 4294901760, %v205_v32 }
  0xe2   :  { %4690 = vmatprep.subr.bf16.mxu1 %v9676_v28  ;;  %9682 = vst [vmem:[#allocation143_spill] sm:$0xff] %v6842_v58  ;;  %9683 = vst [vmem:[#allocation144_spill] sm:$0xff] %v6844_v34  ;;  %v208_v28 = vld [vmem:[#allocation8 + $0x1b0] sm:$0xff]  ;;  %v9689_v17 = vld [vmem:[#allocation34_spill] sm:$0xff]  ;;  %v1618_v31 = vand.u32 4294901760, %v209_v2  ;;  %v2980_v4 = vand.u32 4294901760, %v2893_v14 }
  0xe3   :  { %9684 = vst [vmem:[#allocation145_spill] sm:$0xff] %v6846_v13  ;;  %9685 = vst [vmem:[#allocation146_spill] sm:$0xff] %v6848_v8  ;;  %v9690_v59 = vpack.c.bf16 %v9688_v38, %v9689_v17  ;;  %v9691_v26 = vld [vmem:[#allocation33_spill] sm:$0xff]  ;;  %v2984_v41 = vand.u32 4294901760, %v2895_v37  ;;  %v2892_v34 = vld [vmem:[#allocation7 + $0xc0] sm:$0xff]  ;;  %v6862_v29 = vpack.c.bf16 %v2978_v30, %v2974_v52  ;;  %v6864_v50 = vsub.f32 %v2890_v55, %v2978_v30 }
  0xe4   :  { %9686 = vst [vmem:[#allocation147_spill] sm:$0xff] %v6850_v43  ;;  %9687 = vst [vmem:[#allocation148_spill] sm:$0xff] %v6852_v57  ;;  %4884 = vmatpush1.bf16.msra.mxu0 %v9691_v26  ;;  %v9692_v58 = vld [vmem:[#allocation38_spill] sm:$0xff]  ;;  %v9693_v13 = vld [vmem:[#allocation36_spill] sm:$0xff]  ;;  %v1616_v15 = vand.u32 4294901760, %v204_v10  ;;  %v1620_v17 = vand.u32 4294901760, %v208_v28  ;;  %v6866_v57 = vpack.c.bf16 %v1618_v31, %v1614_v25  ;;  %v6868_v43 = vsub.f32 %v205_v32, %v1614_v25 }
  0xe5   :  { %4692 = vmatpush1.bf16.msra.mxu1 %v9690_v59  ;;  %v9694_v7 = vpack.c.bf16 %v9692_v58, %v9693_v13  ;;  %v9695_v21 = vld [vmem:[#allocation37_spill] sm:$0xff]  ;;  %9696 = vst [vmem:[#allocation35_spill] sm:$0xff] %v6862_v29  ;;  %9697 = vst [vmem:[#allocation34_spill] sm:$0xff] %v6864_v50  ;;  %v2894_v59 = vld [vmem:[#allocation7 + $0xd0] sm:$0xff]  ;;  %v6870_v8 = vsub.f32 %v209_v2, %v1618_v31  ;;  %v6872_v47 = vpack.c.bf16 %v2984_v41, %v2980_v4 }
  0xe6   :  { %4886 = vmatprep.subr.bf16.mxu0 %v9695_v21  ;;  %v213_v38 = vld [vmem:[#allocation8 + $0x1d8] sm:$0xff]  ;;  %9698 = vst [vmem:[#allocation33_spill] sm:$0xff] %v6866_v57  ;;  %9699 = vst [vmem:[#allocation38_spill] sm:$0xff] %v6868_v43  ;;  %v2897_v58 = vld [vmem:[#allocation7 + $0xe8] sm:$0xff]  ;;  %v6874_v52 = vsub.f32 %v2893_v14, %v2980_v4  ;;  %v6876_v55 = vsub.f32 %v2895_v37, %v2984_v41  ;;  %v6878_v30 = vpack.c.bf16 %v1620_v17, %v1616_v15 }
  0xe7   :  { %4694 = vmatprep.subr.bf16.mxu1 %v9694_v7  ;;  %v217_v26 = vld [vmem:[#allocation8 + $0x1f8] sm:$0xff]  ;;  %9700 = vst [vmem:[#allocation36_spill] sm:$0xff] %v6870_v8  ;;  %9701 = vst [vmem:[#allocation37_spill] sm:$0xff] %v6872_v47  ;;  %v212_v7 = vld [vmem:[#allocation8 + $0x1d0] sm:$0xff]  ;;  %v6880_v21 = vsub.f32 %v204_v10, %v1616_v15  ;;  %v6886_v2 = vsub.f32 %v208_v28, %v1620_v17  ;;  %v2982_v25 = vand.u32 4294901760, %v2892_v34  ;;  %v2986_v31 = vand.u32 4294901760, %v2894_v59 }
  0xe8   :  { %v2899_v13 = vld [vmem:[#allocation7 + $0xf8] sm:$0xff]  ;;  %9702 = vst [vmem:[#allocation149_spill] sm:$0xff] %v6874_v52  ;;  %9703 = vst [vmem:[#allocation150_spill] sm:$0xff] %v6876_v55  ;;  %v9707_v29 = vld [vmem:[#allocation40_spill] sm:$0xff]  ;;  %v1622_v8 = vand.u32 4294901760, %v213_v38  ;;  %v1626_v10 = vand.u32 4294901760, %v217_v26 }
  0xe9   :  { %9704 = vst [vmem:[#allocation151_spill] sm:$0xff] %v6878_v30  ;;  %9705 = vst [vmem:[#allocation152_spill] sm:$0xff] %v6880_v21  ;;  %v9706_v50 = vld [vmem:[#allocation41_spill] sm:$0xff]  ;;  %v9709_v32 = vld [vmem:[#allocation39_spill] sm:$0xff]  ;;  %v2988_v15 = vand.u32 4294901760, %v2897_v58  ;;  %v2992_v21 = vand.u32 4294901760, %v2899_v13  ;;  %v6894_v28 = vsub.f32 %v2892_v34, %v2982_v25  ;;  %v6896_v17 = vsub.f32 %v2894_v59, %v2986_v31 }
  0xea   :  { %v9708_v57 = vpack.c.bf16 %v9706_v50, %v9707_v29  ;;  %4888 = vmatpush1.bf16.msra.mxu0 %v9709_v32  ;;  %9710 = vst [vmem:[#allocation41_spill] sm:$0xff] %v6886_v2  ;;  %v216_v43 = vld [vmem:[#allocation8 + $0x1f0] sm:$0xff]  ;;  %v9712_v4 = vld [vmem:[#allocation42_spill] sm:$0xff]  ;;  %v9714_v41 = vld [vmem:[#allocation43_spill] sm:$0xff]  ;;  %v1624_v55 = vand.u32 4294901760, %v212_v7  ;;  %v6892_v50 = vpack.c.bf16 %v2986_v31, %v2982_v25  ;;  %v6898_v32 = vsub.f32 %v213_v38, %v1622_v8 }
  0xeb   :  { %v9711_v14 = vld [vmem:[#allocation44_spill] sm:$0xff]  ;;  %4890 = vmatprep.subr.bf16.mxu0 %v9714_v41  ;;  %v2896_v29 = vld [vmem:[#allocation7 + $0xe0] sm:$0xff]  ;;  %9716 = vst [vmem:[#allocation39_spill] sm:$0xff] %v6894_v28  ;;  %v221_v2 = vld [vmem:[#allocation8 + $0x218] sm:$0xff]  ;;  %v6904_v41 = vpack.c.bf16 %v2992_v21, %v2988_v15  ;;  %v6906_v30 = vsub.f32 %v2897_v58, %v2988_v15  ;;  %v6912_v38 = vsub.f32 %v2899_v13, %v2992_v21  ;;  %v1628_v25 = vand.u32 4294901760, %v216_v43 }
  0xec   :  { %4696 = vmatpush1.bf16.msra.mxu1 %v9708_v57  ;;  %v9713_v37 = vpack.c.bf16 %v9711_v14, %v9712_v4  ;;  %v2898_v57 = vld [vmem:[#allocation7 + $0xf0] sm:$0xff]  ;;  %9715 = vst [vmem:[#allocation40_spill] sm:$0xff] %v6892_v50  ;;  %9717 = vst [vmem:[#allocation44_spill] sm:$0xff] %v6896_v17  ;;  %v225_v52 = vld [vmem:[#allocation8 + $0x238] sm:$0xff]  ;;  %v6900_v4 = vpack.c.bf16 %v1626_v10, %v1622_v8  ;;  %v6914_v31 = vsub.f32 %v212_v7, %v1624_v55 }
  0xed   :  { %9718 = vst [vmem:[#allocation42_spill] sm:$0xff] %v6898_v32  ;;  %v2901_v14 = vld [vmem:[#allocation7 + $0x108] sm:$0xff]  ;;  %9721 = vst [vmem:[#allocation154_spill] sm:$0xff] %v6904_v41  ;;  %v2903_v47 = vld [vmem:[#allocation7 + $0x118] sm:$0xff]  ;;  %v2990_v8 = vand.u32 4294901760, %v2896_v29  ;;  %v2994_v58 = vand.u32 4294901760, %v2898_v57 }
  0xee   :  { %4698 = vmatprep.subr.bf16.mxu1 %v9713_v37  ;;  %9719 = vst [vmem:[#allocation43_spill] sm:$0xff] %v6900_v4  ;;  %v6902_v37 = vsub.f32 %v217_v26, %v1626_v10  ;;  %9722 = vst [vmem:[#allocation155_spill] sm:$0xff] %v6906_v30  ;;  %v9723_v3 = vld [vmem:[#allocation47_spill] sm:$0xff]  ;;  %v9724_v50 = vld [vmem:[#allocation45_spill] sm:$0xff]  ;;  %v1630_v15 = vand.u32 4294901760, %v221_v2  ;;  %v1634_v30 = vand.u32 4294901760, %v225_v52 }
  0xef   :  { %v9725_v34 = vpack.c.bf16 %v9723_v3, %v9724_v50  ;;  %v9726_v59 = vld [vmem:[#allocation46_spill] sm:$0xff]  ;;  %9727 = vst [vmem:[#allocation47_spill] sm:$0xff] %v6912_v38  ;;  %9728 = vst [vmem:[#allocation45_spill] sm:$0xff] %v6914_v31  ;;  %v9730_v26 = vld [vmem:[#allocation49_spill] sm:$0xff]  ;;  %v2996_v17 = vand.u32 4294901760, %v2901_v14  ;;  %v6920_v50 = vpack.c.bf16 %v1628_v25, %v1624_v55  ;;  %v6924_v13 = vsub.f32 %v2896_v29, %v2990_v8 }
  0xf0   :  { %9720 = vst [vmem:[#allocation153_spill] sm:$0xff] %v6902_v37  ;;  %4892 = vmatpush1.bf16.msra.mxu0 %v9726_v59  ;;  %v9729_v32 = vld [vmem:[#allocation50_spill] sm:$0xff]  ;;  %v9732_v37 = vld [vmem:[#allocation48_spill] sm:$0xff]  ;;  %v3000_v7 = vand.u32 4294901760, %v2903_v47  ;;  %v6926_v38 = vpack.c.bf16 %v2994_v58, %v2990_v8  ;;  %v233_v28 = vld [vmem:[#allocation8 + $0x278] sm:$0xff] }
  0xf1   :  { %4700 = vmatpush1.bf16.msra.mxu1 %v9725_v34  ;;  %v9731_v10 = vpack.c.bf16 %v9729_v32, %v9730_v26  ;;  %4894 = vmatprep.subr.bf16.mxu0 %v9732_v37  ;;  %v220_v3 = vld [vmem:[#allocation8 + $0x210] sm:$0xff]  ;;  %9733 = vst [vmem:[#allocation46_spill] sm:$0xff] %v6920_v50  ;;  %v6922_v34 = vsub.f32 %v216_v43, %v1628_v25  ;;  %9735 = vst [vmem:[#allocation49_spill] sm:$0xff] %v6924_v13  ;;  %v2900_v59 = vld [vmem:[#allocation7 + $0x100] sm:$0xff] }
  0xf2   :  { %v224_v21 = vld [vmem:[#allocation8 + $0x230] sm:$0xff]  ;;  %9736 = vst [vmem:[#allocation48_spill] sm:$0xff] %v6926_v38  ;;  %v6928_v32 = vsub.f32 %v2898_v57, %v2994_v58  ;;  %v6930_v37 = vpack.c.bf16 %v1634_v30, %v1630_v15  ;;  %v6932_v26 = vsub.f32 %v221_v2, %v1630_v15  ;;  %v2905_v55 = vld [vmem:[#allocation7 + $0x128] sm:$0xff]  ;;  %v9740_v43 = vpack.c.bf16 %v9569_v11, %v6100_v60  ;;  %v9745_v58 = vld [vmem:[#allocation53_spill] sm:$0xff] }
  0xf3   :  { %4702 = vmatprep.subr.bf16.mxu1 %v9731_v10  ;;  %9734 = vst [vmem:[#allocation50_spill] sm:$0xff] %v6922_v34  ;;  %v2902_v31 = vld [vmem:[#allocation7 + $0x110] sm:$0xff]  ;;  %v229_v10 = vld [vmem:[#allocation8 + $0x258] sm:$0xff]  ;;  %v9741_v29 = vld [vmem:[#allocation51_spill] sm:$0xff]  ;;  %v6938_v25 = vsub.f32 %v225_v52, %v1634_v30  ;;  %v6940_v13 = vpack.c.bf16 %v3000_v7, %v2996_v17  ;;  %v6942_v8 = vsub.f32 %v2901_v14, %v2996_v17  ;;  %v1632_v57 = vand.u32 4294901760, %v220_v3 }
  0xf4   :  { %9737 = vst [vmem:[#allocation156_spill] sm:$0xff] %v6928_v32  ;;  %9738 = vst [vmem:[#allocation157_spill] sm:$0xff] %v6930_v37  ;;  %4896 = vmatpush1.bf16.msra.mxu0 %v9741_v29  ;;  %v9746_v2 = vpack.c.bf16 %v9571_v48, %v9745_v58  ;;  %v9747_v15 = vld [vmem:[#allocation54_spill] sm:$0xff]  ;;  %v1636_v32 = vand.u32 4294901760, %v224_v21  ;;  %v2998_v60 = vand.u32 4294901760, %v2900_v59  ;;  %v3002_v11 = vand.u32 4294901760, %v2902_v31 }
  0xf5   :  { %9739 = vst [vmem:[#allocation158_spill] sm:$0xff] %v6932_v26  ;;  %4704 = vmatpush1.bf16.msra.mxu1 %v9740_v43  ;;  %9742 = vst [vmem:[#allocation51_spill] sm:$0xff] %v6938_v25  ;;  %4898 = vmatprep.subr.bf16.mxu0 %v9747_v15  ;;  %v6948_v26 = vsub.f32 %v2903_v47, %v3000_v7  ;;  %v2907_v43 = vld [vmem:[#allocation7 + $0x138] sm:$0xff]  ;;  %v6950_v29 = vsub.f32 %v220_v3, %v1632_v57  ;;  %v1638_v52 = vand.u32 4294901760, %v229_v10  ;;  %v228_v17 = vld [vmem:[#allocation8 + $0x250] sm:$0xff] }
  0xf6   :  { %9743 = vst [vmem:[#allocation159_spill] sm:$0xff] %v6940_v13  ;;  %9744 = vst [vmem:[#allocation160_spill] sm:$0xff] %v6942_v8  ;;  %4706 = vmatprep.subr.bf16.mxu1 %v9746_v2  ;;  %v1642_v30 = vand.u32 4294901760, %v233_v28  ;;  %v3004_v25 = vand.u32 4294901760, %v2905_v55  ;;  %v232_v14 = vld [vmem:[#allocation8 + $0x270] sm:$0xff]  ;;  %v6952_v8 = vpack.c.bf16 %v1636_v32, %v1632_v57  ;;  %v6954_v34 = vsub.f32 %v224_v21, %v1636_v32  ;;  %v2904_v47 = vld [vmem:[#allocation7 + $0x120] sm:$0xff] }
  0xf7   :  { %9748 = vst [vmem:[#allocation53_spill] sm:$0xff] %v6948_v26  ;;  %9749 = vst [vmem:[#allocation54_spill] sm:$0xff] %v6950_v29  ;;  %v6956_v48 = vpack.c.bf16 %v3002_v11, %v2998_v60  ;;  %v6958_v58 = vsub.f32 %v2900_v59, %v2998_v60  ;;  %v2906_v7 = vld [vmem:[#allocation7 + $0x130] sm:$0xff]  ;;  %v9754_v2 = vld [vmem:[#allocation58_spill] sm:$0xff]  ;;  %v6964_v29 = vsub.f32 %v2902_v31, %v3002_v11  ;;  %v3008_v21 = vand.u32 4294901760, %v2907_v43 }
  0xf8   :  { %9750 = vst [vmem:[#allocation161_spill] sm:$0xff] %v6952_v8  ;;  %9751 = vst [vmem:[#allocation162_spill] sm:$0xff] %v6954_v34  ;;  %v9755_v15 = vld [vmem:[#allocation57_spill] sm:$0xff]  ;;  %v9757_v3 = vld [vmem:[#allocation56_spill] sm:$0xff]  ;;  %v6966_v13 = vpack.c.bf16 %v1642_v30, %v1638_v52  ;;  %v6968_v57 = vsub.f32 %v229_v10, %v1638_v52  ;;  %v3006_v10 = vand.u32 4294901760, %v2904_v47  ;;  %v3010_v52 = vand.u32 4294901760, %v2906_v7 }
  0xf9   :  { %9752 = vst [vmem:[#allocation163_spill] sm:$0xff] %v6956_v48  ;;  %9753 = vst [vmem:[#allocation164_spill] sm:$0xff] %v6958_v58  ;;  %v9756_v26 = vpack.c.bf16 %v9754_v2, %v9755_v15  ;;  %4900 = vmatpush1.bf16.msra.mxu0 %v9757_v3  ;;  %v237_v32 = vld [vmem:[#allocation8 + $0x298] sm:$0xff]  ;;  %v9762_v48 = vld [vmem:[#allocation60_spill] sm:$0xff]  ;;  %v6974_v58 = vsub.f32 %v233_v28, %v1642_v30  ;;  %v6976_v2 = vsub.f32 %v2905_v55, %v3004_v25 }
  0xfa   :  { %9758 = vst [vmem:[#allocation58_spill] sm:$0xff] %v6964_v29  ;;  %9759 = vst [vmem:[#allocation57_spill] sm:$0xff] %v6966_v13  ;;  %v9761_v34 = vld [vmem:[#allocation61_spill] sm:$0xff]  ;;  %v9764_v60 = vld [vmem:[#allocation59_spill] sm:$0xff]  ;;  %v1644_v15 = vand.u32 4294901760, %v232_v14  ;;  %v6978_v11 = vpack.c.bf16 %v3008_v21, %v3004_v25  ;;  %v6980_v3 = vsub.f32 %v2907_v43, %v3008_v21  ;;  %v1646_v55 = vand.u32 4294901760, %v237_v32 }
  0xfb   :  { %4708 = vmatpush1.bf16.msra.mxu1 %v9756_v26  ;;  %9760 = vst [vmem:[#allocation56_spill] sm:$0xff] %v6968_v57  ;;  %v9763_v59 = vpack.c.bf16 %v9761_v34, %v9762_v48  ;;  %4902 = vmatprep.subr.bf16.mxu0 %v9764_v60  ;;  %9765 = vst [vmem:[#allocation61_spill] sm:$0xff] %v6974_v58  ;;  %v1640_v26 = vand.u32 4294901760, %v228_v17  ;;  %v241_v31 = vld [vmem:[#allocation8 + $0x2b8] sm:$0xff]  ;;  %v2909_v57 = vld [vmem:[#allocation7 + $0x148] sm:$0xff]  ;;  %v9772_v25 = vpack.c.bf16 %v9577_v27, %v9576_v33 }
  0xfc   :  { %9766 = vst [vmem:[#allocation60_spill] sm:$0xff] %v6976_v2  ;;  %9767 = vst [vmem:[#allocation59_spill] sm:$0xff] %v6978_v11  ;;  %v2911_v29 = vld [vmem:[#allocation7 + $0x158] sm:$0xff]  ;;  %v236_v13 = vld [vmem:[#allocation8 + $0x290] sm:$0xff]  ;;  %v6986_v28 = vsub.f32 %v232_v14, %v1644_v15  ;;  %v6992_v21 = vpack.c.bf16 %v3010_v52, %v3006_v10  ;;  %v6994_v60 = vsub.f32 %v2904_v47, %v3006_v10  ;;  %v1650_v2 = vand.u32 4294901760, %v241_v31 }
  0xfd   :  { %4710 = vmatprep.subr.bf16.mxu1 %v9763_v59  ;;  %9768 = vst [vmem:[#allocation165_spill] sm:$0xff] %v6980_v3  ;;  %v6982_v34 = vpack.c.bf16 %v1644_v15, %v1640_v26  ;;  %v6984_v48 = vsub.f32 %v228_v17, %v1640_v26  ;;  %v240_v30 = vld [vmem:[#allocation8 + $0x2b0] sm:$0xff]  ;;  %v2908_v59 = vld [vmem:[#allocation7 + $0x140] sm:$0xff]  ;;  %v9773_v43 = vld [vmem:[#allocation63_spill] sm:$0xff]  ;;  %v6996_v3 = vsub.f32 %v2906_v7, %v3010_v52  ;;  %v3016_v33 = vand.u32 4294901760, %v2911_v29 }
  0xfe   :  { %9771 = vst [vmem:[#allocation168_spill] sm:$0xff] %v6986_v28  ;;  %4904 = vmatpush1.bf16.msra.mxu0 %v9773_v43  ;;  %9774 = vst [vmem:[#allocation63_spill] sm:$0xff] %v6992_v21  ;;  %v9777_v17 = vld [vmem:[#allocation66_spill] sm:$0xff]  ;;  %v9779_v26 = vld [vmem:[#allocation65_spill] sm:$0xff]  ;;  %v7002_v15 = vsub.f32 %v237_v32, %v1646_v55  ;;  %v3012_v28 = vand.u32 4294901760, %v2909_v57  ;;  %v1648_v27 = vand.u32 4294901760, %v236_v13  ;;  %v7006_v47 = vsub.f32 %v241_v31, %v1650_v2 }
  0xff   :  { %9769 = vst [vmem:[#allocation166_spill] sm:$0xff] %v6982_v34  ;;  %9770 = vst [vmem:[#allocation167_spill] sm:$0xff] %v6984_v48  ;;  %4712 = vmatpush1.bf16.msra.mxu1 %v9772_v25  ;;  %v9778_v14 = vpack.c.bf16 %v9579_v54, %v9777_v17  ;;  %4906 = vmatprep.subr.bf16.mxu0 %v9779_v26  ;;  %v2910_v25 = vld [vmem:[#allocation7 + $0x150] sm:$0xff]  ;;  %v245_v43 = vld [vmem:[#allocation8 + $0x2d8] sm:$0xff]  ;;  %v7004_v48 = vpack.c.bf16 %v1650_v2, %v1646_v55  ;;  %v1652_v7 = vand.u32 4294901760, %v240_v30 }
 0x100   :  { %9775 = vst [vmem:[#allocation169_spill] sm:$0xff] %v6994_v60  ;;  %9776 = vst [vmem:[#allocation170_spill] sm:$0xff] %v6996_v3  ;;  %v3014_v10 = vand.u32 4294901760, %v2908_v59  ;;  %v249_v52 = vld [vmem:[#allocation8 + $0x2f8] sm:$0xff]  ;;  %v2913_v3 = vld [vmem:[#allocation7 + $0x168] sm:$0xff]  ;;  %v7008_v54 = vpack.c.bf16 %v3016_v33, %v3012_v28  ;;  %v7010_v17 = vsub.f32 %v2909_v57, %v3012_v28  ;;  %v7012_v32 = vsub.f32 %v2911_v29, %v3016_v33 }
 0x101   :  { %4714 = vmatprep.subr.bf16.mxu1 %v9778_v14  ;;  %9780 = vst [vmem:[#allocation66_spill] sm:$0xff] %v7002_v15  ;;  %9781 = vst [vmem:[#allocation65_spill] sm:$0xff] %v7004_v48  ;;  %v2915_v60 = vld [vmem:[#allocation7 + $0x178] sm:$0xff]  ;;  %v7014_v14 = vsub.f32 %v236_v13, %v1648_v27  ;;  %v244_v26 = vld [vmem:[#allocation8 + $0x2d0] sm:$0xff]  ;;  %v7020_v31 = vpack.c.bf16 %v1652_v7, %v1648_v27  ;;  %v3018_v21 = vand.u32 4294901760, %v2910_v25  ;;  %v1654_v33 = vand.u32 4294901760, %v245_v43 }
 0x102   :  { %9782 = vst [vmem:[#allocation171_spill] sm:$0xff] %v7006_v47  ;;  %9783 = vst [vmem:[#allocation172_spill] sm:$0xff] %v7008_v54  ;;  %v248_v15 = vld [vmem:[#allocation8 + $0x2f0] sm:$0xff]  ;;  %v9787_v58 = vld [vmem:[#allocation70_spill] sm:$0xff]  ;;  %v7022_v47 = vsub.f32 %v240_v30, %v1652_v7  ;;  %v7024_v54 = vsub.f32 %v2908_v59, %v3014_v10  ;;  %v1656_v30 = vand.u32 4294901760, %v244_v26 }
 0x103   :  { %9784 = vst [vmem:[#allocation173_spill] sm:$0xff] %v7010_v17  ;;  %9785 = vst [vmem:[#allocation174_spill] sm:$0xff] %v7012_v32  ;;  %v9788_v55 = vld [vmem:[#allocation69_spill] sm:$0xff]  ;;  %v9790_v2 = vld [vmem:[#allocation68_spill] sm:$0xff]  ;;  %v3020_v32 = vand.u32 4294901760, %v2913_v3  ;;  %v7032_v27 = vsub.f32 %v2910_v25, %v3018_v21  ;;  %v1660_v7 = vand.u32 4294901760, %v248_v15 }
 0x104   :  { %9786 = vst [vmem:[#allocation175_spill] sm:$0xff] %v7014_v14  ;;  %v9789_v48 = vpack.c.bf16 %v9787_v58, %v9788_v55  ;;  %4908 = vmatpush1.bf16.msra.mxu0 %v9790_v2  ;;  %9791 = vst [vmem:[#allocation70_spill] sm:$0xff] %v7020_v31  ;;  %v9794_v57 = vld [vmem:[#allocation73_spill] sm:$0xff]  ;;  %v9795_v29 = vld [vmem:[#allocation71_spill] sm:$0xff]  ;;  %v1658_v14 = vand.u32 4294901760, %v249_v52  ;;  %v3024_v58 = vand.u32 4294901760, %v2915_v60  ;;  %v7030_v55 = vpack.c.bf16 %v3018_v21, %v3014_v10 }
 0x105   :  { %9792 = vst [vmem:[#allocation69_spill] sm:$0xff] %v7022_v47  ;;  %9793 = vst [vmem:[#allocation68_spill] sm:$0xff] %v7024_v54  ;;  %v9796_v28 = vpack.c.bf16 %v9794_v57, %v9795_v29  ;;  %v9797_v13 = vld [vmem:[#allocation72_spill] sm:$0xff]  ;;  %v253_v59 = vld [vmem:[#allocation8 + $0x318] sm:$0xff]  ;;  %v7036_v47 = vsub.f32 %v245_v43, %v1654_v33  ;;  %v9804_v10 = vpack.c.bf16 %v9585_v63, %v9584_v45 }
 0x106   :  { %4716 = vmatpush1.bf16.msra.mxu1 %v9789_v48  ;;  %4910 = vmatprep.subr.bf16.mxu0 %v9797_v13  ;;  %v2912_v48 = vld [vmem:[#allocation7 + $0x160] sm:$0xff]  ;;  %9798 = vst [vmem:[#allocation73_spill] sm:$0xff] %v7030_v55  ;;  %9799 = vst [vmem:[#allocation71_spill] sm:$0xff] %v7032_v27  ;;  %v2914_v2 = vld [vmem:[#allocation7 + $0x170] sm:$0xff]  ;;  %v7034_v54 = vpack.c.bf16 %v1658_v14, %v1654_v33  ;;  %v7038_v57 = vsub.f32 %v249_v52, %v1658_v14 }
 0x107   :  { %4718 = vmatprep.subr.bf16.mxu1 %v9796_v28  ;;  %9801 = vst [vmem:[#allocation176_spill] sm:$0xff] %v7036_v47  ;;  %v7040_v29 = vpack.c.bf16 %v3024_v58, %v3020_v32  ;;  %v257_v28 = vld [vmem:[#allocation8 + $0x338] sm:$0xff]  ;;  %v2917_v13 = vld [vmem:[#allocation7 + $0x188] sm:$0xff]  ;;  %v9805_v21 = vld [vmem:[#allocation74_spill] sm:$0xff]  ;;  %v7046_v25 = vsub.f32 %v2913_v3, %v3020_v32  ;;  %v7048_v27 = vsub.f32 %v2915_v60, %v3024_v58  ;;  %v3022_v43 = vand.u32 4294901760, %v2912_v48 }
 0x108   :  { %9800 = vst [vmem:[#allocation72_spill] sm:$0xff] %v7034_v54  ;;  %9802 = vst [vmem:[#allocation177_spill] sm:$0xff] %v7038_v57  ;;  %v2919_v17 = vld [vmem:[#allocation7 + $0x198] sm:$0xff]  ;;  %4912 = vmatpush1.bf16.msra.mxu0 %v9805_v21  ;;  %v7050_v54 = vpack.c.bf16 %v1660_v7, %v1656_v30  ;;  %v252_v52 = vld [vmem:[#allocation8 + $0x310] sm:$0xff]  ;;  %v9809_v14 = vpack.c.bf16 %v9587_v9, %v9586_v20  ;;  %v7056_v57 = vsub.f32 %v244_v26, %v1656_v30 }
 0x109   :  { %9803 = vst [vmem:[#allocation178_spill] sm:$0xff] %v7040_v29  ;;  %9806 = vst [vmem:[#allocation74_spill] sm:$0xff] %v7046_v25  ;;  %v9810_v33 = vld [vmem:[#allocation78_spill] sm:$0xff]  ;;  %v7058_v45 = vsub.f32 %v248_v15, %v1660_v7  ;;  %v3026_v63 = vand.u32 4294901760, %v2914_v2  ;;  %v256_v3 = vld [vmem:[#allocation8 + $0x330] sm:$0xff]  ;;  %v7060_v32 = vsub.f32 %v2912_v48, %v3022_v43  ;;  %v1666_v60 = vand.u32 4294901760, %v257_v28 }
 0x10a   :  { %4720 = vmatpush1.bf16.msra.mxu1 %v9804_v10  ;;  %9807 = vst [vmem:[#allocation179_spill] sm:$0xff] %v7048_v27  ;;  %9808 = vst [vmem:[#allocation180_spill] sm:$0xff] %v7050_v54  ;;  %4914 = vmatprep.subr.bf16.mxu0 %v9810_v33  ;;  %v1662_v10 = vand.u32 4294901760, %v253_v59  ;;  %v3028_v58 = vand.u32 4294901760, %v2917_v13  ;;  %v3032_v21 = vand.u32 4294901760, %v2919_v17  ;;  %v2916_v27 = vld [vmem:[#allocation7 + $0x180] sm:$0xff] }
 0x10b   :  { %4722 = vmatprep.subr.bf16.mxu1 %v9809_v14  ;;  %9811 = vst [vmem:[#allocation78_spill] sm:$0xff] %v7056_v57  ;;  %9812 = vst [vmem:[#allocation181_spill] sm:$0xff] %v7058_v45  ;;  %v7062_v25 = vpack.c.bf16 %v3026_v63, %v3022_v43  ;;  %v7064_v47 = vsub.f32 %v2914_v2, %v3026_v63  ;;  %v1664_v9 = vand.u32 4294901760, %v252_v52  ;;  %v2918_v26 = vld [vmem:[#allocation7 + $0x190] sm:$0xff]  ;;  %v261_v30 = vld [vmem:[#allocation8 + $0x358] sm:$0xff]  ;;  %v1668_v43 = vand.u32 4294901760, %v256_v3 }
 0x10c   :  { %9813 = vst [vmem:[#allocation182_spill] sm:$0xff] %v7060_v32  ;;  %v7066_v20 = vsub.f32 %v253_v59, %v1662_v10  ;;  %v9817_v15 = vld [vmem:[#allocation80_spill] sm:$0xff]  ;;  %v9819_v14 = vld [vmem:[#allocation81_spill] sm:$0xff]  ;;  %v7072_v48 = vpack.c.bf16 %v1666_v60, %v1662_v10  ;;  %v7074_v33 = vsub.f32 %v257_v28, %v1666_v60  ;;  %v7076_v32 = vpack.c.bf16 %v3032_v21, %v3028_v58  ;;  %v2921_v63 = vld [vmem:[#allocation7 + $0x1a8] sm:$0xff] }
 0x10d   :  { %9814 = vst [vmem:[#allocation183_spill] sm:$0xff] %v7062_v25  ;;  %9815 = vst [vmem:[#allocation184_spill] sm:$0xff] %v7064_v47  ;;  %v9818_v7 = vpack.c.bf16 %v9589_v12, %v9817_v15  ;;  %4916 = vmatpush1.bf16.msra.mxu0 %v9819_v14  ;;  %v265_v2 = vld [vmem:[#allocation8 + $0x378] sm:$0xff]  ;;  %v9824_v47 = vld [vmem:[#allocation83_spill] sm:$0xff]  ;;  %v7082_v12 = vsub.f32 %v2917_v13, %v3028_v58  ;;  %v7084_v15 = vsub.f32 %v2919_v17, %v3032_v21 }
 0x10e   :  { %9816 = vst [vmem:[#allocation185_spill] sm:$0xff] %v7066_v20  ;;  %9820 = vst [vmem:[#allocation80_spill] sm:$0xff] %v7072_v48  ;;  %v2923_v59 = vld [vmem:[#allocation7 + $0x1b8] sm:$0xff]  ;;  %v9823_v20 = vpack.c.bf16 %v9591_v49, %v9590_v1  ;;  %4918 = vmatprep.subr.bf16.mxu0 %v9824_v47  ;;  %v7086_v10 = vsub.f32 %v252_v52, %v1664_v9  ;;  %v3030_v28 = vand.u32 4294901760, %v2916_v27  ;;  %v260_v60 = vld [vmem:[#allocation8 + $0x350] sm:$0xff]  ;;  %v1670_v45 = vand.u32 4294901760, %v261_v30 }
 0x10f   :  { %4724 = vmatpush1.bf16.msra.mxu1 %v9818_v7  ;;  %9821 = vst [vmem:[#allocation81_spill] sm:$0xff] %v7074_v33  ;;  %9822 = vst [vmem:[#allocation186_spill] sm:$0xff] %v7076_v32  ;;  %v7088_v7 = vpack.c.bf16 %v1668_v43, %v1664_v9  ;;  %v7090_v14 = vsub.f32 %v256_v3, %v1668_v43  ;;  %v3034_v33 = vand.u32 4294901760, %v2918_v26  ;;  %v264_v57 = vld [vmem:[#allocation8 + $0x370] sm:$0xff]  ;;  %v1674_v49 = vand.u32 4294901760, %v265_v2  ;;  %v2920_v13 = vld [vmem:[#allocation7 + $0x1a0] sm:$0xff] }
 0x110   :  { %4726 = vmatprep.subr.bf16.mxu1 %v9823_v20  ;;  %9825 = vst [vmem:[#allocation83_spill] sm:$0xff] %v7082_v12  ;;  %9826 = vst [vmem:[#allocation187_spill] sm:$0xff] %v7084_v15  ;;  %v7092_v32 = vsub.f32 %v2916_v27, %v3030_v28  ;;  %v3036_v1 = vand.u32 4294901760, %v2921_v63  ;;  %v3040_v47 = vand.u32 4294901760, %v2923_v59  ;;  %v9831_v58 = vld [vmem:[#allocation88_spill] sm:$0xff]  ;;  %v9832_v17 = vld [vmem:[#allocation87_spill] sm:$0xff]  ;;  %v7102_v3 = vsub.f32 %v261_v30, %v1670_v45 }
 0x111   :  { %9827 = vst [vmem:[#allocation188_spill] sm:$0xff] %v7086_v10  ;;  %9828 = vst [vmem:[#allocation189_spill] sm:$0xff] %v7088_v7  ;;  %v9833_v21 = vpack.c.bf16 %v9831_v58, %v9832_v17  ;;  %v9834_v52 = vld [vmem:[#allocation86_spill] sm:$0xff]  ;;  %v7098_v20 = vpack.c.bf16 %v3034_v33, %v3030_v28  ;;  %v7100_v9 = vsub.f32 %v2918_v26, %v3034_v33  ;;  %v1672_v43 = vand.u32 4294901760, %v260_v60  ;;  %v269_v27 = vld [vmem:[#allocation8 + $0x398] sm:$0xff] }
 0x112   :  { %9829 = vst [vmem:[#allocation190_spill] sm:$0xff] %v7090_v14  ;;  %9830 = vst [vmem:[#allocation191_spill] sm:$0xff] %v7092_v32  ;;  %4920 = vmatpush1.bf16.msra.mxu0 %v9834_v52  ;;  %v2922_v14 = vld [vmem:[#allocation7 + $0x1b0] sm:$0xff]  ;;  %v9838_v32 = vpack.c.bf16 %v9549_v40, %v9548_v62  ;;  %v9839_v10 = vld [vmem:[#allocation89_spill] sm:$0xff]  ;;  %v7108_v15 = vpack.c.bf16 %v1674_v49, %v1670_v45  ;;  %v7110_v58 = vsub.f32 %v265_v2, %v1674_v49 }
 0x113   :  { %4728 = vmatpush1.bf16.msra.mxu1 %v9833_v21  ;;  %9835 = vst [vmem:[#allocation88_spill] sm:$0xff] %v7098_v20  ;;  %9836 = vst [vmem:[#allocation87_spill] sm:$0xff] %v7100_v9  ;;  %4922 = vmatprep.subr.bf16.mxu0 %v9839_v10  ;;  %v7112_v17 = vpack.c.bf16 %v3040_v47, %v3036_v1  ;;  %v1676_v28 = vand.u32 4294901760, %v264_v57  ;;  %v273_v26 = vld [vmem:[#allocation8 + $0x3b8] sm:$0xff]  ;;  %v2925_v33 = vld [vmem:[#allocation7 + $0x1c8] sm:$0xff]  ;;  %v7114_v21 = vsub.f32 %v2921_v63, %v3036_v1 }
 0x114   :  { %9837 = vst [vmem:[#allocation86_spill] sm:$0xff] %v7102_v3  ;;  %4730 = vmatprep.subr.bf16.mxu1 %v9838_v32  ;;  %9840 = vst [vmem:[#allocation89_spill] sm:$0xff] %v7108_v15  ;;  %v2927_v30 = vld [vmem:[#allocation7 + $0x1d8] sm:$0xff]  ;;  %v7116_v52 = vsub.f32 %v2923_v59, %v3040_v47  ;;  %v7118_v3 = vsub.f32 %v260_v60, %v1672_v43  ;;  %v3038_v62 = vand.u32 4294901760, %v2920_v13  ;;  %v268_v40 = vld [vmem:[#allocation8 + $0x390] sm:$0xff]  ;;  %v3042_v2 = vand.u32 4294901760, %v2922_v14 }
 0x115   :  { %9841 = vst [vmem:[#allocation192_spill] sm:$0xff] %v7110_v58  ;;  %9842 = vst [vmem:[#allocation193_spill] sm:$0xff] %v7112_v17  ;;  %v7120_v32 = vpack.c.bf16 %v1676_v28, %v1672_v43  ;;  %v7122_v45 = vsub.f32 %v264_v57, %v1676_v28  ;;  %v1678_v10 = vand.u32 4294901760, %v269_v27  ;;  %v9848_v49 = vld [vmem:[#allocation94_spill] sm:$0xff]  ;;  %v9849_v58 = vld [vmem:[#allocation92_spill] sm:$0xff]  ;;  %v1682_v59 = vand.u32 4294901760, %v273_v26 }
 0x116   :  { %9843 = vst [vmem:[#allocation194_spill] sm:$0xff] %v7114_v21  ;;  %9844 = vst [vmem:[#allocation195_spill] sm:$0xff] %v7116_v52  ;;  %v9850_v9 = vpack.c.bf16 %v9848_v49, %v9849_v58  ;;  %v9851_v12 = vld [vmem:[#allocation93_spill] sm:$0xff]  ;;  %v7128_v63 = vsub.f32 %v2920_v13, %v3038_v62  ;;  %v3044_v1 = vand.u32 4294901760, %v2925_v33  ;;  %v3048_v60 = vand.u32 4294901760, %v2927_v30  ;;  %v272_v47 = vld [vmem:[#allocation8 + $0x3b0] sm:$0xff] }
 0x117   :  { %9845 = vst [vmem:[#allocation196_spill] sm:$0xff] %v7118_v3  ;;  %9846 = vst [vmem:[#allocation197_spill] sm:$0xff] %v7120_v32  ;;  %4924 = vmatpush1.bf16.msra.mxu0 %v9851_v12  ;;  %v2924_v3 = vld [vmem:[#allocation7 + $0x1c0] sm:$0xff]  ;;  %v2926_v52 = vld [vmem:[#allocation7 + $0x1d0] sm:$0xff]  ;;  %v9853_v57 = vpack.c.bf16 %v9555_v51, %v9553_v42  ;;  %v7134_v28 = vpack.c.bf16 %v3042_v2, %v3038_v62  ;;  %v7136_v58 = vsub.f32 %v2922_v14, %v3042_v2 }
 0x118   :  { %9847 = vst [vmem:[#allocation198_spill] sm:$0xff] %v7122_v45  ;;  %4732 = vmatpush1.bf16.msra.mxu1 %v9850_v9  ;;  %9852 = vst [vmem:[#allocation94_spill] sm:$0xff] %v7128_v63  ;;  %v9854_v43 = vld [vmem:[#allocation96_spill] sm:$0xff]  ;;  %v7138_v9 = vsub.f32 %v269_v27, %v1678_v10  ;;  %v1680_v12 = vand.u32 4294901760, %v268_v40  ;;  %v277_v13 = vld [vmem:[#allocation8 + $0x3d8] sm:$0xff]  ;;  %v7140_v45 = vpack.c.bf16 %v1682_v59, %v1678_v10  ;;  %v1684_v62 = vand.u32 4294901760, %v272_v47 }
 0x119   :  { %4734 = vmatprep.subr.bf16.mxu1 %v9853_v57  ;;  %4926 = vmatprep.subr.bf16.mxu0 %v9854_v43  ;;  %9855 = vst [vmem:[#allocation92_spill] sm:$0xff] %v7134_v28  ;;  %9856 = vst [vmem:[#allocation93_spill] sm:$0xff] %v7136_v58  ;;  %v281_v49 = vld [vmem:[#allocation8 + $0x3f8] sm:$0xff]  ;;  %v2929_v63 = vld [vmem:[#allocation7 + $0x1e8] sm:$0xff]  ;;  %v7142_v21 = vsub.f32 %v273_v26, %v1682_v59  ;;  %v7144_v32 = vpack.c.bf16 %v3048_v60, %v3044_v1  ;;  %v3046_v27 = vand.u32 4294901760, %v2924_v3 }
 0x11a   :  { %9857 = vst [vmem:[#allocation96_spill] sm:$0xff] %v7138_v9  ;;  %9858 = vst [vmem:[#allocation199_spill] sm:$0xff] %v7140_v45  ;;  %v7146_v42 = vsub.f32 %v2925_v33, %v3044_v1  ;;  %v2931_v51 = vld [vmem:[#allocation7 + $0x1f8] sm:$0xff]  ;;  %v7148_v57 = vsub.f32 %v2927_v30, %v3048_v60  ;;  %v7150_v14 = vsub.f32 %v268_v40, %v1680_v12  ;;  %v9864_v2 = vld [vmem:[#allocation99_spill] sm:$0xff]  ;;  %v3050_v10 = vand.u32 4294901760, %v2926_v52 }
 0x11b   :  { %9859 = vst [vmem:[#allocation200_spill] sm:$0xff] %v7142_v21  ;;  %9860 = vst [vmem:[#allocation201_spill] sm:$0xff] %v7144_v32  ;;  %v9865_v43 = vpack.c.bf16 %v6220_v22, %v9864_v2  ;;  %v9866_v9 = vld [vmem:[#allocation98_spill] sm:$0xff]  ;;  %v1686_v26 = vand.u32 4294901760, %v277_v13  ;;  %v1690_v59 = vand.u32 4294901760, %v281_v49  ;;  %v3052_v21 = vand.u32 4294901760, %v2929_v63 }
 0x11c   :  { %9861 = vst [vmem:[#allocation202_spill] sm:$0xff] %v7146_v42  ;;  %9862 = vst [vmem:[#allocation203_spill] sm:$0xff] %v7148_v57  ;;  %4928 = vmatpush1.bf16.msra.mxu0 %v9866_v9  ;;  %v276_v58 = vld [vmem:[#allocation8 + $0x3d0] sm:$0xff]  ;;  %v9867_v33 = vpack.c.bf16 %v6226_v36, %v6222_v19  ;;  %v7160_v40 = vpack.c.bf16 %v1684_v62, %v1680_v12  ;;  %v7162_v1 = vsub.f32 %v272_v47, %v1684_v62  ;;  %v2928_v9 = vld [vmem:[#allocation7 + $0x1e0] sm:$0xff] }
 0x11d   :  { %9863 = vst [vmem:[#allocation204_spill] sm:$0xff] %v7150_v14  ;;  %4736 = vmatpush1.bf16.msra.mxu1 %v9865_v43  ;;  %v9868_v30 = vld [vmem:[#allocation100_spill] sm:$0xff]  ;;  %v7164_v60 = vsub.f32 %v2924_v3, %v3046_v27  ;;  %v3056_v22 = vand.u32 4294901760, %v2931_v51  ;;  %v7166_v14 = vpack.c.bf16 %v3050_v10, %v3046_v27  ;;  %v7168_v57 = vsub.f32 %v2926_v52, %v3050_v10  ;;  %v9880_v62 = vld [vmem:[#allocation102_spill] sm:$0xff] }
 0x11e   :  { %4738 = vmatprep.subr.bf16.mxu1 %v9867_v33  ;;  %4930 = vmatprep.subr.bf16.mxu0 %v9868_v30  ;;  %9869 = vst [vmem:[#allocation99_spill] sm:$0xff] %v7160_v40  ;;  %9870 = vst [vmem:[#allocation98_spill] sm:$0xff] %v7162_v1  ;;  %v280_v2 = vld [vmem:[#allocation8 + $0x3f0] sm:$0xff]  ;;  %v7170_v42 = vpack.c.bf16 %v1690_v59, %v1686_v26  ;;  %v7172_v19 = vsub.f32 %v277_v13, %v1686_v26  ;;  %v1688_v52 = vand.u32 4294901760, %v276_v58  ;;  %v9883_v13 = vld [vmem:[#allocation97_spill] sm:$0xff] }
 0x11f   :  { %9871 = vst [vmem:[#allocation100_spill] sm:$0xff] %v7164_v60  ;;  %v2930_v43 = vld [vmem:[#allocation7 + $0x1f0] sm:$0xff]  ;;  %9872 = vst [vmem:[#allocation205_spill] sm:$0xff] %v7166_v14  ;;  %v7174_v36 = vsub.f32 %v281_v49, %v1690_v59  ;;  %v7176_v12 = vpack.c.bf16 %v3056_v22, %v3052_v21  ;;  %v7178_v47 = vsub.f32 %v2929_v63, %v3052_v21  ;;  %v1692_v10 = vand.u32 4294901760, %v280_v2  ;;  %v9885_v26 = vld [vmem:[#allocation19_spill] sm:$0xff] }
 0x120   :  { %9873 = vst [vmem:[#allocation206_spill] sm:$0xff] %v7168_v57  ;;  %9874 = vst [vmem:[#allocation207_spill] sm:$0xff] %v7170_v42  ;;  %v7180_v3 = vsub.f32 %v2931_v51, %v3056_v22  ;;  %v9881_v33 = vpack.c.bf16 %v6240_v53, %v9880_v62  ;;  %v9882_v27 = vld [vmem:[#allocation104_spill] sm:$0xff]  ;;  %v3054_v30 = vand.u32 4294901760, %v2928_v9  ;;  %v3058_v57 = vand.u32 4294901760, %v2930_v43  ;;  %v9886_v21 = vld [vmem:[#allocation21_spill] sm:$0xff] }
 0x121   :  { %9875 = vst [vmem:[#allocation208_spill] sm:$0xff] %v7172_v19  ;;  %9876 = vst [vmem:[#allocation209_spill] sm:$0xff] %v7174_v36  ;;  %4932 = vmatpush1.bf16.msra.mxu0 %v9882_v27  ;;  %v9884_v49 = vld [vmem:[#allocation24_spill] sm:$0xff]  ;;  %v7190_v51 = vld [vmem:[#allocation2 + $0x8] sm:$0xff]  ;;  %v7198_v27 = vsub.f32 %v276_v58, %v1688_v52 }
 0x122   :  { %9877 = vst [vmem:[#allocation210_spill] sm:$0xff] %v7176_v12  ;;  %9878 = vst [vmem:[#allocation211_spill] sm:$0xff] %v7178_v47  ;;  %4740 = vmatpush1.bf16.msra.mxu1 %v9881_v33  ;;  %5318 = vmatprep.subr.bf16.mxu0 %v9884_v49  ;;  %v7193_v22 = vand.u32 4294901760, %v7190_v51  ;;  %v9888_v53 = vld [vmem:[#allocation26_spill] sm:$0xff]  ;;  %v7196_v33 = vpack.c.bf16 %v1692_v10, %v1688_v52  ;;  %v9893_v49 = vld [vmem:[#allocation108_spill] sm:$0xff]  ;;  %v7206_v63 = vsub.f32 %v2928_v9, %v3054_v30 }
 0x123   :  { %9879 = vst [vmem:[#allocation212_spill] sm:$0xff] %v7180_v3  ;;  %4934 = vmatprep.subr.bf16.mxu1 %v9883_v13  ;;  %9890 = vst [vmem:[#allocation213_spill] sm:$0xff] %v7198_v27  ;;  %v7200_v3 = vsub.f32 %v280_v2, %v1692_v10  ;;  %v7202_v13 = vpack.c.bf16 %v3058_v57, %v3054_v30  ;;  %v7208_v59 = vsub.f32 %v2930_v43, %v3058_v57  ;;  %v9897_v36 = vld [vmem:[#allocation27_spill] sm:$0xff]  ;;  %v9898_v58 = vld [vmem:[#allocation52_spill] sm:$0xff] }
 0x124   :  { %9887 = vst [vmem:[#allocation102_spill] sm:$0xff] %v7193_v22  ;;  %9889 = vst [vmem:[#allocation104_spill] sm:$0xff] %v7196_v33  ;;  %1560 = vmatmul.mubr.f32.vlgmr.msra.gmra.mrb[0].mxu0 %v9636_v5  ;;  %v9896_v47 = vand.u32 4294901760, %v9885_v26  ;;  %v9061_v19 = vand.u32 4294901760, %v9897_v36  ;;  %v9899_v2 = vand.u32 4294901760, %v9886_v21  ;;  %v7221_v9 = vsub.f32 %v7190_v51, %v7193_v22  ;;  %v9902_v10 = vld [vmem:[#allocation29_spill] sm:$0xff] }
 0x125   :  { %9891 = vst [vmem:[#allocation214_spill] sm:$0xff] %v7200_v3  ;;  %9892 = vst [vmem:[#allocation215_spill] sm:$0xff] %v7202_v13  ;;  %1017 = vmatmul.mubr.f32.vlgmr.msra.gmra.mrb[0].mxu1 %v9893_v49  ;;  %5320 = vmatpush1.bf16.msra.mxu0 %v6690_v44  ;;  %v9901_v57 = vand.u32 4294901760, %v9888_v53  ;;  %v7233_v49 = vld [vmem:[#allocation2] sm:$0xff]  ;;  %v9905_v5 = vld [vmem:[#allocation111_spill] sm:$0xff] }
 0x126   :  { %9894 = vst [vmem:[#allocation216_spill] sm:$0xff] %v7206_v63  ;;  %9895 = vst [vmem:[#allocation217_spill] sm:$0xff] %v7208_v59  ;;  %v1714_v62 = vsub.f32 %v9885_v26, %v9896_v47  ;;  %4936 = vmatpush1.bf16.msra.mxu1 %v9898_v58  ;;  %v1726_v52 = vsub.f32 %v9886_v21, %v9899_v2  ;;  %5322 = vmatprep.subr.bf16.mxu0 %v6708_v16  ;;  %v9903_v2 = vld [vmem:[#allocation55_spill] sm:$0xff]  ;;  %v7236_v22 = vand.u32 4294901760, %v7233_v49  ;;  %v9908_v21 = vld [vmem:[#allocation64_spill] sm:$0xff] }
 0x127   :  { %9900 = vst [vmem:[#allocation218_spill] sm:$0xff] %v7221_v9  ;;  %v3144_v43 = vsub.f32 %v9888_v53, %v9901_v57  ;;  %4938 = vmatprep.subr.bf16.mxu1 %v6698_v23  ;;  %v3156_v44 = vsub.f32 %v9897_v36, %v9061_v19  ;;  %v9065_v58 = vand.u32 4294901760, %v9903_v2  ;;  %1699 = vmatprep.mubr.f32.mxu1 %v9905_v5  ;;  %v9070_v47 = vand.u32 4294901760, %v7221_v9  ;;  %v9945_v27 = vld [vmem:[#allocation40_spill] sm:$0xff] }
 0x128   :  { %v1715_v30 = vand.u32 4294901760, %v1714_v62  ;;  %9904 = vst [vmem:[#allocation219_spill] sm:$0xff] %v7236_v22  ;;  %v1727_v57 = vand.u32 4294901760, %v1726_v52  ;;  %v9906_v16 = vand.u32 4294901760, %v9902_v10  ;;  %v7248_v36 = vsub.f32 %v7233_v49, %v7236_v22  ;;  %v9909_v52 = vld [vmem:[#allocation67_spill] sm:$0xff]  ;;  %v9912_v22 = vld [vmem:[#allocation77_spill] sm:$0xff] }
 0x129   :  { %v3145_v23 = vand.u32 4294901760, %v3144_v43  ;;  %v3157_v53 = vand.u32 4294901760, %v3156_v44  ;;  %v1732_v19 = vsub.f32 %v9903_v2, %v9065_v58  ;;  %5324 = vmatpush1.bf16.msra.mxu0 %v6720_v56  ;;  %v3063_v44 = vsub.f32 %v7221_v9, %v9070_v47  ;;  %v9911_v47 = vld [vmem:[#allocation76_spill] sm:$0xff] }
 0x12a   :  { %v1720_v62 = vsub.f32 %v9902_v10, %v9906_v16  ;;  %9907 = vst [vmem:[#allocation111_spill] sm:$0xff] %v7248_v36  ;;  %4940 = vmatpush1.bf16.msra.mxu1 %v6712_v6  ;;  %v7253_v5 = vpack.c.bf16 %v1727_v57, %v1715_v30  ;;  %v9081_v43 = vand.u32 4294901760, %v9909_v52  ;;  %5326 = vmatprep.subr.bf16.mxu0 %v6734_v39  ;;  %v9083_v6 = vand.u32 4294901760, %v7248_v36 }
 0x12b   :  { %4942 = vmatprep.subr.bf16.mxu1 %v6730_v46  ;;  %v7261_v58 = vpack.c.bf16 %v3157_v53, %v3145_v23  ;;  %v1733_v26 = vand.u32 4294901760, %v1732_v19  ;;  %v9910_v56 = vand.u32 4294901760, %v9908_v21  ;;  %v3064_v57 = vand.u32 4294901760, %v3063_v44  ;;  %v9913_v53 = vld [vmem:[#allocation79_spill] sm:$0xff]  ;;  %v9915_v44 = vld [vmem:[#allocation17_spill] sm:$0xff] }
 0x12c   :  { %v1721_v16 = vand.u32 4294901760, %v1720_v62  ;;  %v3162_v62 = vsub.f32 %v9909_v52, %v9081_v43  ;;  %v9086_v9 = vand.u32 4294901760, %v9911_v47  ;;  %v9088_v46 = vand.u32 4294901760, %v9912_v22 }
 0x12d   :  { %v3150_v30 = vsub.f32 %v9908_v21, %v9910_v56  ;;  %v7277_v23 = vsub.f32 %v7248_v36, %v9083_v6  ;;  %v9092_v39 = vand.u32 4294901760, %v9913_v53  ;;  %v9914_v56 = vld [vmem:[#allocation122_spill] sm:$0xff]  ;;  %5328 = vmatpush1.bf16.msra.mxu0 %v9915_v44  ;;  %v9917_v6 = vld [vmem:[#allocation15_spill] sm:$0xff]  ;;  %3065 = vmatprep.mubr.f32.mxu0 %v3064_v57 }
 0x12e   :  { %v7272_v2 = vpack.c.bf16 %v1733_v26, %v1721_v16  ;;  %4944 = vmatpush1.bf16.msra.mxu1 %v9914_v56  ;;  %v3163_v21 = vand.u32 4294901760, %v3162_v62  ;;  %v1738_v43 = vsub.f32 %v9911_v47, %v9086_v9  ;;  %v1750_v26 = vsub.f32 %v9912_v22, %v9088_v46  ;;  %v9916_v16 = vld [vmem:[#allocation84_spill] sm:$0xff]  ;;  %5330 = vmatprep.subr.bf16.mxu0 %v6770_v0  ;;  %v9918_v44 = vld [vmem:[#allocation90_spill] sm:$0xff]  ;;  %v9919_v36 = vld [vmem:[#allocation91_spill] sm:$0xff] }
 0x12f   :  { %v3151_v19 = vand.u32 4294901760, %v3150_v30  ;;  %v9095_v52 = vand.u32 4294901760, %v9916_v16  ;;  %4946 = vmatprep.subr.bf16.mxu1 %v9917_v6  ;;  %v3168_v62 = vsub.f32 %v9913_v53, %v9092_v39  ;;  %v9096_v56 = vand.u32 4294901760, %v9918_v44  ;;  %v9920_v53 = vld [vmem:[#allocation113_spill] sm:$0xff]  ;;  %v9921_v57 = vld [vmem:[#allocation114_spill] sm:$0xff] }
 0x130   :  { %v9097_v9 = vand.u32 4294901760, %v9919_v36  ;;  %v1739_v46 = vand.u32 4294901760, %v1738_v43  ;;  %v1751_v22 = vand.u32 4294901760, %v1750_v26  ;;  %v9105_v10 = vand.u32 4294901760, %v9920_v53  ;;  %v9922_v26 = vld [vmem:[#allocation115_spill] sm:$0xff] }
 0x131   :  { %v7297_v47 = vpack.c.bf16 %v3163_v21, %v3151_v19  ;;  %v3180_v6 = vsub.f32 %v9916_v16, %v9095_v52  ;;  %v3169_v0 = vand.u32 4294901760, %v3168_v62  ;;  %v1744_v30 = vsub.f32 %v9918_v44, %v9096_v56  ;;  %5332 = vmatpush1.bf16.msra.mxu0 %v6788_v35 }
 0x132   :  { %v1756_v39 = vsub.f32 %v9919_v36, %v9097_v9  ;;  %4948 = vmatpush1.bf16.msra.mxu1 %v6780_v18  ;;  %v7311_v21 = vpack.c.bf16 %v1751_v22, %v1739_v46  ;;  %v9109_v19 = vand.u32 4294901760, %v9921_v57  ;;  %v9111_v62 = vand.u32 4294901760, %v9922_v26  ;;  %5334 = vmatprep.subr.bf16.mxu0 %v6808_v24  ;;  %v9923_v18 = vld [vmem:[#allocation117_spill] sm:$0xff]  ;;  %v9924_v22 = vld [vmem:[#allocation119_spill] sm:$0xff] }
 0x133   :  { %v3181_v43 = vand.u32 4294901760, %v3180_v6  ;;  %4950 = vmatprep.subr.bf16.mxu1 %v6800_v61  ;;  %v1745_v52 = vand.u32 4294901760, %v1744_v30  ;;  %v3174_v9 = vsub.f32 %v9920_v53, %v9105_v10  ;;  %v9114_v16 = vand.u32 4294901760, %v9923_v18  ;;  %v9925_v61 = vld [vmem:[#allocation120_spill] sm:$0xff]  ;;  %v9927_v53 = vld [vmem:[#allocation141_spill] sm:$0xff] }
 0x134   :  { %v1757_v56 = vand.u32 4294901760, %v1756_v39  ;;  %v3186_v6 = vsub.f32 %v9921_v57, %v9109_v19  ;;  %v1762_v46 = vsub.f32 %v9922_v26, %v9111_v62  ;;  %v9117_v24 = vand.u32 4294901760, %v9924_v22  ;;  %v9928_v26 = vld [vmem:[#allocation121_spill] sm:$0xff] }
 0x135   :  { %v7321_v35 = vpack.c.bf16 %v3181_v43, %v3169_v0  ;;  %v3175_v39 = vand.u32 4294901760, %v3174_v9  ;;  %v1774_v10 = vsub.f32 %v9923_v18, %v9114_v16  ;;  %v9120_v0 = vand.u32 4294901760, %v9925_v61  ;;  %v9926_v43 = vld [vmem:[#allocation137_spill] sm:$0xff]  ;;  %5336 = vmatpush1.bf16.msra.mxu0 %v9927_v53  ;;  %v9930_v9 = vld [vmem:[#allocation30_spill] sm:$0xff]  ;;  %v9932_v53 = vld [vmem:[#allocation124_spill] sm:$0xff] }
 0x136   :  { %v7330_v30 = vpack.c.bf16 %v1757_v56, %v1745_v52  ;;  %4952 = vmatpush1.bf16.msra.mxu1 %v9926_v43  ;;  %v3187_v19 = vand.u32 4294901760, %v3186_v6  ;;  %v1763_v57 = vand.u32 4294901760, %v1762_v46  ;;  %v3192_v62 = vsub.f32 %v9924_v22, %v9117_v24  ;;  %v9929_v56 = vld [vmem:[#allocation28_spill] sm:$0xff]  ;;  %5338 = vmatprep.subr.bf16.mxu0 %v9930_v9  ;;  %v9931_v43 = vld [vmem:[#allocation123_spill] sm:$0xff] }
 0x137   :  { %v9121_v52 = vand.u32 4294901760, %v9928_v26  ;;  %4954 = vmatprep.subr.bf16.mxu1 %v9929_v56  ;;  %v1775_v36 = vand.u32 4294901760, %v1774_v10  ;;  %v3204_v16 = vsub.f32 %v9925_v61, %v9120_v0  ;;  %v9124_v18 = vand.u32 4294901760, %v9931_v43  ;;  %v9933_v22 = vld [vmem:[#allocation16_spill] sm:$0xff] }
 0x138   :  { %v9126_v6 = vand.u32 4294901760, %v9932_v53  ;;  %v7349_v46 = vpack.c.bf16 %v3187_v19, %v3175_v39  ;;  %v3193_v44 = vand.u32 4294901760, %v3192_v62  ;;  %v9129_v56 = vand.u32 4294901760, %v9933_v22  ;;  %v9934_v19 = vld [vmem:[#allocation145_spill] sm:$0xff]  ;;  %v9935_v62 = vld [vmem:[#allocation35_spill] sm:$0xff] }
 0x139   :  { %v1768_v24 = vsub.f32 %v9928_v26, %v9121_v52  ;;  %v7355_v59 = vpack.c.bf16 %v1775_v36, %v1763_v57  ;;  %v3205_v10 = vand.u32 4294901760, %v3204_v16  ;;  %v1780_v0 = vsub.f32 %v9931_v43, %v9124_v18  ;;  %5340 = vmatpush1.bf16.msra.mxu0 %v9935_v62  ;;  %v9936_v36 = vld [vmem:[#allocation125_spill] sm:$0xff]  ;;  %v9937_v16 = vld [vmem:[#allocation126_spill] sm:$0xff] }
 0x13a   :  { %v3198_v9 = vsub.f32 %v9932_v53, %v9126_v6  ;;  %4956 = vmatpush1.bf16.msra.mxu1 %v9934_v19  ;;  %v3210_v52 = vsub.f32 %v9933_v22, %v9129_v56  ;;  %v9133_v57 = vand.u32 4294901760, %v9936_v36  ;;  %v9135_v61 = vand.u32 4294901760, %v9937_v16  ;;  %v9938_v26 = vld [vmem:[#allocation33_spill] sm:$0xff]  ;;  %v9940_v19 = vld [vmem:[#allocation127_spill] sm:$0xff]  ;;  %v9941_v22 = vld [vmem:[#allocation128_spill] sm:$0xff] }
 0x13b   :  { %v1769_v39 = vand.u32 4294901760, %v1768_v24  ;;  %4958 = vmatprep.subr.bf16.mxu1 %v9938_v26  ;;  %v9939_v18 = vld [vmem:[#allocation37_spill] sm:$0xff]  ;;  %v7372_v43 = vpack.c.bf16 %v3205_v10, %v3193_v44  ;;  %v1781_v6 = vand.u32 4294901760, %v1780_v0  ;;  %v9136_v63 = vand.u32 4294901760, %v9940_v19  ;;  %v9943_v10 = vld [vmem:[#allocation130_spill] sm:$0xff] }
 0x13c   :  { %5342 = vmatprep.subr.bf16.mxu0 %v9939_v18  ;;  %v3199_v53 = vand.u32 4294901760, %v3198_v9  ;;  %v3211_v62 = vand.u32 4294901760, %v3210_v52  ;;  %v1786_v24 = vsub.f32 %v9936_v36, %v9133_v57  ;;  %v1798_v56 = vsub.f32 %v9937_v16, %v9135_v61  ;;  %v9942_v0 = vld [vmem:[#allocation129_spill] sm:$0xff]  ;;  %v9944_v18 = vld [vmem:[#allocation151_spill] sm:$0xff] }
 0x13d   :  { %v9137_v3 = vand.u32 4294901760, %v9941_v22  ;;  %v7382_v26 = vpack.c.bf16 %v1781_v6, %v1769_v39  ;;  %v3216_v44 = vsub.f32 %v9940_v19, %v9136_v63  ;;  %v9144_v9 = vand.u32 4294901760, %v9942_v0  ;;  %5344 = vmatpush1.bf16.msra.mxu0 %v9945_v27 }
 0x13e   :  { %v9146_v52 = vand.u32 4294901760, %v9943_v10  ;;  %4960 = vmatpush1.bf16.msra.mxu1 %v9944_v18  ;;  %v7391_v57 = vpack.c.bf16 %v3211_v62, %v3199_v53  ;;  %v1787_v36 = vand.u32 4294901760, %v1786_v24  ;;  %v1799_v61 = vand.u32 4294901760, %v1798_v56  ;;  %5346 = vmatprep.subr.bf16.mxu0 %v6904_v41  ;;  %v9946_v62 = vld [vmem:[#allocation132_spill] sm:$0xff]  ;;  %v9947_v18 = vld [vmem:[#allocation133_spill] sm:$0xff] }
 0x13f   :  { %v3228_v6 = vsub.f32 %v9941_v22, %v9137_v3  ;;  %4962 = vmatprep.subr.bf16.mxu1 %v6900_v4  ;;  %v3217_v39 = vand.u32 4294901760, %v3216_v44  ;;  %v1792_v63 = vsub.f32 %v9942_v0, %v9144_v9  ;;  %v9147_v24 = vand.u32 4294901760, %v9946_v62  ;;  %v9948_v22 = vld [vmem:[#allocation134_spill] sm:$0xff] }
 0x140   :  { %v1804_v53 = vsub.f32 %v9943_v10, %v9146_v52  ;;  %v7405_v56 = vpack.c.bf16 %v1799_v61, %v1787_v36  ;;  %v9152_v3 = vand.u32 4294901760, %v9947_v18  ;;  %v9154_v4 = vand.u32 4294901760, %v9948_v22  ;;  %v9949_v9 = vld [vmem:[#allocation22_spill] sm:$0xff]  ;;  %v9950_v36 = vld [vmem:[#allocation135_spill] sm:$0xff] }
 0x141   :  { %v3229_v27 = vand.u32 4294901760, %v3228_v6  ;;  %v1793_v19 = vand.u32 4294901760, %v1792_v63  ;;  %v3222_v44 = vsub.f32 %v9946_v62, %v9147_v24  ;;  %5348 = vmatpush1.bf16.msra.mxu0 %v6926_v38  ;;  %v9160_v6 = vand.u32 4294901760, %v9950_v36  ;;  %v9953_v38 = vld [vmem:[#allocation136_spill] sm:$0xff]  ;;  %v9954_v62 = vld [vmem:[#allocation138_spill] sm:$0xff] }
 0x142   :  { %v1805_v41 = vand.u32 4294901760, %v1804_v53  ;;  %4964 = vmatpush1.bf16.msra.mxu1 %v6920_v50  ;;  %v3234_v61 = vsub.f32 %v9947_v18, %v9152_v3  ;;  %v1810_v63 = vsub.f32 %v9948_v22, %v9154_v4  ;;  %v9951_v53 = vld [vmem:[#allocation159_spill] sm:$0xff]  ;;  %v9163_v50 = vand.u32 4294901760, %v9953_v38 }
 0x143   :  { %v7415_v52 = vpack.c.bf16 %v3229_v27, %v3217_v39  ;;  %4966 = vmatprep.subr.bf16.mxu1 %v6930_v37  ;;  %5350 = vmatprep.subr.bf16.mxu0 %v9951_v53  ;;  %v3223_v0 = vand.u32 4294901760, %v3222_v44  ;;  %v9952_v27 = vand.u32 4294901760, %v9949_v9  ;;  %v3240_v4 = vsub.f32 %v9950_v36, %v9160_v6  ;;  %v9956_v53 = vld [vmem:[#allocation140_spill] sm:$0xff] }
 0x144   :  { %v7426_v24 = vpack.c.bf16 %v1805_v41, %v1793_v19  ;;  %v3235_v3 = vand.u32 4294901760, %v3234_v61  ;;  %v1811_v18 = vand.u32 4294901760, %v1810_v63  ;;  %v9164_v22 = vand.u32 4294901760, %v9954_v62  ;;  %v9955_v19 = vld [vmem:[#allocation139_spill] sm:$0xff] }
 0x145   :  { %v1822_v39 = vsub.f32 %v9949_v9, %v9952_v27  ;;  %v3252_v41 = vsub.f32 %v9953_v38, %v9163_v50  ;;  %v9172_v44 = vand.u32 4294901760, %v9955_v19  ;;  %v9957_v27 = vld [vmem:[#allocation163_spill] sm:$0xff]  ;;  %v3241_v63 = vand.u32 4294901760, %v3240_v4  ;;  %v9959_v9 = vld [vmem:[#allocation57_spill] sm:$0xff] }
 0x146   :  { %4968 = vmatpush1.bf16.msra.mxu1 %v6952_v8  ;;  %5352 = vmatpush1.bf16.msra.mxu0 %v9957_v27  ;;  %v7443_v61 = vpack.c.bf16 %v3235_v3, %v3223_v0  ;;  %v1816_v6 = vsub.f32 %v9954_v62, %v9164_v22  ;;  %v9960_v3 = vand.u32 4294901760, %v9956_v53  ;;  %v9961_v8 = vld [vmem:[#allocation32_spill] sm:$0xff]  ;;  %v9962_v38 = vld [vmem:[#allocation31_spill] sm:$0xff] }
 0x147   :  { %v1823_v37 = vand.u32 4294901760, %v1822_v39  ;;  %v9958_v39 = vld [vmem:[#allocation142_spill] sm:$0xff]  ;;  %4970 = vmatprep.subr.bf16.mxu1 %v9959_v9  ;;  %5354 = vmatprep.subr.bf16.mxu0 %v6978_v11  ;;  %v3253_v10 = vand.u32 4294901760, %v3252_v41  ;;  %v1828_v27 = vsub.f32 %v9955_v19, %v9172_v44  ;;  %v9178_v9 = vand.u32 4294901760, %v9961_v8  ;;  %v9963_v62 = vld [vmem:[#allocation143_spill] sm:$0xff] }
 0x148   :  { %v9173_v36 = vand.u32 4294901760, %v9958_v39  ;;  %v3246_v4 = vsub.f32 %v9956_v53, %v9960_v3  ;;  %v1817_v0 = vand.u32 4294901760, %v1816_v6  ;;  %v9181_v11 = vand.u32 4294901760, %v9962_v38  ;;  %v9964_v44 = vld [vmem:[#allocation63_spill] sm:$0xff] }
 0x149   :  { %v7451_v50 = vpack.c.bf16 %v1823_v37, %v1811_v18  ;;  %v7464_v18 = vpack.c.bf16 %v3253_v10, %v3241_v63  ;;  %v1829_v37 = vand.u32 4294901760, %v1828_v27  ;;  %v9183_v16 = vand.u32 4294901760, %v9963_v62  ;;  %v9966_v63 = vld [vmem:[#allocation65_spill] sm:$0xff]  ;;  %v9967_v27 = vld [vmem:[#allocation172_spill] sm:$0xff]  ;;  %v9969_v53 = vld [vmem:[#allocation147_spill] sm:$0xff] }
 0x14a   :  { %v3258_v22 = vsub.f32 %v9958_v39, %v9173_v36  ;;  %v3247_v41 = vand.u32 4294901760, %v3246_v4  ;;  %4972 = vmatpush1.bf16.msra.mxu1 %v6982_v34  ;;  %5356 = vmatpush1.bf16.msra.mxu0 %v9964_v44  ;;  %v1834_v6 = vsub.f32 %v9961_v8, %v9178_v9  ;;  %v1846_v36 = vsub.f32 %v9962_v38, %v9181_v11  ;;  %v9965_v39 = vld [vmem:[#allocation144_spill] sm:$0xff]  ;;  %v9968_v44 = vld [vmem:[#allocation146_spill] sm:$0xff] }
 0x14b   :  { %v9184_v10 = vand.u32 4294901760, %v9965_v39  ;;  %4974 = vmatprep.subr.bf16.mxu1 %v9966_v63  ;;  %5358 = vmatprep.subr.bf16.mxu0 %v9967_v27  ;;  %v7478_v4 = vpack.c.bf16 %v1829_v37, %v1817_v0  ;;  %v9186_v34 = vand.u32 4294901760, %v9968_v44  ;;  %v9188_v9 = vand.u32 4294901760, %v9969_v53 }
 0x14c   :  { %v3259_v3 = vand.u32 4294901760, %v3258_v22  ;;  %v3264_v22 = vsub.f32 %v9963_v62, %v9183_v16  ;;  %v1835_v19 = vand.u32 4294901760, %v1834_v6  ;;  %v1847_v11 = vand.u32 4294901760, %v1846_v36  ;;  %v9970_v16 = vld [vmem:[#allocation148_spill] sm:$0xff] }
 0x14d   :  { %v3276_v63 = vsub.f32 %v9965_v39, %v9184_v10  ;;  %v1840_v0 = vsub.f32 %v9968_v44, %v9186_v34  ;;  %v1852_v37 = vsub.f32 %v9969_v53, %v9188_v9  ;;  %v9196_v27 = vand.u32 4294901760, %v9970_v16  ;;  %v9973_v39 = vld [vmem:[#allocation72_spill] sm:$0xff] }
 0x14e   :  { %v7485_v8 = vpack.c.bf16 %v3259_v3, %v3247_v41  ;;  %v3265_v38 = vand.u32 4294901760, %v3264_v22  ;;  %4976 = vmatpush1.bf16.msra.mxu1 %v7020_v31  ;;  %5360 = vmatpush1.bf16.msra.mxu0 %v7030_v55  ;;  %v7499_v36 = vpack.c.bf16 %v1847_v11, %v1835_v19  ;;  %v9971_v3 = vld [vmem:[#allocation34_spill] sm:$0xff]  ;;  %v9974_v31 = vld [vmem:[#allocation36_spill] sm:$0xff] }
 0x14f   :  { %v3277_v41 = vand.u32 4294901760, %v3276_v63  ;;  %v9197_v6 = vand.u32 4294901760, %v9971_v3  ;;  %v9972_v22 = vld [vmem:[#allocation38_spill] sm:$0xff]  ;;  %4978 = vmatprep.subr.bf16.mxu1 %v9973_v39  ;;  %5362 = vmatprep.subr.bf16.mxu0 %v7040_v29  ;;  %v1841_v34 = vand.u32 4294901760, %v1840_v0  ;;  %v1853_v62 = vand.u32 4294901760, %v1852_v37  ;;  %v9975_v63 = vld [vmem:[#allocation149_spill] sm:$0xff] }
 0x150   :  { %v9198_v10 = vand.u32 4294901760, %v9972_v22  ;;  %v3270_v9 = vsub.f32 %v9970_v16, %v9196_v27  ;;  %v9200_v53 = vand.u32 4294901760, %v9974_v31  ;;  %v9207_v29 = vand.u32 4294901760, %v9975_v63  ;;  %v9976_v39 = vld [vmem:[#allocation150_spill] sm:$0xff] }
 0x151   :  { %v7509_v55 = vpack.c.bf16 %v3277_v41, %v3265_v38  ;;  %v3282_v11 = vsub.f32 %v9971_v3, %v9197_v6  ;;  %v7518_v0 = vpack.c.bf16 %v1853_v62, %v1841_v34  ;;  %v9212_v38 = vand.u32 4294901760, %v9976_v39  ;;  %v9977_v3 = vld [vmem:[#allocation152_spill] sm:$0xff] }
 0x152   :  { %v1858_v19 = vsub.f32 %v9972_v22, %v9198_v10  ;;  %v3271_v37 = vand.u32 4294901760, %v3270_v9  ;;  %v1870_v27 = vsub.f32 %v9974_v31, %v9200_v53  ;;  %4980 = vmatpush1.bf16.msra.mxu1 %v7050_v54  ;;  %5364 = vmatpush1.bf16.msra.mxu0 %v7062_v25  ;;  %v3288_v10 = vsub.f32 %v9975_v63, %v9207_v29  ;;  %v9978_v9 = vld [vmem:[#allocation186_spill] sm:$0xff]  ;;  %v9979_v54 = vld [vmem:[#allocation41_spill] sm:$0xff]  ;;  %v9980_v25 = vld [vmem:[#allocation39_spill] sm:$0xff] }
 0x153   :  { %v3283_v41 = vand.u32 4294901760, %v3282_v11  ;;  %v9215_v34 = vand.u32 4294901760, %v9977_v3  ;;  %4982 = vmatprep.subr.bf16.mxu1 %v7072_v48  ;;  %5366 = vmatprep.subr.bf16.mxu0 %v9978_v9  ;;  %v3300_v53 = vsub.f32 %v9976_v39, %v9212_v38  ;;  %v9213_v16 = vand.u32 4294901760, %v9979_v54  ;;  %v9981_v63 = vld [vmem:[#allocation44_spill] sm:$0xff] }
 0x154   :  { %v1859_v6 = vand.u32 4294901760, %v1858_v19  ;;  %v1871_v62 = vand.u32 4294901760, %v1870_v27  ;;  %v9214_v11 = vand.u32 4294901760, %v9980_v25  ;;  %v3289_v31 = vand.u32 4294901760, %v3288_v10 }
 0x155   :  { %v7537_v19 = vpack.c.bf16 %v3283_v41, %v3271_v37  ;;  %v1864_v29 = vsub.f32 %v9977_v3, %v9215_v34  ;;  %v9221_v48 = vand.u32 4294901760, %v9981_v63  ;;  %v3301_v27 = vand.u32 4294901760, %v3300_v53  ;;  %v9983_v53 = vld [vmem:[#allocation153_spill] sm:$0xff] }
 0x156   :  { %v7543_v22 = vpack.c.bf16 %v1871_v62, %v1859_v6  ;;  %v1876_v38 = vsub.f32 %v9979_v54, %v9213_v16  ;;  %v3294_v9 = vsub.f32 %v9980_v25, %v9214_v11  ;;  %4984 = vmatpush1.bf16.msra.mxu1 %v7088_v7  ;;  %5368 = vmatpush1.bf16.msra.mxu0 %v7098_v20  ;;  %v9982_v6 = vld [vmem:[#allocation42_spill] sm:$0xff]  ;;  %v9230_v62 = vand.u32 4294901760, %v9983_v53  ;;  %v9984_v7 = vld [vmem:[#allocation155_spill] sm:$0xff] }
 0x157   :  { %v1865_v10 = vand.u32 4294901760, %v1864_v29  ;;  %v3306_v37 = vsub.f32 %v9981_v63, %v9221_v48  ;;  %v9228_v41 = vand.u32 4294901760, %v9982_v6  ;;  %4986 = vmatprep.subr.bf16.mxu1 %v7108_v15  ;;  %5370 = vmatprep.subr.bf16.mxu0 %v7112_v17  ;;  %v7560_v16 = vpack.c.bf16 %v3301_v27, %v3289_v31  ;;  %v9985_v63 = vld [vmem:[#allocation47_spill] sm:$0xff]  ;;  %v9987_v27 = vld [vmem:[#allocation50_spill] sm:$0xff]  ;;  %v9988_v17 = vld [vmem:[#allocation197_spill] sm:$0xff] }
 0x158   :  { %v1877_v11 = vand.u32 4294901760, %v1876_v38  ;;  %v3295_v34 = vand.u32 4294901760, %v3294_v9  ;;  %v9231_v25 = vand.u32 4294901760, %v9984_v7  ;;  %v1894_v48 = vsub.f32 %v9983_v53, %v9230_v62  ;;  %v9986_v38 = vld [vmem:[#allocation45_spill] sm:$0xff]  ;;  %v10040_v53 = vld [vmem:[#allocation87_spill] sm:$0xff] }
 0x159   :  { %v3307_v20 = vand.u32 4294901760, %v3306_v37  ;;  %v1882_v29 = vsub.f32 %v9982_v6, %v9228_v41  ;;  %v9234_v39 = vand.u32 4294901760, %v9985_v63  ;;  %v9241_v9 = vand.u32 4294901760, %v9986_v38 }
 0x15a   :  { %v7570_v15 = vpack.c.bf16 %v1877_v11, %v1865_v10  ;;  %v3312_v31 = vsub.f32 %v9984_v7, %v9231_v25  ;;  %v9243_v37 = vand.u32 4294901760, %v9987_v27  ;;  %4988 = vmatpush1.bf16.msra.mxu1 %v9988_v17  ;;  %5372 = vmatpush1.bf16.msra.mxu0 %v7134_v28  ;;  %v1895_v62 = vand.u32 4294901760, %v1894_v48  ;;  %v9990_v17 = vld [vmem:[#allocation156_spill] sm:$0xff] }
 0x15b   :  { %v7579_v41 = vpack.c.bf16 %v3307_v20, %v3295_v34  ;;  %v1883_v6 = vand.u32 4294901760, %v1882_v29  ;;  %v3324_v11 = vsub.f32 %v9985_v63, %v9234_v39  ;;  %4990 = vmatprep.subr.bf16.mxu1 %v7140_v45  ;;  %5374 = vmatprep.subr.bf16.mxu0 %v7144_v32  ;;  %v1888_v25 = vsub.f32 %v9986_v38, %v9241_v9  ;;  %v9989_v34 = vld [vmem:[#allocation49_spill] sm:$0xff]  ;;  %v9991_v63 = vld [vmem:[#allocation158_spill] sm:$0xff]  ;;  %v9992_v9 = vld [vmem:[#allocation51_spill] sm:$0xff] }
 0x15c   :  { %v3313_v10 = vand.u32 4294901760, %v3312_v31  ;;  %v1900_v20 = vsub.f32 %v9987_v27, %v9243_v37  ;;  %v9244_v29 = vand.u32 4294901760, %v9989_v34  ;;  %v9247_v39 = vand.u32 4294901760, %v9990_v17 }
 0x15d   :  { %v7593_v48 = vpack.c.bf16 %v1895_v62, %v1883_v6  ;;  %v3325_v28 = vand.u32 4294901760, %v3324_v11  ;;  %v9250_v45 = vand.u32 4294901760, %v9991_v63  ;;  %v1889_v7 = vand.u32 4294901760, %v1888_v25  ;;  %v9993_v62 = vld [vmem:[#allocation160_spill] sm:$0xff] }
 0x15e   :  { %v1901_v32 = vand.u32 4294901760, %v1900_v20  ;;  %v3318_v31 = vsub.f32 %v9989_v34, %v9244_v29  ;;  %v9259_v38 = vand.u32 4294901760, %v9992_v9  ;;  %4992 = vmatpush1.bf16.msra.mxu1 %v7160_v40  ;;  %5376 = vmatpush1.bf16.msra.mxu0 %v7166_v14  ;;  %v3330_v6 = vsub.f32 %v9990_v17, %v9247_v39  ;;  %v9995_v17 = vld [vmem:[#allocation54_spill] sm:$0xff] }
 0x15f   :  { %v7603_v37 = vpack.c.bf16 %v3325_v28, %v3313_v10  ;;  %v1906_v25 = vsub.f32 %v9991_v63, %v9250_v45  ;;  %v9258_v11 = vand.u32 4294901760, %v9993_v62  ;;  %4994 = vmatprep.subr.bf16.mxu1 %v7170_v42  ;;  %5378 = vmatprep.subr.bf16.mxu0 %v7176_v12  ;;  %v9994_v10 = vld [vmem:[#allocation53_spill] sm:$0xff]  ;;  %v9263_v34 = vand.u32 4294901760, %v9995_v17  ;;  %v9997_v12 = vld [vmem:[#allocation164_spill] sm:$0xff] }
 0x160   :  { %v7614_v20 = vpack.c.bf16 %v1901_v32, %v1889_v7  ;;  %v3319_v29 = vand.u32 4294901760, %v3318_v31  ;;  %v1918_v28 = vsub.f32 %v9992_v9, %v9259_v38  ;;  %v9260_v14 = vand.u32 4294901760, %v9994_v10  ;;  %v9996_v32 = vld [vmem:[#allocation162_spill] sm:$0xff] }
 0x161   :  { %v3331_v39 = vand.u32 4294901760, %v3330_v6  ;;  %v1907_v40 = vand.u32 4294901760, %v1906_v25  ;;  %v3336_v45 = vsub.f32 %v9993_v62, %v9258_v11  ;;  %v9267_v31 = vand.u32 4294901760, %v9996_v32 }
 0x162   :  { %v1919_v42 = vand.u32 4294901760, %v1918_v28  ;;  %v3348_v7 = vsub.f32 %v9994_v10, %v9260_v14  ;;  %4996 = vmatpush1.bf16.msra.mxu1 %v7196_v33  ;;  %5380 = vmatpush1.bf16.msra.mxu0 %v7202_v13  ;;  %v1912_v11 = vsub.f32 %v9995_v17, %v9263_v34  ;;  %v9998_v28 = vld [vmem:[#allocation58_spill] sm:$0xff]  ;;  %v10000_v33 = vld [vmem:[#allocation56_spill] sm:$0xff]  ;;  %v10001_v10 = vld [vmem:[#allocation61_spill] sm:$0xff]  ;;  %v9323_v54 = vand.u32 4294901760, %v10040_v53 }
 0x163   :  { %v7631_v6 = vpack.c.bf16 %v3331_v39, %v3319_v29  ;;  %v3337_v25 = vand.u32 4294901760, %v3336_v45  ;;  %v9270_v38 = vand.u32 4294901760, %v9998_v28  ;;  %4998 = vmatprep.subr.bf16.mxu1 %v7253_v5  ;;  %5382 = vmatprep.subr.bf16.mxu0 %v7261_v58  ;;  %v1924_v13 = vsub.f32 %v9996_v32, %v9267_v31  ;;  %v10004_v32 = vld [vmem:[#allocation60_spill] sm:$0xff] }
 0x164   :  { %v7639_v14 = vpack.c.bf16 %v1919_v42, %v1907_v40  ;;  %v3349_v63 = vand.u32 4294901760, %v3348_v7  ;;  %v9999_v39 = vand.u32 4294901760, %v9997_v12  ;;  %v1913_v29 = vand.u32 4294901760, %v1912_v11  ;;  %v10002_v42 = vld [vmem:[#allocation112_spill] sm:$0xff] }
 0x165   :  { %v3354_v34 = vsub.f32 %v9998_v28, %v9270_v38  ;;  %v9271_v5 = vand.u32 4294901760, %v10000_v33  ;;  %v9272_v58 = vand.u32 4294901760, %v10001_v10  ;;  %1705 = vmatmul.mubr.f32.vlgmr.msra.gmra.mrb[2].mxu1 %v10002_v42  ;;  %v10003_v40 = vand.u32 4294901760, %v7277_v23  ;;  %v10005_v42 = vld [vmem:[#allocation165_spill] sm:$0xff] }
 0x166   :  { %v3342_v45 = vsub.f32 %v9997_v12, %v9999_v39  ;;  %v7655_v7 = vpack.c.bf16 %v3349_v63, %v3337_v25  ;;  %v1925_v31 = vand.u32 4294901760, %v1924_v13  ;;  %v9274_v39 = vand.u32 4294901760, %v10004_v32  ;;  %5000 = vmatpush1.bf16.msra.mxu1 %v7272_v2  ;;  %v10006_v2 = vld [vmem:[#allocation167_spill] sm:$0xff]  ;;  %v10007_v25 = vld [vmem:[#allocation168_spill] sm:$0xff]  ;;  %v10008_v28 = vld [vmem:[#allocation105_spill] sm:$0xff] }
 0x167   :  { %3071 = vmatmul.mubr.f32.vlgmr.msra.gmra.mrb[2].mxu0 %v10003_v40  ;;  %v3355_v11 = vand.u32 4294901760, %v3354_v34  ;;  %v1930_v38 = vsub.f32 %v10000_v33, %v9271_v5  ;;  %v1942_v23 = vsub.f32 %v10001_v10, %v9272_v58  ;;  %v9275_v63 = vand.u32 4294901760, %v10005_v42  ;;  %5002 = vmatprep.subr.bf16.mxu1 %v7311_v21  ;;  %v10033_v33 = vld [vmem:[#allocation187_spill] sm:$0xff] }
 0x168   :  { %v3343_v62 = vand.u32 4294901760, %v3342_v45  ;;  %5384 = vmatpush1.bf16.msra.mxu0 %v7297_v47  ;;  %v7669_v13 = vpack.c.bf16 %v1925_v31, %v1913_v29  ;;  %v3360_v47 = vsub.f32 %v10004_v32, %v9274_v39  ;;  %v9276_v34 = vand.u32 4294901760, %v10006_v2  ;;  %2096 = vmatprep.mubr.f32.mxu1 %v10008_v28  ;;  %v10009_v39 = vld [vmem:[#allocation169_spill] sm:$0xff] }
 0x169   :  { %5386 = vmatprep.subr.bf16.mxu0 %v7321_v35  ;;  %v9278_v45 = vand.u32 4294901760, %v10007_v25  ;;  %v1931_v5 = vand.u32 4294901760, %v1930_v38  ;;  %v1943_v58 = vand.u32 4294901760, %v1942_v23  ;;  %v3372_v21 = vsub.f32 %v10005_v42, %v9275_v63  ;;  %v10010_v23 = vld [vmem:[#allocation170_spill] sm:$0xff] }
 0x16a   :  { %v7676_v40 = vpack.c.bf16 %v3355_v11, %v3343_v62  ;;  %v3361_v35 = vand.u32 4294901760, %v3360_v47  ;;  %v1936_v31 = vsub.f32 %v10006_v2, %v9276_v34  ;;  %v9280_v62 = vand.u32 4294901760, %v10009_v39  ;;  %5004 = vmatpush1.bf16.msra.mxu1 %v7330_v30  ;;  %v10011_v47 = vld [vmem:[#allocation66_spill] sm:$0xff]  ;;  %v10012_v30 = vld [vmem:[#allocation171_spill] sm:$0xff] }
 0x16b   :  { %v1948_v29 = vsub.f32 %v10007_v25, %v9278_v45  ;;  %v7691_v38 = vpack.c.bf16 %v1943_v58, %v1931_v5  ;;  %v3373_v11 = vand.u32 4294901760, %v3372_v21  ;;  %v9281_v63 = vand.u32 4294901760, %v10010_v23  ;;  %5006 = vmatprep.subr.bf16.mxu1 %v7355_v59  ;;  %v10013_v58 = vld [vmem:[#allocation173_spill] sm:$0xff] }
 0x16c   :  { %5388 = vmatpush1.bf16.msra.mxu0 %v7349_v46  ;;  %v9282_v28 = vand.u32 4294901760, %v10011_v47  ;;  %v1937_v34 = vand.u32 4294901760, %v1936_v31  ;;  %v3366_v45 = vsub.f32 %v10009_v39, %v9280_v62  ;;  %v9284_v32 = vand.u32 4294901760, %v10012_v30  ;;  %v10014_v62 = vld [vmem:[#allocation174_spill] sm:$0xff]  ;;  %v10027_v25 = vld [vmem:[#allocation185_spill] sm:$0xff] }
 0x16d   :  { %5390 = vmatprep.subr.bf16.mxu0 %v7372_v43  ;;  %v1949_v42 = vand.u32 4294901760, %v1948_v29  ;;  %v7701_v46 = vpack.c.bf16 %v3373_v11, %v3361_v35  ;;  %v3378_v5 = vsub.f32 %v10010_v23, %v9281_v63  ;;  %v9286_v43 = vand.u32 4294901760, %v10013_v58  ;;  %v10015_v23 = vld [vmem:[#allocation175_spill] sm:$0xff] }
 0x16e   :  { %v1954_v59 = vsub.f32 %v10011_v47, %v9282_v28  ;;  %v3367_v31 = vand.u32 4294901760, %v3366_v45  ;;  %v1966_v29 = vsub.f32 %v10012_v30, %v9284_v32  ;;  %v9289_v35 = vand.u32 4294901760, %v10014_v62  ;;  %5008 = vmatpush1.bf16.msra.mxu1 %v7382_v26  ;;  %v10016_v26 = vld [vmem:[#allocation69_spill] sm:$0xff]  ;;  %v10022_v30 = vld [vmem:[#allocation179_spill] sm:$0xff] }
 0x16f   :  { %v7710_v21 = vpack.c.bf16 %v1949_v42, %v1937_v34  ;;  %v3379_v11 = vand.u32 4294901760, %v3378_v5  ;;  %v3384_v28 = vsub.f32 %v10013_v58, %v9286_v43  ;;  %v9292_v42 = vand.u32 4294901760, %v10015_v23  ;;  %5010 = vmatprep.subr.bf16.mxu1 %v7405_v56  ;;  %v10018_v58 = vld [vmem:[#allocation71_spill] sm:$0xff] }
 0x170   :  { %5392 = vmatpush1.bf16.msra.mxu0 %v7391_v57  ;;  %v1955_v63 = vand.u32 4294901760, %v1954_v59  ;;  %v1967_v34 = vand.u32 4294901760, %v1966_v29  ;;  %v3396_v45 = vsub.f32 %v10014_v62, %v9289_v35  ;;  %v9290_v32 = vand.u32 4294901760, %v10016_v26  ;;  %v10017_v57 = vld [vmem:[#allocation68_spill] sm:$0xff] }
 0x171   :  { %5394 = vmatprep.subr.bf16.mxu0 %v7415_v52  ;;  %v9291_v5 = vand.u32 4294901760, %v10017_v57  ;;  %v7729_v59 = vpack.c.bf16 %v3379_v11, %v3367_v31  ;;  %v3385_v39 = vand.u32 4294901760, %v3384_v28  ;;  %v1960_v43 = vsub.f32 %v10015_v23, %v9292_v42 }
 0x172   :  { %v9294_v56 = vand.u32 4294901760, %v10018_v58  ;;  %v7735_v12 = vpack.c.bf16 %v1967_v34, %v1955_v63  ;;  %v3397_v52 = vand.u32 4294901760, %v3396_v45  ;;  %v1972_v29 = vsub.f32 %v10016_v26, %v9290_v32  ;;  %5012 = vmatpush1.bf16.msra.mxu1 %v7426_v24  ;;  %v10019_v63 = vld [vmem:[#allocation176_spill] sm:$0xff]  ;;  %v10020_v34 = vld [vmem:[#allocation177_spill] sm:$0xff]  ;;  %v10021_v24 = vld [vmem:[#allocation74_spill] sm:$0xff] }
 0x173   :  { %v3390_v35 = vsub.f32 %v10017_v57, %v9291_v5  ;;  %v1961_v28 = vand.u32 4294901760, %v1960_v43  ;;  %v9297_v11 = vand.u32 4294901760, %v10019_v63  ;;  %v9298_v45 = vand.u32 4294901760, %v10020_v34  ;;  %5014 = vmatprep.subr.bf16.mxu1 %v7451_v50 }
 0x174   :  { %5396 = vmatpush1.bf16.msra.mxu0 %v7443_v61  ;;  %v3402_v31 = vsub.f32 %v10018_v58, %v9294_v56  ;;  %v7752_v32 = vpack.c.bf16 %v3397_v52, %v3385_v39  ;;  %v1973_v5 = vand.u32 4294901760, %v1972_v29  ;;  %v9299_v62 = vand.u32 4294901760, %v10021_v24  ;;  %v10023_v39 = vld [vmem:[#allocation78_spill] sm:$0xff]  ;;  %v10024_v52 = vld [vmem:[#allocation181_spill] sm:$0xff] }
 0x175   :  { %5398 = vmatprep.subr.bf16.mxu0 %v7464_v18  ;;  %v3391_v42 = vand.u32 4294901760, %v3390_v35  ;;  %v1978_v43 = vsub.f32 %v10019_v63, %v9297_v11  ;;  %v1990_v56 = vsub.f32 %v10020_v34, %v9298_v45  ;;  %v9300_v47 = vand.u32 4294901760, %v10022_v30 }
 0x176   :  { %v3403_v61 = vand.u32 4294901760, %v3402_v31  ;;  %v7762_v50 = vpack.c.bf16 %v1973_v5, %v1961_v28  ;;  %v3408_v18 = vsub.f32 %v10021_v24, %v9299_v62  ;;  %v9303_v35 = vand.u32 4294901760, %v10023_v39  ;;  %5016 = vmatpush1.bf16.msra.mxu1 %v7478_v4  ;;  %v10025_v4 = vld [vmem:[#allocation182_spill] sm:$0xff] }
 0x177   :  { %v9305_v29 = vand.u32 4294901760, %v10024_v52  ;;  %v1979_v11 = vand.u32 4294901760, %v1978_v43  ;;  %v1991_v45 = vand.u32 4294901760, %v1990_v56  ;;  %v3420_v5 = vsub.f32 %v10022_v30, %v9300_v47  ;;  %5018 = vmatprep.subr.bf16.mxu1 %v7499_v36  ;;  %v10026_v43 = vld [vmem:[#allocation184_spill] sm:$0xff] }
 0x178   :  { %5400 = vmatpush1.bf16.msra.mxu0 %v7485_v8  ;;  %v7771_v31 = vpack.c.bf16 %v3403_v61, %v3391_v42  ;;  %v3409_v28 = vand.u32 4294901760, %v3408_v18  ;;  %v1984_v62 = vsub.f32 %v10023_v39, %v9303_v35  ;;  %v9307_v42 = vand.u32 4294901760, %v10025_v4  ;;  %v10028_v35 = vld [vmem:[#allocation81_spill] sm:$0xff] }
 0x179   :  { %5402 = vmatprep.subr.bf16.mxu0 %v7509_v55  ;;  %v1996_v8 = vsub.f32 %v10024_v52, %v9305_v29  ;;  %v7785_v56 = vpack.c.bf16 %v1991_v45, %v1979_v11  ;;  %v3421_v61 = vand.u32 4294901760, %v3420_v5  ;;  %v9306_v47 = vand.u32 4294901760, %v10026_v43  ;;  %v7803_v45 = vld [vmem:[#allocation5 + $0x8] sm:$0xff] }
 0x17a   :  { %v9308_v36 = vand.u32 4294901760, %v10027_v25  ;;  %v1985_v2 = vand.u32 4294901760, %v1984_v62  ;;  %v3414_v18 = vsub.f32 %v10025_v4, %v9307_v42  ;;  %v9312_v10 = vand.u32 4294901760, %v10028_v35  ;;  %5020 = vmatpush1.bf16.msra.mxu1 %v7518_v0  ;;  %10029 = vst [vmem:[#allocation112_spill] sm:$0xff] %v7803_v45 }
 0x17b   :  { %v1997_v55 = vand.u32 4294901760, %v1996_v8  ;;  %v7795_v29 = vpack.c.bf16 %v3421_v61, %v3409_v28  ;;  %v3426_v11 = vsub.f32 %v10026_v43, %v9306_v47  ;;  %v7806_v5 = vand.u32 4294901760, %v7803_v45  ;;  %5022 = vmatprep.subr.bf16.mxu1 %v7543_v22  ;;  %v10031_v8 = vld [vmem:[#allocation83_spill] sm:$0xff] }
 0x17c   :  { %5404 = vmatpush1.bf16.msra.mxu0 %v7537_v19  ;;  %v2002_v62 = vsub.f32 %v10027_v25, %v9308_v36  ;;  %v3415_v19 = vand.u32 4294901760, %v3414_v18  ;;  %v2014_v28 = vsub.f32 %v10028_v35, %v9312_v10  ;;  %v9313_v61 = vand.u32 4294901760, %v10031_v8  ;;  %v10035_v18 = vld [vmem:[#allocation190_spill] sm:$0xff]  ;;  %v7834_v10 = vld [vmem:[#allocation5] sm:$0xff] }
 0x17d   :  { %10030 = vst [vmem:[#allocation175_spill] sm:$0xff] %v7806_v5  ;;  %5406 = vmatprep.subr.bf16.mxu0 %v7560_v16  ;;  %v7810_v0 = vpack.c.bf16 %v1997_v55, %v1985_v2  ;;  %v3427_v47 = vand.u32 4294901760, %v3426_v11  ;;  %v7818_v36 = vsub.f32 %v7803_v45, %v7806_v5  ;;  %v9314_v17 = vand.u32 4294901760, %v10033_v33  ;;  %v10034_v2 = vld [vmem:[#allocation188_spill] sm:$0xff]  ;;  %10036 = vst [vmem:[#allocation68_spill] sm:$0xff] %v7834_v10 }
 0x17e   :  { %v2003_v42 = vand.u32 4294901760, %v2002_v62  ;;  %v2015_v22 = vand.u32 4294901760, %v2014_v28  ;;  %v3432_v16 = vsub.f32 %v10031_v8, %v9313_v61  ;;  %v9318_v55 = vand.u32 4294901760, %v10034_v2  ;;  %5024 = vmatpush1.bf16.msra.mxu1 %v7570_v15 }
 0x17f   :  { %10032 = vst [vmem:[#allocation69_spill] sm:$0xff] %v7818_v36  ;;  %v9320_v9 = vand.u32 4294901760, %v10035_v18  ;;  %v7828_v11 = vpack.c.bf16 %v3427_v47, %v3415_v19  ;;  %v9322_v62 = vand.u32 4294901760, %v7818_v36  ;;  %v3444_v28 = vsub.f32 %v10033_v33, %v9314_v17  ;;  %5026 = vmatprep.subr.bf16.mxu1 %v7593_v48 }
 0x180   :  { %5408 = vmatpush1.bf16.msra.mxu0 %v7579_v41  ;;  %v7837_v61 = vand.u32 4294901760, %v7834_v10  ;;  %v7841_v15 = vpack.c.bf16 %v2015_v22, %v2003_v42  ;;  %v3433_v41 = vand.u32 4294901760, %v3432_v16  ;;  %v2008_v47 = vsub.f32 %v10034_v2, %v9318_v55  ;;  %v10041_v55 = vld [vmem:[#allocation86_spill] sm:$0xff] }
 0x181   :  { %5410 = vmatprep.subr.bf16.mxu0 %v7603_v37  ;;  %v2020_v19 = vsub.f32 %v10035_v18, %v9320_v9  ;;  %v3079_v17 = vsub.f32 %v7818_v36, %v9322_v62  ;;  %v3445_v27 = vand.u32 4294901760, %v3444_v28  ;;  %v10039_v37 = vld [vmem:[#allocation191_spill] sm:$0xff]  ;;  %v9325_v3 = vand.u32 4294901760, %v10041_v55 }
 0x182   :  { %10037 = vst [vmem:[#allocation71_spill] sm:$0xff] %v7837_v61  ;;  %v7854_v48 = vsub.f32 %v7834_v10, %v7837_v61  ;;  %v9324_v42 = vand.u32 4294901760, %v10039_v37  ;;  %v2009_v22 = vand.u32 4294901760, %v2008_v47  ;;  %5028 = vmatpush1.bf16.msra.mxu1 %v7614_v20  ;;  %v3450_v20 = vsub.f32 %v10040_v53, %v9323_v54 }
 0x183   :  { %v2021_v16 = vand.u32 4294901760, %v2020_v19  ;;  %v3080_v9 = vand.u32 4294901760, %v3079_v17  ;;  %v7861_v44 = vpack.c.bf16 %v3445_v27, %v3433_v41  ;;  %5030 = vmatprep.subr.bf16.mxu1 %v7639_v14  ;;  %v2026_v17 = vsub.f32 %v10041_v55, %v9325_v3  ;;  %v10042_v27 = vld [vmem:[#allocation192_spill] sm:$0xff]  ;;  %v10044_v19 = vld [vmem:[#allocation194_spill] sm:$0xff]  ;;  %v10045_v3 = vld [vmem:[#allocation195_spill] sm:$0xff] }
 0x184   :  { %10038 = vst [vmem:[#allocation176_spill] sm:$0xff] %v7854_v48  ;;  %5412 = vmatpush1.bf16.msra.mxu0 %v7631_v6  ;;  %v9329_v28 = vand.u32 4294901760, %v7854_v48  ;;  %v3438_v62 = vsub.f32 %v10039_v37, %v9324_v42  ;;  %v9328_v6 = vand.u32 4294901760, %v10042_v27  ;;  %v9333_v36 = vand.u32 4294901760, %v10045_v3 }
 0x185   :  { %5414 = vmatprep.subr.bf16.mxu0 %v7655_v7  ;;  %v7869_v47 = vpack.c.bf16 %v2021_v16, %v2009_v22  ;;  %3081 = vmatprep.mubr.f32.mxu0 %v3080_v9  ;;  %v7883_v7 = vmul.f32 %v7190_v51, %v7190_v51  ;;  %v9332_v22 = vand.u32 4294901760, %v10044_v19  ;;  %v3451_v16 = vand.u32 4294901760, %v3450_v20  ;;  %v10047_v20 = vld [vmem:[#allocation196_spill] sm:$0xff] }
 0x186   :  { %v3085_v41 = vsub.f32 %v7854_v48, %v9329_v28  ;;  %v3439_v14 = vand.u32 4294901760, %v3438_v62  ;;  %v2027_v54 = vand.u32 4294901760, %v2026_v17  ;;  %v2038_v42 = vsub.f32 %v10042_v27, %v9328_v6  ;;  %5032 = vmatpush1.bf16.msra.mxu1 %v7669_v13 }
 0x187   :  { %10043 = vst [vmem:[#allocation177_spill] sm:$0xff] %v7883_v7  ;;  %v7893_v62 = vand.u32 4294901760, %v7883_v7  ;;  %v3456_v51 = vsub.f32 %v10044_v19, %v9332_v22  ;;  %v9334_v17 = vand.u32 4294901760, %v10047_v20  ;;  %5034 = vmatprep.subr.bf16.mxu1 %v7691_v38  ;;  %v3468_v13 = vsub.f32 %v10045_v3, %v9333_v36 }
 0x188   :  { %5416 = vmatpush1.bf16.msra.mxu0 %v7676_v40  ;;  %v3086_v9 = vand.u32 4294901760, %v3085_v41  ;;  %v7901_v6 = vpack.c.bf16 %v3451_v16, %v3439_v14  ;;  %v2039_v28 = vand.u32 4294901760, %v2038_v42  ;;  %v10048_v40 = vld [vmem:[#allocation198_spill] sm:$0xff] }
 0x189   :  { %10046 = vst [vmem:[#allocation74_spill] sm:$0xff] %v7893_v62  ;;  %5418 = vmatprep.subr.bf16.mxu0 %v7701_v46  ;;  %v9336_v41 = vand.u32 4294901760, %v10048_v40  ;;  %v7909_v48 = vsub.f32 %v7883_v7, %v7893_v62  ;;  %v3457_v22 = vand.u32 4294901760, %v3456_v51  ;;  %v2032_v38 = vsub.f32 %v10047_v20, %v9334_v17 }
 0x18a   :  { %3087 = vmatmul.mubr.f32.gmra.mrb[4].mxu0 %v3086_v9  ;;  %v7916_v46 = vmul.f32 %v7233_v49, %v7233_v49  ;;  %v7918_v42 = vpack.c.bf16 %v2039_v28, %v2027_v54  ;;  %v3469_v14 = vand.u32 4294901760, %v3468_v13  ;;  %v10051_v9 = vld [vmem:[#allocation94_spill] sm:$0xff]  ;;  %5036 = vmatpush1.bf16.msra.mxu1 %v7710_v21  ;;  %v10053_v49 = vld [vmem:[#allocation93_spill] sm:$0xff] }
 0x18b   :  { %10049 = vst [vmem:[#allocation179_spill] sm:$0xff] %v7909_v48  ;;  %v2044_v16 = vsub.f32 %v10048_v40, %v9336_v41  ;;  %v9338_v36 = vand.u32 4294901760, %v10051_v9  ;;  %v9339_v51 = vand.u32 4294901760, %v7909_v48  ;;  %v2033_v17 = vand.u32 4294901760, %v2032_v38  ;;  %5038 = vmatprep.subr.bf16.mxu1 %v7735_v12  ;;  %v10054_v41 = vld [vmem:[#allocation96_spill] sm:$0xff] }
 0x18c   :  { %10050 = vst [vmem:[#allocation78_spill] sm:$0xff] %v7916_v46  ;;  %5420 = vmatpush1.bf16.msra.mxu0 %v7729_v59  ;;  %v7928_v7 = vand.u32 4294901760, %v7916_v46  ;;  %v9341_v54 = vand.u32 4294901760, %v10053_v49  ;;  %v5433_v28 = vpack.c.bf16 %v3469_v14, %v3457_v22  ;;  %v9344_v59 = vand.u32 4294901760, %v10054_v41 }
 0x18d   :  { %5422 = vmatprep.subr.bf16.mxu0 %v7752_v32  ;;  %v2045_v13 = vand.u32 4294901760, %v2044_v16  ;;  %v3462_v21 = vsub.f32 %v10051_v9, %v9338_v36  ;;  %v3095_v38 = vsub.f32 %v7909_v48, %v9339_v51  ;;  %v10056_v32 = vld [vmem:[#allocation200_spill] sm:$0xff]  ;;  %v7955_v51 = vmul.f32 %v7803_v45, %v7803_v45 }
 0x18e   :  { %10052 = vst [vmem:[#allocation181_spill] sm:$0xff] %v7928_v7  ;;  %v7942_v40 = vsub.f32 %v7916_v46, %v7928_v7  ;;  %v3474_v12 = vsub.f32 %v10053_v49, %v9341_v54  ;;  %v9348_v22 = vand.u32 4294901760, %v10056_v32  ;;  %v2050_v36 = vsub.f32 %v10054_v41, %v9344_v59  ;;  %5040 = vmatpush1.bf16.msra.mxu1 %v7762_v50  ;;  %v10059_v59 = vld [vmem:[#allocation202_spill] sm:$0xff]  ;;  %v10060_v7 = vld [vmem:[#allocation203_spill] sm:$0xff] }
 0x18f   :  { %v7948_v14 = vpack.c.bf16 %v2045_v13, %v2033_v17  ;;  %v3463_v16 = vand.u32 4294901760, %v3462_v21  ;;  %10057 = vst [vmem:[#allocation184_spill] sm:$0xff] %v7955_v51  ;;  %v3096_v46 = vand.u32 4294901760, %v3095_v38  ;;  %5042 = vmatprep.subr.bf16.mxu1 %v7785_v56  ;;  %v7966_v21 = vand.u32 4294901760, %v7955_v51 }
 0x190   :  { %10055 = vst [vmem:[#allocation182_spill] sm:$0xff] %v7942_v40  ;;  %5424 = vmatpush1.bf16.msra.mxu0 %v7771_v31  ;;  %v9350_v54 = vand.u32 4294901760, %v7942_v40  ;;  %v3475_v48 = vand.u32 4294901760, %v3474_v12  ;;  %v2062_v17 = vsub.f32 %v10056_v32, %v9348_v22  ;;  %v2051_v13 = vand.u32 4294901760, %v2050_v36  ;;  %v10061_v22 = vld [vmem:[#allocation204_spill] sm:$0xff] }
 0x191   :  { %5426 = vmatprep.subr.bf16.mxu0 %v7795_v29  ;;  %10058 = vst [vmem:[#allocation185_spill] sm:$0xff] %v7966_v21  ;;  %v9352_v50 = vand.u32 4294901760, %v10059_v59  ;;  %v9351_v31 = vand.u32 4294901760, %v10060_v7  ;;  %3097 = vmatprep.mubr.f32.mxu0 %v3096_v46  ;;  %v9353_v32 = vand.u32 4294901760, %v10061_v22  ;;  %v7976_v29 = vsub.f32 %v7955_v51, %v7966_v21 }
 0x192   :  { %v3101_v38 = vsub.f32 %v7942_v40, %v9350_v54  ;;  %v5435_v12 = vpack.c.bf16 %v3475_v48, %v3463_v16  ;;  %v2063_v41 = vand.u32 4294901760, %v2062_v17  ;;  %v9357_v46 = vand.u32 4294901760, %v7162_v1  ;;  %5044 = vmatpush1.bf16.msra.mxu1 %v7810_v0 }
 0x193   :  { %10062 = vst [vmem:[#allocation81_spill] sm:$0xff] %v7976_v29  ;;  %v3480_v56 = vsub.f32 %v10059_v59, %v9352_v50  ;;  %v3492_v36 = vsub.f32 %v10060_v7, %v9351_v31  ;;  %v2056_v17 = vsub.f32 %v10061_v22, %v9353_v32  ;;  %v7992_v54 = vmul.f32 %v7834_v10, %v7834_v10  ;;  %v10065_v32 = vld [vmem:[#allocation206_spill] sm:$0xff] }
 0x194   :  { %5428 = vmatpush1.bf16.msra.mxu0 %v7828_v11  ;;  %v3102_v48 = vand.u32 4294901760, %v3101_v38  ;;  %v5053_v16 = vpack.c.bf16 %v2063_v41, %v2051_v13  ;;  %5046 = vmatprep.subr.bf16.mxu1 %v7841_v15  ;;  %v9358_v31 = vand.u32 4294901760, %v7976_v29  ;;  %v2068_v11 = vsub.f32 %v7162_v1, %v9357_v46 }
 0x195   :  { %10063 = vst [vmem:[#allocation83_spill] sm:$0xff] %v7992_v54  ;;  %5430 = vmatprep.subr.bf16.mxu0 %v7861_v44  ;;  %v3481_v50 = vand.u32 4294901760, %v3480_v56  ;;  %v3493_v0 = vand.u32 4294901760, %v3492_v36  ;;  %v2057_v41 = vand.u32 4294901760, %v2056_v17  ;;  %v8001_v13 = vand.u32 4294901760, %v7992_v54  ;;  %v10066_v36 = vld [vmem:[#allocation208_spill] sm:$0xff] }
 0x196   :  { %3103 = vmatmul.mubr.f32.gmra.mrb[6].mxu0 %v3102_v48  ;;  %v9359_v38 = vand.u32 4294901760, %v7164_v60  ;;  %v9363_v51 = vand.u32 4294901760, %v10065_v32  ;;  %v3111_v44 = vsub.f32 %v7976_v29, %v9358_v31  ;;  %v2069_v56 = vand.u32 4294901760, %v2068_v11  ;;  %5048 = vmatpush1.bf16.msra.mxu1 %v7869_v47  ;;  %v8026_v31 = vld [vmem:[#allocation2 + $0x8] sm:$0xff] }
 0x197   :  { %10064 = vst [vmem:[#allocation187_spill] sm:$0xff] %v8001_v13  ;;  %v5437_v15 = vpack.c.bf16 %v3493_v0, %v3481_v50  ;;  %v9364_v40 = vand.u32 4294901760, %v10066_v36  ;;  %v8013_v48 = vsub.f32 %v7992_v54, %v8001_v13  ;;  %v10068_v50 = vld [vmem:[#allocation209_spill] sm:$0xff]  ;;  %5050 = vmatprep.subr.bf16.mxu1 %v7918_v42  ;;  %10069 = vst [vmem:[#allocation190_spill] sm:$0xff] %v8026_v31 }
 0x198   :  { %5432 = vmatpush1.bf16.msra.mxu0 %v7901_v6  ;;  %v3486_v17 = vsub.f32 %v7164_v60, %v9359_v38  ;;  %v3498_v46 = vsub.f32 %v10065_v32, %v9363_v51  ;;  %v9371_v0 = vand.u32 4294901760, %v10068_v50  ;;  %v3112_v47 = vand.u32 4294901760, %v3111_v44  ;;  %v10071_v44 = vld [vmem:[#allocation211_spill] sm:$0xff] }
 0x199   :  { %10067 = vst [vmem:[#allocation188_spill] sm:$0xff] %v8013_v48  ;;  %5434 = vmatprep.subr.bf16.mxu0 %v5433_v28  ;;  %v5055_v11 = vpack.c.bf16 %v2069_v56, %v2057_v41  ;;  %v2074_v6 = vsub.f32 %v10066_v36, %v9364_v40  ;;  %v2867_v38 = vmul.f32 %v8026_v31, %v7803_v45  ;;  %v9372_v54 = vand.u32 4294901760, %v8013_v48  ;;  %v10072_v40 = vld [vmem:[#allocation212_spill] sm:$0xff]  ;;  %v10073_v31 = vld [vmem:[#allocation213_spill] sm:$0xff] }
 0x19a   :  { %v3487_v29 = vand.u32 4294901760, %v3486_v17  ;;  %v3499_v51 = vand.u32 4294901760, %v3498_v46  ;;  %v2086_v42 = vsub.f32 %v10068_v50, %v9371_v0  ;;  %3113 = vmatprep.mubr.f32.mxu0 %v3112_v47  ;;  %v9373_v56 = vand.u32 4294901760, %v10071_v44  ;;  %5052 = vmatpush1.bf16.msra.mxu1 %v7948_v14 }
 0x19b   :  { %v2075_v28 = vand.u32 4294901760, %v2074_v6  ;;  %v8034_v41 = vand.u32 4294901760, %v2867_v38  ;;  %v9374_v13 = vand.u32 4294901760, %v10072_v40  ;;  %v3117_v17 = vsub.f32 %v8013_v48, %v9372_v54  ;;  %5054 = vmatprep.subr.bf16.mxu1 %v5053_v16  ;;  %v8056_v16 = vld [vmem:[#allocation2] sm:$0xff]  ;;  %v10079_v48 = vld [vmem:[#allocation217_spill] sm:$0xff] }
 0x19c   :  { %5436 = vmatpush1.bf16.msra.mxu0 %v5435_v12  ;;  %v5439_v46 = vpack.c.bf16 %v3499_v51, %v3487_v29  ;;  %v2087_v45 = vand.u32 4294901760, %v2086_v42  ;;  %v9375_v21 = vand.u32 4294901760, %v10073_v31  ;;  %v3504_v6 = vsub.f32 %v10071_v44, %v9373_v56  ;;  %v10075_v12 = vld [vmem:[#allocation214_spill] sm:$0xff]  ;;  %10076 = vst [vmem:[#allocation196_spill] sm:$0xff] %v8056_v16 }
 0x19d   :  { %10070 = vst [vmem:[#allocation86_spill] sm:$0xff] %v8034_v41  ;;  %5438 = vmatprep.subr.bf16.mxu0 %v5437_v15  ;;  %v8044_v47 = vsub.f32 %v2867_v38, %v8034_v41  ;;  %v3516_v14 = vsub.f32 %v10072_v40, %v9374_v13  ;;  %v9382_v0 = vand.u32 4294901760, %v10075_v12  ;;  %v3118_v54 = vand.u32 4294901760, %v3117_v17  ;;  %v10078_v17 = vld [vmem:[#allocation216_spill] sm:$0xff] }
 0x19e   :  { %v5057_v51 = vpack.c.bf16 %v2087_v45, %v2075_v28  ;;  %v2080_v29 = vsub.f32 %v10073_v31, %v9375_v21  ;;  %v2866_v38 = vmul.f32 %v8056_v16, %v7834_v10  ;;  %v3505_v42 = vand.u32 4294901760, %v3504_v6  ;;  %5056 = vmatpush1.bf16.msra.mxu1 %v5055_v11  ;;  %v10118_v31 = vld [vmem:[#allocation139_spill] sm:$0xff] }
 0x19f   :  { %10074 = vst [vmem:[#allocation192_spill] sm:$0xff] %v8044_v47  ;;  %v9384_v15 = vand.u32 4294901760, %v8044_v47  ;;  %v3517_v56 = vand.u32 4294901760, %v3516_v14  ;;  %v2092_v13 = vsub.f32 %v10075_v12, %v9382_v0  ;;  %3119 = vmatmul.mubr.f32.gmra.mrb[8].mxu0 %v3118_v54  ;;  %v9387_v21 = vand.u32 4294901760, %v10078_v17 }
 0x1a0   :  { %v2081_v45 = vand.u32 4294901760, %v2080_v29  ;;  %v8064_v28 = vand.u32 4294901760, %v2866_v38  ;;  %v9391_v41 = vand.u32 4294901760, %v10079_v48  ;;  %5440 = vmatpush1.bf16.msra.mxu0 %v5439_v46  ;;  %5058 = vmatprep.subr.bf16.mxu1 %v5057_v51  ;;  %v10081_v29 = vld [vmem:[#allocation19_spill] sm:$0xff]  ;;  %v10082_v46 = vld [vmem:[#allocation21_spill] sm:$0xff] }
 0x1a1   :  { %v3127_v6 = vsub.f32 %v8044_v47, %v9384_v15  ;;  %v5441_v14 = vpack.c.bf16 %v3517_v56, %v3505_v42  ;;  %v2093_v10 = vand.u32 4294901760, %v2092_v13  ;;  %v3510_v54 = vsub.f32 %v10078_v17, %v9387_v21  ;;  %v10084_v15 = vld [vmem:[#allocation27_spill] sm:$0xff]  ;;  %v10085_v21 = vld [vmem:[#allocation29_spill] sm:$0xff] }
 0x1a2   :  { %10077 = vst [vmem:[#allocation220_spill] sm:$0xff] %v8064_v28  ;;  %v8072_v16 = vsub.f32 %v2866_v38, %v8064_v28  ;;  %v3522_v11 = vsub.f32 %v10079_v48, %v9391_v41  ;;  %v5061_v51 = vpack.c.bf16 %v10082_v46, %v10081_v29  ;;  %v10083_v38 = vld [vmem:[#allocation26_spill] sm:$0xff]  ;;  %v10086_v28 = vld [vmem:[#allocation55_spill] sm:$0xff]  ;;  %v10109_v29 = vld [vmem:[#allocation125_spill] sm:$0xff] }
 0x1a3   :  { %v3128_v0 = vand.u32 4294901760, %v3127_v6  ;;  %5442 = vmatprep.subr.bf16.mxu0 %v5441_v14  ;;  %v5059_v12 = vpack.c.bf16 %v2093_v10, %v2081_v45  ;;  %v3511_v13 = vand.u32 4294901760, %v3510_v54  ;;  %v5445_v47 = vpack.c.bf16 %v10084_v15, %v10083_v38  ;;  %v10087_v6 = vld [vmem:[#allocation76_spill] sm:$0xff]  ;;  %v10088_v10 = vld [vmem:[#allocation77_spill] sm:$0xff]  ;;  %v10089_v54 = vld [vmem:[#allocation106_spill] sm:$0xff] }
 0x1a4   :  { %10080 = vst [vmem:[#allocation221_spill] sm:$0xff] %v8072_v16  ;;  %v9392_v56 = vand.u32 4294901760, %v8072_v16  ;;  %v3523_v42 = vand.u32 4294901760, %v3522_v11  ;;  %v5063_v17 = vpack.c.bf16 %v10086_v28, %v10085_v21  ;;  %v5065_v45 = vpack.c.bf16 %v10088_v10, %v10087_v6  ;;  %v10092_v15 = vld [vmem:[#allocation115_spill] sm:$0xff]  ;;  %v10093_v38 = vld [vmem:[#allocation117_spill] sm:$0xff]  ;;  %v10107_v21 = vld [vmem:[#allocation124_spill] sm:$0xff] }
 0x1a5   :  { %3129 = vmatprep.mubr.f32.mxu0 %v3128_v0  ;;  %5060 = vmatpush1.bf16.msra.mxu1 %v5059_v12  ;;  %v10090_v0 = vld [vmem:[#allocation90_spill] sm:$0xff]  ;;  %v10091_v12 = vld [vmem:[#allocation91_spill] sm:$0xff]  ;;  %v5069_v28 = vpack.c.bf16 %v10093_v38, %v10092_v15 }
 0x1a6   :  { %v3133_v41 = vsub.f32 %v8072_v16, %v9392_v56  ;;  %v5443_v46 = vpack.c.bf16 %v3523_v42, %v3511_v13  ;;  %5062 = vmatprep.subr.bf16.mxu1 %v5061_v51  ;;  %v5067_v11 = vpack.c.bf16 %v10091_v12, %v10090_v0  ;;  %v10094_v56 = vld [vmem:[#allocation102_spill] sm:$0xff]  ;;  %v10095_v51 = vld [vmem:[#allocation64_spill] sm:$0xff]  ;;  %v10096_v13 = vld [vmem:[#allocation67_spill] sm:$0xff] }
 0x1a7   :  { %v5447_v42 = vpack.c.bf16 %v10096_v13, %v10095_v51  ;;  %v10097_v10 = vld [vmem:[#allocation79_spill] sm:$0xff]  ;;  %v10102_v12 = vld [vmem:[#allocation121_spill] sm:$0xff]  ;;  %v10108_v13 = vld [vmem:[#allocation16_spill] sm:$0xff] }
 0x1a8   :  { %v3134_v14 = vand.u32 4294901760, %v3133_v41  ;;  %5444 = vmatpush1.bf16.msra.mxu0 %v5443_v46  ;;  %2098 = vmatmul.mubr.f32.vlgmr.msra.gmra.mrb[2].mxu1 %v10089_v54  ;;  %v10098_v41 = vld [vmem:[#allocation84_spill] sm:$0xff]  ;;  %v10099_v6 = vld [vmem:[#allocation107_spill] sm:$0xff]  ;;  %v5455_v51 = vpack.c.bf16 %v10108_v13, %v10107_v21  ;;  %v10132_v21 = vld [vmem:[#allocation185_spill] sm:$0xff] }
 0x1a9   :  { %5446 = vmatprep.subr.bf16.mxu0 %v5445_v47  ;;  %5064 = vmatpush1.bf16.msra.mxu1 %v5063_v17  ;;  %v5449_v46 = vpack.c.bf16 %v10098_v41, %v10097_v10  ;;  %v10100_v47 = vld [vmem:[#allocation113_spill] sm:$0xff]  ;;  %v10101_v17 = vld [vmem:[#allocation114_spill] sm:$0xff]  ;;  %v10104_v0 = vld [vmem:[#allocation219_spill] sm:$0xff] }
 0x1aa   :  { %3135 = vmatmul.mubr.f32.gmra.mrb[10].mxu0 %v3134_v14  ;;  %5066 = vmatprep.subr.bf16.mxu1 %v5065_v45  ;;  %v5451_v54 = vpack.c.bf16 %v10101_v17, %v10100_v47  ;;  %v10103_v14 = vld [vmem:[#allocation123_spill] sm:$0xff]  ;;  %v10110_v41 = vld [vmem:[#allocation126_spill] sm:$0xff]  ;;  %v10113_v17 = vld [vmem:[#allocation129_spill] sm:$0xff] }
 0x1ab   :  { %3526 = vmatprep.mubr.f32.mxu0 %v10094_v56  ;;  %2298 = vmatprep.mubr.f32.mxu1 %v10099_v6  ;;  %v5071_v45 = vpack.c.bf16 %v10103_v14, %v10102_v12  ;;  %v10105_v38 = vld [vmem:[#allocation119_spill] sm:$0xff]  ;;  %v10106_v56 = vld [vmem:[#allocation120_spill] sm:$0xff]  ;;  %v5073_v10 = vpack.c.bf16 %v10110_v41, %v10109_v29  ;;  %v10114_v47 = vld [vmem:[#allocation130_spill] sm:$0xff] }
 0x1ac   :  { %v5453_v15 = vpack.c.bf16 %v10106_v56, %v10105_v38  ;;  %v10111_v6 = vld [vmem:[#allocation127_spill] sm:$0xff]  ;;  %v5075_v48 = vpack.c.bf16 %v10114_v47, %v10113_v17  ;;  %v10115_v14 = vld [vmem:[#allocation134_spill] sm:$0xff]  ;;  %v10125_v13 = vld [vmem:[#allocation32_spill] sm:$0xff] }
 0x1ad   :  { %5068 = vmatpush1.bf16.msra.mxu1 %v5067_v11  ;;  %v10112_v11 = vld [vmem:[#allocation128_spill] sm:$0xff]  ;;  %v10116_v12 = vld [vmem:[#allocation22_spill] sm:$0xff]  ;;  %v10139_v41 = vld [vmem:[#allocation187_spill] sm:$0xff] }
 0x1ae   :  { %3528 = vmatmul.mubr.f32.vlgmr.msra.gmra.mrb[2].mxu0 %v10104_v0  ;;  %5070 = vmatprep.subr.bf16.mxu1 %v5069_v28  ;;  %v5457_v16 = vpack.c.bf16 %v10112_v11, %v10111_v6  ;;  %v5077_v0 = vpack.c.bf16 %v10116_v12, %v10115_v14  ;;  %v10117_v28 = vld [vmem:[#allocation138_spill] sm:$0xff]  ;;  %v10121_v6 = vld [vmem:[#allocation200_spill] sm:$0xff]  ;;  %v10131_v14 = vld [vmem:[#allocation133_spill] sm:$0xff] }
 0x1af   :  { %5448 = vmatpush1.bf16.msra.mxu0 %v5447_v42  ;;  %v5079_v40 = vpack.c.bf16 %v10118_v31, %v10117_v28  ;;  %3534 = vmatprep.mubr.f32.mxu0 %v7806_v5  ;;  %v10119_v11 = vld [vmem:[#allocation198_spill] sm:$0xff]  ;;  %v10123_v42 = vld [vmem:[#allocation213_spill] sm:$0xff]  ;;  %v10126_v5 = vld [vmem:[#allocation31_spill] sm:$0xff] }
 0x1b0   :  { %5450 = vmatprep.subr.bf16.mxu0 %v5449_v46  ;;  %v10120_v46 = vld [vmem:[#allocation96_spill] sm:$0xff]  ;;  %v10127_v28 = vld [vmem:[#allocation181_spill] sm:$0xff]  ;;  %v10133_v31 = vld [vmem:[#allocation135_spill] sm:$0xff] }
 0x1b1   :  { %5072 = vmatpush1.bf16.msra.mxu1 %v5071_v45  ;;  %v10128_v45 = vld [vmem:[#allocation216_spill] sm:$0xff]  ;;  %v10141_v12 = vld [vmem:[#allocation142_spill] sm:$0xff] }
 0x1b2   :  { %5074 = vmatprep.subr.bf16.mxu1 %v5073_v10  ;;  %3536 = vmatmul.mubr.f32.gmra.mrb[4].mxu0 %v7837_v61  ;;  %v10130_v10 = vld [vmem:[#allocation132_spill] sm:$0xff]  ;;  %v10136_v61 = vld [vmem:[#allocation147_spill] sm:$0xff] }
 0x1b3   :  { %5452 = vmatpush1.bf16.msra.mxu0 %v5451_v54  ;;  %3542 = vmatprep.mubr.f32.mxu0 %v7893_v62  ;;  %v10124_v62 = vld [vmem:[#allocation214_spill] sm:$0xff]  ;;  %v5081_v54 = vpack.c.bf16 %v10126_v5, %v10125_v13  ;;  %v5459_v47 = vpack.c.bf16 %v10131_v14, %v10130_v10  ;;  %v10134_v17 = vld [vmem:[#allocation136_spill] sm:$0xff] }
 0x1b4   :  { %5454 = vmatprep.subr.bf16.mxu0 %v5453_v15  ;;  %v10122_v15 = vld [vmem:[#allocation212_spill] sm:$0xff]  ;;  %v5461_v56 = vpack.c.bf16 %v10134_v17, %v10133_v31  ;;  %v10137_v5 = vld [vmem:[#allocation38_spill] sm:$0xff]  ;;  %v10146_v31 = vld [vmem:[#allocation41_spill] sm:$0xff] }
 0x1b5   :  { %5076 = vmatpush1.bf16.msra.mxu1 %v5075_v48  ;;  %v10129_v48 = vld [vmem:[#allocation217_spill] sm:$0xff]  ;;  %v10142_v10 = vld [vmem:[#allocation86_spill] sm:$0xff] }
 0x1b6   :  { %5078 = vmatprep.subr.bf16.mxu1 %v5077_v0  ;;  %3544 = vmatmul.mubr.f32.gmra.mrb[6].mxu0 %v10127_v28  ;;  %v10135_v0 = vld [vmem:[#allocation146_spill] sm:$0xff]  ;;  %v10138_v28 = vld [vmem:[#allocation36_spill] sm:$0xff] }
 0x1b7   :  { %5456 = vmatpush1.bf16.msra.mxu0 %v5455_v51  ;;  %3550 = vmatprep.mubr.f32.mxu0 %v10132_v21  ;;  %v5083_v38 = vpack.c.bf16 %v10136_v61, %v10135_v0  ;;  %v5085_v13 = vpack.c.bf16 %v10138_v28, %v10137_v5  ;;  %v10140_v51 = vld [vmem:[#allocation140_spill] sm:$0xff]  ;;  %v10148_v0 = vld [vmem:[#allocation153_spill] sm:$0xff] }
 0x1b8   :  { %5458 = vmatprep.subr.bf16.mxu0 %v5457_v16  ;;  %v5463_v14 = vpack.c.bf16 %v10141_v12, %v10140_v51  ;;  %v10143_v16 = vld [vmem:[#allocation143_spill] sm:$0xff]  ;;  %v10144_v21 = vld [vmem:[#allocation144_spill] sm:$0xff]  ;;  %v10152_v51 = vld [vmem:[#allocation218_spill] sm:$0xff] }
 0x1b9   :  { %5080 = vmatpush1.bf16.msra.mxu1 %v5079_v40  ;;  %v5465_v17 = vpack.c.bf16 %v10144_v21, %v10143_v16  ;;  %v10145_v40 = vld [vmem:[#allocation152_spill] sm:$0xff]  ;;  %v10156_v16 = vld [vmem:[#allocation50_spill] sm:$0xff] }
 0x1ba   :  { %5082 = vmatprep.subr.bf16.mxu1 %v5081_v54  ;;  %3552 = vmatmul.mubr.f32.gmra.mrb[8].mxu0 %v10139_v41  ;;  %v5087_v61 = vpack.c.bf16 %v10146_v31, %v10145_v40  ;;  %v10147_v54 = vld [vmem:[#allocation42_spill] sm:$0xff]  ;;  %v10149_v5 = vld [vmem:[#allocation220_spill] sm:$0xff]  ;;  %v10158_v40 = vld [vmem:[#allocation51_spill] sm:$0xff] }
 0x1bb   :  { %5460 = vmatpush1.bf16.msra.mxu0 %v5459_v47  ;;  %3558 = vmatprep.mubr.f32.mxu0 %v10142_v10  ;;  %v5089_v28 = vpack.c.bf16 %v10148_v0, %v10147_v54  ;;  %v10150_v47 = vld [vmem:[#allocation148_spill] sm:$0xff]  ;;  %v10151_v41 = vld [vmem:[#allocation34_spill] sm:$0xff] }
 0x1bc   :  { %5462 = vmatprep.subr.bf16.mxu0 %v5461_v56  ;;  %v5467_v12 = vpack.c.bf16 %v10151_v41, %v10150_v47  ;;  %v10153_v56 = vld [vmem:[#allocation149_spill] sm:$0xff]  ;;  %v10154_v10 = vld [vmem:[#allocation150_spill] sm:$0xff]  ;;  %v10161_v41 = vld [vmem:[#allocation155_spill] sm:$0xff] }
 0x1bd   :  { %5084 = vmatpush1.bf16.msra.mxu1 %v5083_v38  ;;  %v5469_v21 = vpack.c.bf16 %v10154_v10, %v10153_v56  ;;  %v10155_v38 = vld [vmem:[#allocation45_spill] sm:$0xff]  ;;  %v10162_v47 = vld [vmem:[#allocation47_spill] sm:$0xff] }
 0x1be   :  { %5086 = vmatprep.subr.bf16.mxu1 %v5085_v13  ;;  %3560 = vmatmul.mubr.f32.gmra.mrb[10].mxu0 %v10149_v5  ;;  %v5091_v31 = vpack.c.bf16 %v10156_v16, %v10155_v38  ;;  %v10157_v13 = vld [vmem:[#allocation158_spill] sm:$0xff]  ;;  %v10159_v5 = vld [vmem:[#allocation39_spill] sm:$0xff]  ;;  %v5473_v29 = vpack.c.bf16 %v10162_v47, %v10161_v41  ;;  %v10166_v56 = vld [vmem:[#allocation61_spill] sm:$0xff] }
 0x1bf   :  { %5464 = vmatpush1.bf16.msra.mxu0 %v5463_v14  ;;  %3760 = vmatprep.mubr.f32.mxu0 %v10152_v51  ;;  %v5093_v0 = vpack.c.bf16 %v10158_v40, %v10157_v13  ;;  %v10160_v14 = vld [vmem:[#allocation44_spill] sm:$0xff]  ;;  %v10164_v51 = vld [vmem:[#allocation162_spill] sm:$0xff]  ;;  %v10170_v13 = vld [vmem:[#allocation53_spill] sm:$0xff] }
 0x1c0   :  { %5466 = vmatprep.subr.bf16.mxu0 %v5465_v17  ;;  %v5471_v54 = vpack.c.bf16 %v10160_v14, %v10159_v5  ;;  %v10163_v17 = vld [vmem:[#allocation54_spill] sm:$0xff]  ;;  %v10168_v38 = vld [vmem:[#allocation156_spill] sm:$0xff]  ;;  %v10174_v41 = vld [vmem:[#allocation171_spill] sm:$0xff] }
 0x1c1   :  { %5088 = vmatpush1.bf16.msra.mxu1 %v5087_v61  ;;  %v5095_v10 = vpack.c.bf16 %v10164_v51, %v10163_v17  ;;  %v10165_v61 = vld [vmem:[#allocation56_spill] sm:$0xff]  ;;  %v10176_v17 = vld [vmem:[#allocation58_spill] sm:$0xff] }
 0x1c2   :  { %5090 = vmatprep.subr.bf16.mxu1 %v5089_v28  ;;  %v5097_v16 = vpack.c.bf16 %v10166_v56, %v10165_v61  ;;  %v10167_v28 = vld [vmem:[#allocation49_spill] sm:$0xff]  ;;  %v10172_v5 = vld [vmem:[#allocation168_spill] sm:$0xff] }
 0x1c3   :  { %5468 = vmatpush1.bf16.msra.mxu0 %v5467_v12  ;;  %v5475_v40 = vpack.c.bf16 %v10168_v38, %v10167_v28  ;;  %v10169_v12 = vld [vmem:[#allocation160_spill] sm:$0xff]  ;;  %v10178_v61 = vld [vmem:[#allocation165_spill] sm:$0xff] }
 0x1c4   :  { %5470 = vmatprep.subr.bf16.mxu0 %v5469_v21  ;;  %v5477_v14 = vpack.c.bf16 %v10170_v13, %v10169_v12  ;;  %v10171_v21 = vld [vmem:[#allocation167_spill] sm:$0xff] }
 0x1c5   :  { %5092 = vmatpush1.bf16.msra.mxu1 %v5091_v31  ;;  %v5099_v47 = vpack.c.bf16 %v10172_v5, %v10171_v21  ;;  %v10173_v31 = vld [vmem:[#allocation66_spill] sm:$0xff]  ;;  %v10181_v5 = vld [vmem:[#allocation173_spill] sm:$0xff] }
 0x1c6   :  { %5094 = vmatprep.subr.bf16.mxu1 %v5093_v0  ;;  %v5101_v51 = vpack.c.bf16 %v10174_v41, %v10173_v31  ;;  %v10175_v0 = vld [vmem:[#allocation164_spill] sm:$0xff] }
 0x1c7   :  { %5472 = vmatpush1.bf16.msra.mxu0 %v5471_v54  ;;  %v5479_v56 = vpack.c.bf16 %v10176_v17, %v10175_v0  ;;  %v10177_v54 = vld [vmem:[#allocation60_spill] sm:$0xff] }
 0x1c8   :  { %5474 = vmatprep.subr.bf16.mxu0 %v5473_v29  ;;  %v5481_v38 = vpack.c.bf16 %v10178_v61, %v10177_v54  ;;  %v10179_v29 = vld [vmem:[#allocation169_spill] sm:$0xff] }
 0x1c9   :  { %5096 = vmatpush1.bf16.msra.mxu1 %v5095_v10  ;;  %v10180_v10 = vld [vmem:[#allocation170_spill] sm:$0xff] }
 0x1ca   :  { %5098 = vmatprep.subr.bf16.mxu1 %v5097_v16  ;;  %v5483_v13 = vpack.c.bf16 %v10180_v10, %v10179_v29  ;;  %v10182_v16 = vld [vmem:[#allocation174_spill] sm:$0xff] }
 0x1cb   :  { %5476 = vmatpush1.bf16.msra.mxu0 %v5475_v40  ;;  %v5485_v21 = vpack.c.bf16 %v10182_v16, %v10181_v5  ;;  %v10183_v40 = vpack.c.bf16 %v10016_v26, %v10015_v23 }
 0x1cc   :  { %5478 = vmatprep.subr.bf16.mxu0 %v5477_v14  ;;  %v10184_v14 = vpack.c.bf16 %v10020_v34, %v10019_v63 }
 0x1cd   :  { %5100 = vmatpush1.bf16.msra.mxu1 %v5099_v47  ;;  %v10186_v47 = vpack.c.bf16 %v10028_v35, %v10027_v25 }
 0x1ce   :  { %5102 = vmatprep.subr.bf16.mxu1 %v5101_v51  ;;  %v10185_v51 = vpack.c.bf16 %v10024_v52, %v10023_v39 }
 0x1cf   :  { %5480 = vmatpush1.bf16.msra.mxu0 %v5479_v56  ;;  %v10187_v56 = vpack.c.bf16 %v10018_v58, %v10017_v57 }
 0x1d0   :  { %5482 = vmatprep.subr.bf16.mxu0 %v5481_v38  ;;  %v10188_v38 = vpack.c.bf16 %v10022_v30, %v10021_v24 }
 0x1d1   :  { %5104 = vmatpush1.bf16.msra.mxu1 %v10183_v40  ;;  %v10191_v40 = vpack.c.bf16 %v10026_v43, %v10025_v4 }
 0x1d2   :  { %5106 = vmatprep.subr.bf16.mxu1 %v10184_v14  ;;  %v10192_v14 = vpack.c.bf16 %v10033_v33, %v10031_v8 }
 0x1d3   :  { %5484 = vmatpush1.bf16.msra.mxu0 %v5483_v13  ;;  %v10189_v13 = vpack.c.bf16 %v10035_v18, %v10034_v2 }
 0x1d4   :  { %5486 = vmatprep.subr.bf16.mxu0 %v5485_v21  ;;  %v10190_v21 = vpack.c.bf16 %v10042_v27, %v10041_v55 }
 0x1d5   :  { %5108 = vmatpush1.bf16.msra.mxu1 %v10185_v51  ;;  %v10193_v51 = vpack.c.bf16 %v10119_v11, %v10047_v20 }
 0x1d6   :  { %5110 = vmatprep.subr.bf16.mxu1 %v10186_v47  ;;  %v10194_v47 = vpack.c.bf16 %v10121_v6, %v10120_v46 }
 0x1d7   :  { %5488 = vmatpush1.bf16.msra.mxu0 %v10187_v56  ;;  %v10195_v56 = vpack.c.bf16 %v10040_v53, %v10039_v37  ;;  %v10292_v53 = vld [vmem:[#allocation205_spill] sm:$0xff]  ;;  %v10298_v37 = vld [vmem:[#allocation110_spill] sm:$0xff] }
 0x1d8   :  { %5490 = vmatprep.subr.bf16.mxu0 %v10188_v38  ;;  %v10196_v38 = vpack.c.bf16 %v10045_v3, %v10044_v19 }
 0x1d9   :  { %5112 = vmatpush1.bf16.msra.mxu1 %v10189_v13  ;;  %v10197_v13 = vpack.c.bf16 %v7162_v1, %v10061_v22  ;;  %v10239_v1 = vld [vmem:[#allocation218_spill] sm:$0xff]  ;;  %v10243_v22 = vld [vmem:[#allocation151_spill] sm:$0xff] }
 0x1da   :  { %5114 = vmatprep.subr.bf16.mxu1 %v10190_v21  ;;  %v10198_v21 = vpack.c.bf16 %v10068_v50, %v10066_v36  ;;  %v10236_v50 = vld [vmem:[#allocation33_spill] sm:$0xff] }
 0x1db   :  { %5492 = vmatpush1.bf16.msra.mxu0 %v10191_v40  ;;  %v10199_v40 = vpack.c.bf16 %v10053_v49, %v10051_v9  ;;  %v10237_v36 = vld [vmem:[#allocation221_spill] sm:$0xff] }
 0x1dc   :  { %5494 = vmatprep.subr.bf16.mxu0 %v10192_v14  ;;  %v10200_v14 = vpack.c.bf16 %v10060_v7, %v10059_v59  ;;  %v10233_v59 = vld [vmem:[#allocation192_spill] sm:$0xff] }
 0x1dd   :  { %5116 = vmatpush1.bf16.msra.mxu1 %v10193_v51  ;;  %v10201_v51 = vpack.c.bf16 %v10124_v62, %v10123_v42  ;;  %v10230_v62 = vld [vmem:[#allocation28_spill] sm:$0xff] }
 0x1de   :  { %5118 = vmatprep.subr.bf16.mxu1 %v10194_v47  ;;  %v10202_v47 = vld [vmem:[#allocation97_spill] sm:$0xff]  ;;  %v10231_v42 = vld [vmem:[#allocation188_spill] sm:$0xff] }
 0x1df   :  { %5496 = vmatpush1.bf16.msra.mxu0 %v10195_v56  ;;  %v10203_v56 = vpack.c.bf16 %v10065_v32, %v7164_v60  ;;  %v10211_v32 = vld [vmem:[#allocation85_spill] sm:$0xff] }
 0x1e0   :  { %5498 = vmatprep.subr.bf16.mxu0 %v10196_v38  ;;  %v10204_v38 = vpack.c.bf16 %v10122_v15, %v10071_v44  ;;  %v10213_v15 = vld [vmem:[#allocation116_spill] sm:$0xff]  ;;  %v10226_v44 = vld [vmem:[#allocation17_spill] sm:$0xff] }
 0x1e1   :  { %5120 = vmatpush1.bf16.msra.mxu1 %v10197_v13  ;;  %v10205_v13 = vld [vmem:[#allocation108_spill] sm:$0xff] }
 0x1e2   :  { %5122 = vmatprep.subr.bf16.mxu1 %v10198_v21  ;;  %v10206_v21 = vld [vmem:[#allocation52_spill] sm:$0xff] }
 0x1e3   :  { %5500 = vmatpush1.bf16.msra.mxu0 %v10199_v40  ;;  %v10207_v40 = vld [vmem:[#allocation109_spill] sm:$0xff] }
 0x1e4   :  { %5502 = vmatprep.subr.bf16.mxu0 %v10200_v14  ;;  %v10208_v14 = vld [vmem:[#allocation75_spill] sm:$0xff] }
 0x1e5   :  { %5124 = vmatpush1.bf16.msra.mxu1 %v10201_v51  ;;  %v10209_v51 = vpack.c.bf16 %v10129_v48, %v10128_v45  ;;  %v10219_v48 = vld [vmem:[#allocation176_spill] sm:$0xff] }
 0x1e6   :  { %5126 = vmatprep.subr.bf16.mxu1 %v10202_v47  ;;  %v10210_v47 = vld [vmem:[#allocation24_spill] sm:$0xff] }
 0x1e7   :  { %5504 = vmatpush1.bf16.msra.mxu0 %v10203_v56  ;;  %v10212_v56 = vld [vmem:[#allocation111_spill] sm:$0xff]  ;;  %v10223_v45 = vld [vmem:[#allocation20_spill] sm:$0xff] }
 0x1e8   :  { %5506 = vmatprep.subr.bf16.mxu0 %v10204_v38  ;;  %2301 = vmatmul.mubr.f32.vlgmr.msra.gmra.mrb[2].mxu1 %v10205_v13  ;;  %v10214_v38 = vld [vmem:[#allocation62_spill] sm:$0xff]  ;;  %v10215_v13 = vld [vmem:[#allocation69_spill] sm:$0xff] }
 0x1e9   :  { %5128 = vmatpush1.bf16.msra.mxu1 %v10206_v21  ;;  %2438 = vmatprep.mubr.f32.mxu1 %v10207_v40  ;;  %v10216_v21 = vld [vmem:[#allocation82_spill] sm:$0xff] }
 0x1ea   :  { %5130 = vmatprep.subr.bf16.mxu1 %v10208_v14  ;;  %v10217_v40 = vld [vmem:[#allocation122_spill] sm:$0xff]  ;;  %v10218_v14 = vld [vmem:[#allocation15_spill] sm:$0xff] }
 0x1eb   :  { %5508 = vmatpush1.bf16.msra.mxu0 %v10209_v51  ;;  %v10220_v51 = vld [vmem:[#allocation95_spill] sm:$0xff] }
 0x1ec   :  { %5510 = vmatprep.subr.bf16.mxu0 %v10210_v47  ;;  %v10221_v47 = vld [vmem:[#allocation179_spill] sm:$0xff] }
 0x1ed   :  { %5132 = vmatpush1.bf16.msra.mxu1 %v10211_v32  ;;  %v10222_v32 = vld [vmem:[#allocation118_spill] sm:$0xff] }
 0x1ee   :  { %3763 = vmatmul.mubr.f32.vlgmr.msra.gmra.mrb[2].mxu0 %v10212_v56  ;;  %5134 = vmatprep.subr.bf16.mxu1 %v10213_v15  ;;  %v10224_v15 = vld [vmem:[#allocation23_spill] sm:$0xff] }
 0x1ef   :  { %5512 = vmatpush1.bf16.msra.mxu0 %v10214_v38  ;;  %3770 = vmatprep.mubr.f32.mxu0 %v10215_v13  ;;  %v10225_v38 = vld [vmem:[#allocation182_spill] sm:$0xff] }
 0x1f0   :  { %5514 = vmatprep.subr.bf16.mxu0 %v10216_v21  ;;  %v10227_v21 = vld [vmem:[#allocation81_spill] sm:$0xff] }
 0x1f1   :  { %5136 = vmatpush1.bf16.msra.mxu1 %v10217_v40  ;;  %v10228_v40 = vld [vmem:[#allocation18_spill] sm:$0xff] }
 0x1f2   :  { %5138 = vmatprep.subr.bf16.mxu1 %v10218_v14  ;;  %3773 = vmatmul.mubr.f32.gmra.mrb[4].mxu0 %v10219_v48  ;;  %v10229_v14 = vld [vmem:[#allocation137_spill] sm:$0xff] }
 0x1f3   :  { %5516 = vmatpush1.bf16.msra.mxu0 %v10220_v51  ;;  %3780 = vmatprep.mubr.f32.mxu0 %v10221_v47 }
 0x1f4   :  { %5518 = vmatprep.subr.bf16.mxu0 %v10222_v32  ;;  %v10232_v32 = vld [vmem:[#allocation131_spill] sm:$0xff] }
 0x1f5   :  { %5140 = vmatpush1.bf16.msra.mxu1 %v10223_v45 }
 0x1f6   :  { %5142 = vmatprep.subr.bf16.mxu1 %v10224_v15  ;;  %3783 = vmatmul.mubr.f32.gmra.mrb[6].mxu0 %v10225_v38 }
 0x1f7   :  { %5520 = vmatpush1.bf16.msra.mxu0 %v10226_v44  ;;  %3790 = vmatprep.mubr.f32.mxu0 %v10227_v21  ;;  %v1561_v51 = vpop.f32.mrb[0].mxu0  ;;  %v10234_v44 = vld [vmem:[#allocation25_spill] sm:$0xff] }
 0x1f8   :  { %5522 = vmatprep.subr.bf16.mxu0 %v10228_v40  ;;  %v1018_v60 = vpop.f32.mrb[0].mxu1  ;;  %v1563_v7 = vpop.f32.mrb[1].mxu0  ;;  %v10235_v40 = vld [vmem:[#allocation145_spill] sm:$0xff] }
 0x1f9   :  { %5144 = vmatpush1.bf16.msra.mxu1 %v10229_v14  ;;  %v5701_v45 = vadd.f32 %v1561_v51, %v1018_v60  ;;  %v1020_v15 = vpop.f32.mrb[1].mxu1  ;;  %v10242_v51 = vld [vmem:[#allocation30_spill] sm:$0xff] }
 0x1fa   :  { %5146 = vmatprep.subr.bf16.mxu1 %v10230_v62  ;;  %3793 = vmatmul.mubr.f32.gmra.mrb[8].mxu0 %v10231_v42  ;;  %v5702_v49 = vadd.f32 %v1563_v7, %v1020_v15  ;;  %v10238_v62 = vld [vmem:[#allocation141_spill] sm:$0xff]  ;;  %v10244_v7 = vld [vmem:[#allocation43_spill] sm:$0xff]  ;;  %v10247_v15 = vld [vmem:[#allocation46_spill] sm:$0xff] }
 0x1fb   :  { %5524 = vmatpush1.bf16.msra.mxu0 %v10232_v32  ;;  %3800 = vmatprep.mubr.f32.mxu0 %v10233_v59  ;;  %v2850_v9 = vand.u32 2147483647, %v5701_v45  ;;  %v10240_v32 = vand.u32 4294901760, %v10239_v1  ;;  %v10245_v45 = vld [vmem:[#allocation35_spill] sm:$0xff]  ;;  %v10250_v1 = vld [vmem:[#allocation154_spill] sm:$0xff] }
 0x1fc   :  { %5526 = vmatprep.subr.bf16.mxu0 %v10234_v44  ;;  %v2851_v14 = vand.u32 2147483647, %v5702_v49  ;;  %v10246_v49 = vld [vmem:[#allocation37_spill] sm:$0xff] }
 0x1fd   :  { %5148 = vmatpush1.bf16.msra.mxu1 %v10235_v40 }
 0x1fe   :  { %5150 = vmatprep.subr.bf16.mxu1 %v10236_v50  ;;  %3803 = vmatmul.mubr.f32.gmra.mrb[10].mxu0 %v10237_v36  ;;  %v8327_v60 = vadd.f32 %v2851_v14, %v2850_v9  ;;  %v10248_v50 = vld [vmem:[#allocation157_spill] sm:$0xff]  ;;  %v10253_v14 = vld [vmem:[#allocation48_spill] sm:$0xff] }
 0x1ff   :  { %5528 = vmatpush1.bf16.msra.mxu0 %v10238_v62  ;;  %3940 = vmatprep.mubr.f32.mxu0 %v10240_v32  ;;  %v10249_v62 = vld [vmem:[#allocation40_spill] sm:$0xff]  ;;  %v10251_v9 = vld [vmem:[#allocation161_spill] sm:$0xff] }
 0x200   :  { %10241 = vst [vmem:[#allocation107_spill] sm:$0xff] %v8327_v60  ;;  %5530 = vmatprep.subr.bf16.mxu0 %v10242_v51  ;;  %v10252_v32 = vld [vmem:[#allocation57_spill] sm:$0xff]  ;;  %v10254_v60 = vld [vmem:[#allocation159_spill] sm:$0xff] }
 0x201   :  { %5152 = vmatpush1.bf16.msra.mxu1 %v10243_v22  ;;  %v10279_v22 = vld [vmem:[#allocation21_spill] sm:$0xff] }
 0x202   :  { %5154 = vmatprep.subr.bf16.mxu1 %v10244_v7  ;;  %v10255_v7 = vld [vmem:[#allocation166_spill] sm:$0xff] }
 0x203   :  { %5532 = vmatpush1.bf16.msra.mxu0 %v10245_v45  ;;  %v10256_v45 = vld [vmem:[#allocation65_spill] sm:$0xff] }
 0x204   :  { %5534 = vmatprep.subr.bf16.mxu0 %v10246_v49  ;;  %v10257_v49 = vld [vmem:[#allocation163_spill] sm:$0xff] }
 0x205   :  { %5156 = vmatpush1.bf16.msra.mxu1 %v10247_v15  ;;  %v10258_v15 = vld [vmem:[#allocation59_spill] sm:$0xff] }
 0x206   :  { %5158 = vmatprep.subr.bf16.mxu1 %v10248_v50  ;;  %v10259_v50 = vld [vmem:[#allocation70_spill] sm:$0xff] }
 0x207   :  { %5536 = vmatpush1.bf16.msra.mxu0 %v10249_v62  ;;  %v10260_v62 = vld [vmem:[#allocation72_spill] sm:$0xff] }
 0x208   :  { %5538 = vmatprep.subr.bf16.mxu0 %v10250_v1  ;;  %v10261_v1 = vld [vmem:[#allocation63_spill] sm:$0xff] }
 0x209   :  { %5160 = vmatpush1.bf16.msra.mxu1 %v10251_v9  ;;  %v10262_v9 = vld [vmem:[#allocation172_spill] sm:$0xff] }
 0x20a   :  { %5162 = vmatprep.subr.bf16.mxu1 %v10252_v32  ;;  %v10263_v32 = vld [vmem:[#allocation180_spill] sm:$0xff] }
 0x20b   :  { %5540 = vmatpush1.bf16.msra.mxu0 %v10253_v14  ;;  %v10264_v14 = vld [vmem:[#allocation80_spill] sm:$0xff] }
 0x20c   :  { %5542 = vmatprep.subr.bf16.mxu0 %v10254_v60  ;;  %v10265_v60 = vld [vmem:[#allocation73_spill] sm:$0xff] }
 0x20d   :  { %5164 = vmatpush1.bf16.msra.mxu1 %v10255_v7  ;;  %v10266_v7 = vld [vmem:[#allocation178_spill] sm:$0xff] }
 0x20e   :  { %5166 = vmatprep.subr.bf16.mxu1 %v10256_v45  ;;  %v10267_v45 = vld [vmem:[#allocation189_spill] sm:$0xff] }
 0x20f   :  { %5544 = vmatpush1.bf16.msra.mxu0 %v10257_v49  ;;  %v10268_v49 = vld [vmem:[#allocation89_spill] sm:$0xff] }
 0x210   :  { %5546 = vmatprep.subr.bf16.mxu0 %v10258_v15  ;;  %v10269_v15 = vld [vmem:[#allocation183_spill] sm:$0xff] }
 0x211   :  { %5168 = vmatpush1.bf16.msra.mxu1 %v10259_v50  ;;  %v10270_v50 = vld [vmem:[#allocation186_spill] sm:$0xff] }
 0x212   :  { %5170 = vmatprep.subr.bf16.mxu1 %v10260_v62  ;;  %v10271_v62 = vld [vmem:[#allocation197_spill] sm:$0xff] }
 0x213   :  { %5548 = vmatpush1.bf16.msra.mxu0 %v10261_v1  ;;  %v10272_v1 = vld [vmem:[#allocation199_spill] sm:$0xff] }
 0x214   :  { %5550 = vmatprep.subr.bf16.mxu0 %v10262_v9  ;;  %v10273_v9 = vld [vmem:[#allocation88_spill] sm:$0xff] }
 0x215   :  { %5172 = vmatpush1.bf16.msra.mxu1 %v10263_v32  ;;  %v10274_v32 = vld [vmem:[#allocation193_spill] sm:$0xff] }
 0x216   :  { %5174 = vmatprep.subr.bf16.mxu1 %v10264_v14  ;;  %v10275_v14 = vld [vmem:[#allocation99_spill] sm:$0xff] }
 0x217   :  { %5552 = vmatpush1.bf16.msra.mxu0 %v10265_v60  ;;  %v10276_v60 = vld [vmem:[#allocation207_spill] sm:$0xff] }
 0x218   :  { %5554 = vmatprep.subr.bf16.mxu0 %v10266_v7  ;;  %v10277_v7 = vld [vmem:[#allocation19_spill] sm:$0xff] }
 0x219   :  { %5176 = vmatpush1.bf16.msra.mxu1 %v10267_v45  ;;  %v10278_v45 = vand.u32 4294901760, %v10277_v7 }
 0x21a   :  { %5178 = vmatprep.subr.bf16.mxu1 %v10268_v49  ;;  %v10280_v49 = vand.u32 4294901760, %v10279_v22  ;;  %v10293_v22 = vld [vmem:[#allocation210_spill] sm:$0xff] }
 0x21b   :  { %5556 = vmatpush1.bf16.msra.mxu0 %v10269_v15  ;;  %v10281_v15 = vld [vmem:[#allocation92_spill] sm:$0xff] }
 0x21c   :  { %5558 = vmatprep.subr.bf16.mxu0 %v10270_v50  ;;  %v5189_v51 = vpack.c.bf16 %v10280_v49, %v10278_v45  ;;  %v10282_v50 = vld [vmem:[#allocation201_spill] sm:$0xff]  ;;  %v10294_v45 = vld [vmem:[#allocation26_spill] sm:$0xff] }
 0x21d   :  { %5180 = vmatpush1.bf16.msra.mxu1 %v10271_v62  ;;  %v10283_v62 = vld [vmem:[#allocation104_spill] sm:$0xff]  ;;  %v10295_v49 = vand.u32 4294901760, %v10294_v45  ;;  %v10308_v45 = vld [vmem:[#allocation215_spill] sm:$0xff] }
 0x21e   :  { %5182 = vmatprep.subr.bf16.mxu1 %v10272_v1  ;;  %v10284_v1 = vld [vmem:[#allocation29_spill] sm:$0xff] }
 0x21f   :  { %5560 = vmatpush1.bf16.msra.mxu0 %v10273_v9  ;;  %v10285_v40 = vand.u32 4294901760, %v10284_v1  ;;  %v10286_v9 = vld [vmem:[#allocation55_spill] sm:$0xff]  ;;  %v10299_v1 = vld [vmem:[#allocation90_spill] sm:$0xff] }
 0x220   :  { %5562 = vmatprep.subr.bf16.mxu0 %v10274_v32  ;;  %v10287_v44 = vand.u32 4294901760, %v10286_v9 }
 0x221   :  { %5184 = vmatpush1.bf16.msra.mxu1 %v10275_v14  ;;  %v10288_v14 = vld [vmem:[#allocation76_spill] sm:$0xff] }
 0x222   :  { %5186 = vmatprep.subr.bf16.mxu1 %v10276_v60  ;;  %v5191_v32 = vpack.c.bf16 %v10287_v44, %v10285_v40  ;;  %v10289_v3 = vand.u32 4294901760, %v10288_v14  ;;  %v10290_v60 = vld [vmem:[#allocation77_spill] sm:$0xff]  ;;  %v10300_v44 = vand.u32 4294901760, %v10299_v1  ;;  %v10301_v40 = vld [vmem:[#allocation91_spill] sm:$0xff] }
 0x223   :  { %5564 = vmatpush1.bf16.msra.mxu0 %v10281_v15  ;;  %v10291_v19 = vand.u32 4294901760, %v10290_v60  ;;  %v10303_v14 = vld [vmem:[#allocation105_spill] sm:$0xff]  ;;  %v10313_v1 = vld [vmem:[#allocation79_spill] sm:$0xff] }
 0x224   :  { %5566 = vmatprep.subr.bf16.mxu0 %v10282_v50  ;;  %v10296_v50 = vld [vmem:[#allocation27_spill] sm:$0xff]  ;;  %v10306_v60 = vld [vmem:[#allocation117_spill] sm:$0xff]  ;;  %v10314_v6 = vand.u32 4294901760, %v10313_v1 }
 0x225   :  { %5188 = vmatpush1.bf16.msra.mxu1 %v10283_v62  ;;  %v5193_v7 = vpack.c.bf16 %v10291_v19, %v10289_v3  ;;  %v10297_v15 = vand.u32 4294901760, %v10296_v50  ;;  %v10304_v3 = vld [vmem:[#allocation115_spill] sm:$0xff]  ;;  %v10309_v50 = vld [vmem:[#allocation64_spill] sm:$0xff] }
 0x226   :  { %5190 = vmatprep.subr.bf16.mxu1 %v5189_v51  ;;  %v10302_v51 = vand.u32 4294901760, %v10301_v40  ;;  %v10305_v19 = vand.u32 4294901760, %v10304_v3  ;;  %v10315_v40 = vld [vmem:[#allocation84_spill] sm:$0xff]  ;;  %v10319_v3 = vld [vmem:[#allocation123_spill] sm:$0xff] }
 0x227   :  { %5568 = vmatpush1.bf16.msra.mxu0 %v10292_v53  ;;  %v5573_v62 = vpack.c.bf16 %v10297_v15, %v10295_v49  ;;  %v10310_v15 = vand.u32 4294901760, %v10309_v50  ;;  %v10311_v49 = vld [vmem:[#allocation67_spill] sm:$0xff]  ;;  %v10320_v46 = vand.u32 4294901760, %v10319_v3  ;;  %v10335_v3 = vld [vmem:[#allocation129_spill] sm:$0xff] }
 0x228   :  { %5570 = vmatprep.subr.bf16.mxu0 %v10293_v22  ;;  %2442 = vmatmul.mubr.f32.vlgmr.msra.gmra.mrb[2].mxu1 %v10298_v37  ;;  %v5195_v9 = vpack.c.bf16 %v10302_v51, %v10300_v44  ;;  %v10307_v22 = vand.u32 4294901760, %v10306_v60  ;;  %v10312_v37 = vand.u32 4294901760, %v10311_v49  ;;  %v10316_v44 = vand.u32 4294901760, %v10315_v40  ;;  %v10324_v49 = vld [vmem:[#allocation126_spill] sm:$0xff] }
 0x229   :  { %5192 = vmatpush1.bf16.msra.mxu1 %v5191_v32  ;;  %2705 = vmatprep.mubr.f32.mxu1 %v10303_v14  ;;  %v10328_v40 = vld [vmem:[#allocation114_spill] sm:$0xff] }
 0x22a   :  { %5194 = vmatprep.subr.bf16.mxu1 %v5193_v7  ;;  %v5197_v53 = vpack.c.bf16 %v10307_v22, %v10305_v19  ;;  %v5575_v32 = vpack.c.bf16 %v10312_v37, %v10310_v15  ;;  %v5577_v51 = vpack.c.bf16 %v10316_v44, %v10314_v6  ;;  %v10317_v7 = vld [vmem:[#allocation121_spill] sm:$0xff]  ;;  %v10321_v22 = vand.u32 4294901760, %v10212_v56  ;;  %v10333_v56 = vld [vmem:[#allocation120_spill] sm:$0xff] }
 0x22b   :  { %5572 = vmatpush1.bf16.msra.mxu0 %v10308_v45  ;;  %v10318_v14 = vand.u32 4294901760, %v10317_v7  ;;  %v10322_v19 = vld [vmem:[#allocation125_spill] sm:$0xff]  ;;  %v10325_v15 = vand.u32 4294901760, %v10324_v49  ;;  %v10329_v6 = vand.u32 4294901760, %v10328_v40  ;;  %v10330_v44 = vand.u32 4294901760, %v10215_v13  ;;  %v10339_v49 = vld [vmem:[#allocation134_spill] sm:$0xff] }
 0x22c   :  { %5574 = vmatprep.subr.bf16.mxu0 %v5573_v62  ;;  %v10323_v50 = vand.u32 4294901760, %v10322_v19  ;;  %v10326_v37 = vld [vmem:[#allocation113_spill] sm:$0xff]  ;;  %v10334_v7 = vand.u32 4294901760, %v10333_v56  ;;  %v10337_v19 = vld [vmem:[#allocation130_spill] sm:$0xff]  ;;  %v10343_v13 = vand.u32 4294901760, %v10219_v48  ;;  %v10349_v56 = vld [vmem:[#allocation127_spill] sm:$0xff] }
 0x22d   :  { %5196 = vmatpush1.bf16.msra.mxu1 %v5195_v9  ;;  %v5199_v60 = vpack.c.bf16 %v10320_v46, %v10318_v14  ;;  %v10327_v1 = vand.u32 4294901760, %v10326_v37  ;;  %v10331_v46 = vld [vmem:[#allocation119_spill] sm:$0xff]  ;;  %v10341_v37 = vld [vmem:[#allocation22_spill] sm:$0xff] }
 0x22e   :  { %3944 = vmatmul.mubr.f32.vlgmr.msra.gmra.mrb[2].mxu0 %v10321_v22  ;;  %5198 = vmatprep.subr.bf16.mxu1 %v5197_v53  ;;  %v5201_v62 = vpack.c.bf16 %v10325_v15, %v10323_v50  ;;  %v10332_v14 = vand.u32 4294901760, %v10331_v46  ;;  %v10336_v22 = vand.u32 4294901760, %v10335_v3  ;;  %v10338_v50 = vand.u32 4294901760, %v10337_v19  ;;  %v10353_v19 = vld [vmem:[#allocation138_spill] sm:$0xff]  ;;  %v10355_v48 = vld [vmem:[#allocation139_spill] sm:$0xff] }
 0x22f   :  { %5576 = vmatpush1.bf16.msra.mxu0 %v5575_v32  ;;  %v5579_v9 = vpack.c.bf16 %v10329_v6, %v10327_v1  ;;  %3952 = vmatprep.mubr.f32.mxu0 %v10330_v44  ;;  %v10340_v15 = vand.u32 4294901760, %v10339_v49  ;;  %v10342_v1 = vand.u32 4294901760, %v10341_v37  ;;  %v10346_v44 = vld [vmem:[#allocation16_spill] sm:$0xff]  ;;  %v10356_v49 = vand.u32 4294901760, %v10355_v48 }
 0x230   :  { %5578 = vmatprep.subr.bf16.mxu0 %v5577_v51  ;;  %v5581_v53 = vpack.c.bf16 %v10334_v7, %v10332_v14  ;;  %v5203_v32 = vpack.c.bf16 %v10338_v50, %v10336_v22  ;;  %v10344_v51 = vld [vmem:[#allocation124_spill] sm:$0xff]  ;;  %v10347_v46 = vand.u32 4294901760, %v10346_v44  ;;  %v10348_v14 = vand.u32 4294901760, %v10221_v47  ;;  %v10364_v44 = vld [vmem:[#allocation133_spill] sm:$0xff] }
 0x231   :  { %5200 = vmatpush1.bf16.msra.mxu1 %v5199_v60  ;;  %v5205_v40 = vpack.c.bf16 %v10342_v1, %v10340_v15  ;;  %v10345_v6 = vand.u32 4294901760, %v10344_v51  ;;  %v10351_v7 = vld [vmem:[#allocation128_spill] sm:$0xff]  ;;  %v10354_v50 = vand.u32 4294901760, %v10353_v19  ;;  %v10359_v1 = vld [vmem:[#allocation31_spill] sm:$0xff]  ;;  %v10361_v47 = vand.u32 4294901760, %v10225_v38  ;;  %v10371_v19 = vld [vmem:[#allocation146_spill] sm:$0xff] }
 0x232   :  { %5202 = vmatprep.subr.bf16.mxu1 %v5201_v62  ;;  %3956 = vmatmul.mubr.f32.gmra.mrb[4].mxu0 %v10343_v13  ;;  %v10350_v62 = vand.u32 4294901760, %v10349_v56  ;;  %v10352_v3 = vand.u32 4294901760, %v10351_v7  ;;  %v10357_v15 = vld [vmem:[#allocation32_spill] sm:$0xff]  ;;  %v10360_v13 = vand.u32 4294901760, %v10359_v1  ;;  %v10367_v56 = vld [vmem:[#allocation135_spill] sm:$0xff] }
 0x233   :  { %5580 = vmatpush1.bf16.msra.mxu0 %v5579_v9  ;;  %v5583_v60 = vpack.c.bf16 %v10347_v46, %v10345_v6  ;;  %3964 = vmatprep.mubr.f32.mxu0 %v10348_v14  ;;  %v5207_v9 = vpack.c.bf16 %v10356_v49, %v10354_v50  ;;  %v10358_v37 = vand.u32 4294901760, %v10357_v15  ;;  %v10365_v46 = vand.u32 4294901760, %v10364_v44  ;;  %v10373_v38 = vld [vmem:[#allocation147_spill] sm:$0xff]  ;;  %v10375_v49 = vld [vmem:[#allocation38_spill] sm:$0xff] }
 0x234   :  { %5582 = vmatprep.subr.bf16.mxu0 %v5581_v53  ;;  %v5585_v22 = vpack.c.bf16 %v10352_v3, %v10350_v62  ;;  %v10362_v53 = vld [vmem:[#allocation132_spill] sm:$0xff]  ;;  %v10366_v14 = vand.u32 4294901760, %v10227_v21  ;;  %v10372_v50 = vand.u32 4294901760, %v10371_v19  ;;  %v10374_v48 = vand.u32 4294901760, %v10373_v38 }
 0x235   :  { %5204 = vmatpush1.bf16.msra.mxu1 %v5203_v32  ;;  %v5209_v51 = vpack.c.bf16 %v10360_v13, %v10358_v37  ;;  %v10363_v6 = vand.u32 4294901760, %v10362_v53  ;;  %v10369_v62 = vld [vmem:[#allocation136_spill] sm:$0xff]  ;;  %v10376_v15 = vand.u32 4294901760, %v10375_v49  ;;  %v10379_v21 = vand.u32 4294901760, %v10231_v42  ;;  %v10382_v53 = vld [vmem:[#allocation142_spill] sm:$0xff]  ;;  %v10391_v42 = vld [vmem:[#allocation41_spill] sm:$0xff] }
 0x236   :  { %5206 = vmatprep.subr.bf16.mxu1 %v5205_v40  ;;  %3968 = vmatmul.mubr.f32.gmra.mrb[6].mxu0 %v10361_v47  ;;  %v10368_v40 = vand.u32 4294901760, %v10367_v56  ;;  %v10370_v7 = vand.u32 4294901760, %v10369_v62  ;;  %v10377_v37 = vld [vmem:[#allocation36_spill] sm:$0xff]  ;;  %v10384_v44 = vand.u32 4294901760, %v10233_v59  ;;  %v10392_v19 = vand.u32 4294901760, %v10391_v42 }
 0x237   :  { %5584 = vmatpush1.bf16.msra.mxu0 %v5583_v60  ;;  %v5587_v32 = vpack.c.bf16 %v10365_v46, %v10363_v6  ;;  %3976 = vmatprep.mubr.f32.mxu0 %v10366_v14  ;;  %v5211_v60 = vpack.c.bf16 %v10374_v48, %v10372_v50  ;;  %v10378_v1 = vand.u32 4294901760, %v10377_v37  ;;  %v10383_v6 = vand.u32 4294901760, %v10382_v53  ;;  %v10385_v46 = vld [vmem:[#allocation143_spill] sm:$0xff]  ;;  %v10387_v14 = vld [vmem:[#allocation144_spill] sm:$0xff]  ;;  %v10393_v50 = vld [vmem:[#allocation42_spill] sm:$0xff] }
 0x238   :  { %5586 = vmatprep.subr.bf16.mxu0 %v5585_v22  ;;  %v5589_v3 = vpack.c.bf16 %v10370_v7, %v10368_v40  ;;  %v10380_v22 = vld [vmem:[#allocation140_spill] sm:$0xff]  ;;  %v10388_v56 = vand.u32 4294901760, %v10387_v14  ;;  %v10394_v38 = vand.u32 4294901760, %v10393_v50  ;;  %v10395_v48 = vld [vmem:[#allocation153_spill] sm:$0xff]  ;;  %v10397_v59 = vand.u32 4294901760, %v10237_v36 }
 0x239   :  { %5208 = vmatpush1.bf16.msra.mxu1 %v5207_v9  ;;  %v5213_v13 = vpack.c.bf16 %v10378_v1, %v10376_v15  ;;  %v10381_v47 = vand.u32 4294901760, %v10380_v22  ;;  %v10389_v62 = vld [vmem:[#allocation152_spill] sm:$0xff]  ;;  %v10396_v49 = vand.u32 4294901760, %v10395_v48  ;;  %v10401_v22 = vld [vmem:[#allocation177_spill] sm:$0xff] }
 0x23a   :  { %5210 = vmatprep.subr.bf16.mxu1 %v5209_v51  ;;  %3980 = vmatmul.mubr.f32.gmra.mrb[8].mxu0 %v10379_v21  ;;  %v10386_v51 = vand.u32 4294901760, %v10385_v46  ;;  %v10390_v7 = vand.u32 4294901760, %v10389_v62  ;;  %v10399_v37 = vld [vmem:[#allocation196_spill] sm:$0xff]  ;;  %v10400_v21 = vld [vmem:[#allocation78_spill] sm:$0xff]  ;;  %v10413_v50 = vld [vmem:[#allocation45_spill] sm:$0xff] }
 0x23b   :  { %5588 = vmatpush1.bf16.msra.mxu0 %v5587_v32  ;;  %v5591_v9 = vpack.c.bf16 %v10383_v6, %v10381_v47  ;;  %3988 = vmatprep.mubr.f32.mxu0 %v10384_v44  ;;  %v5217_v15 = vpack.c.bf16 %v10396_v49, %v10394_v38  ;;  %v10402_v47 = vld [vmem:[#allocation148_spill] sm:$0xff]  ;;  %v10404_v6 = vld [vmem:[#allocation34_spill] sm:$0xff] }
 0x23c   :  { %5590 = vmatprep.subr.bf16.mxu0 %v5589_v3  ;;  %v5593_v40 = vpack.c.bf16 %v10388_v56, %v10386_v51  ;;  %v5215_v32 = vpack.c.bf16 %v10392_v19, %v10390_v7  ;;  %v10398_v3 = vld [vmem:[#allocation190_spill] sm:$0xff]  ;;  %v10403_v53 = vand.u32 4294901760, %v10402_v47  ;;  %v10405_v44 = vand.u32 4294901760, %v10404_v6  ;;  %v10407_v51 = vld [vmem:[#allocation149_spill] sm:$0xff]  ;;  %v10411_v7 = vld [vmem:[#allocation112_spill] sm:$0xff] }
 0x23d   :  { %5212 = vmatpush1.bf16.msra.mxu1 %v5211_v60  ;;  %v87_v1 = vadd.f32 %v10399_v37, %v10398_v3  ;;  %v95_v60 = vadd.f32 %v10401_v22, %v10400_v21  ;;  %v10406_v46 = vld [vmem:[#allocation102_spill] sm:$0xff]  ;;  %v10408_v14 = vand.u32 4294901760, %v10407_v51  ;;  %v10412_v42 = vld [vmem:[#allocation68_spill] sm:$0xff]  ;;  %v10421_v22 = vld [vmem:[#allocation51_spill] sm:$0xff] }
 0x23e   :  { %5214 = vmatprep.subr.bf16.mxu1 %v5213_v13  ;;  %3992 = vmatmul.mubr.f32.gmra.mrb[10].mxu0 %v10397_v59  ;;  %v5595_v13 = vpack.c.bf16 %v10405_v44, %v10403_v53  ;;  %v10409_v56 = vld [vmem:[#allocation150_spill] sm:$0xff]  ;;  %v90_v19 = vadd.f32 %v10412_v42, %v10411_v7  ;;  %v10417_v59 = vld [vmem:[#allocation83_spill] sm:$0xff]  ;;  %v10418_v3 = vld [vmem:[#allocation184_spill] sm:$0xff]  ;;  %v10422_v47 = vand.u32 4294901760, %v10421_v22 }
 0x23f   :  { %5592 = vmatpush1.bf16.msra.mxu0 %v5591_v9  ;;  %4255 = vmatprep.mubr.f32.mxu0 %v10406_v46  ;;  %v10410_v36 = vand.u32 4294901760, %v10409_v56  ;;  %v10414_v9 = vand.u32 4294901760, %v10413_v50  ;;  %v10415_v38 = vld [vmem:[#allocation50_spill] sm:$0xff]  ;;  %v100_v37 = vadd.f32 %v10418_v3, %v10417_v59  ;;  %v10425_v44 = vld [vmem:[#allocation44_spill] sm:$0xff]  ;;  %v10437_v59 = vld [vmem:[#allocation61_spill] sm:$0xff] }
 0x240   :  { %5594 = vmatprep.subr.bf16.mxu0 %v5593_v40  ;;  %88 = vadd.xlane.f32.xlu0 %v87_v1  ;;  %v10416_v48 = vand.u32 4294901760, %v10415_v38  ;;  %v10419_v40 = vld [vmem:[#allocation158_spill] sm:$0xff]  ;;  %v10423_v1 = vld [vmem:[#allocation39_spill] sm:$0xff]  ;;  %v10438_v3 = vand.u32 4294901760, %v10437_v59 }
 0x241   :  { %v5597_v62 = vpack.c.bf16 %v10410_v36, %v10408_v14  ;;  %5216 = vmatpush1.bf16.msra.mxu1 %v5215_v32  ;;  %96 = vadd.xlane.f32.xlu1 %v95_v60  ;;  %v10420_v21 = vand.u32 4294901760, %v10419_v40  ;;  %v10424_v6 = vand.u32 4294901760, %v10423_v1  ;;  %v10426_v32 = vand.u32 4294901760, %v10425_v44  ;;  %v10427_v14 = vld [vmem:[#allocation155_spill] sm:$0xff]  ;;  %v10433_v50 = vld [vmem:[#allocation162_spill] sm:$0xff]  ;;  %v10447_v44 = vld [vmem:[#allocation168_spill] sm:$0xff] }
 0x242   :  { %v5219_v49 = vpack.c.bf16 %v10416_v48, %v10414_v9  ;;  %5218 = vmatprep.subr.bf16.mxu1 %v5217_v15  ;;  %v10428_v56 = vand.u32 4294901760, %v10427_v14  ;;  %v10429_v36 = vld [vmem:[#allocation47_spill] sm:$0xff]  ;;  %v10431_v15 = vld [vmem:[#allocation54_spill] sm:$0xff]  ;;  %v10434_v9 = vand.u32 4294901760, %v10433_v50  ;;  %v10455_v50 = vand.u32 4294901760, %v10015_v23 }
 0x243   :  { %v5221_v53 = vpack.c.bf16 %v10422_v47, %v10420_v21  ;;  %5596 = vmatpush1.bf16.msra.mxu0 %v5595_v13  ;;  %v5599_v51 = vpack.c.bf16 %v10426_v32, %v10424_v6  ;;  %v10430_v60 = vand.u32 4294901760, %v10429_v36  ;;  %v10432_v42 = vand.u32 4294901760, %v10431_v15  ;;  %v10435_v13 = vld [vmem:[#allocation56_spill] sm:$0xff] }
 0x244   :  { %5598 = vmatprep.subr.bf16.mxu0 %v5597_v62  ;;  %91 = vadd.xlane.f32.xlu0 %v90_v19  ;;  %v10436_v48 = vand.u32 4294901760, %v10435_v13  ;;  %v10439_v62 = vand.u32 4294901760, %v10167_v28  ;;  %v10440_v21 = vld [vmem:[#allocation156_spill] sm:$0xff]  ;;  %v10442_v19 = vand.u32 4294901760, %v10169_v12  ;;  %v10448_v32 = vand.u32 4294901760, %v10447_v44  ;;  %v10487_v44 = vld [vmem:[#allocation87_spill] sm:$0xff] }
 0x245   :  { %v5601_v7 = vpack.c.bf16 %v10430_v60, %v10428_v56  ;;  %5220 = vmatpush1.bf16.msra.mxu1 %v5219_v49  ;;  %v5223_v38 = vpack.c.bf16 %v10434_v9, %v10432_v42  ;;  %101 = vadd.xlane.f32.xlu1 %v100_v37  ;;  %v10441_v22 = vand.u32 4294901760, %v10440_v21  ;;  %v10443_v49 = vld [vmem:[#allocation53_spill] sm:$0xff]  ;;  %v10445_v37 = vld [vmem:[#allocation167_spill] sm:$0xff]  ;;  %v10450_v28 = vand.u32 4294901760, %v10174_v41 }
 0x246   :  { %5222 = vmatprep.subr.bf16.mxu1 %v5221_v53  ;;  %v5225_v40 = vpack.c.bf16 %v10438_v3, %v10436_v48  ;;  %v10444_v1 = vand.u32 4294901760, %v10443_v49  ;;  %v10446_v53 = vand.u32 4294901760, %v10445_v37  ;;  %v10451_v36 = vand.u32 4294901760, %v10175_v0 }
 0x247   :  { %5600 = vmatpush1.bf16.msra.mxu0 %v5599_v51  ;;  %v5603_v47 = vpack.c.bf16 %v10441_v22, %v10439_v62  ;;  %v10449_v51 = vand.u32 4294901760, %v10173_v31  ;;  %v10452_v12 = vand.u32 4294901760, %v10176_v17  ;;  %v10454_v15 = vand.u32 4294901760, %v10178_v61 }
 0x248   :  { %5602 = vmatprep.subr.bf16.mxu0 %v5601_v7  ;;  %v5605_v6 = vpack.c.bf16 %v10444_v1, %v10442_v19  ;;  %v5227_v14 = vpack.c.bf16 %v10448_v32, %v10446_v53  ;;  %v10453_v7 = vand.u32 4294901760, %v10177_v54  ;;  %v10456_v31 = vand.u32 4294901760, %v10016_v26 }
 0x249   :  { %5224 = vmatpush1.bf16.msra.mxu1 %v5223_v38  ;;  %v5229_v56 = vpack.c.bf16 %v10450_v28, %v10449_v51  ;;  %v5607_v60 = vpack.c.bf16 %v10452_v12, %v10451_v36  ;;  %v10457_v41 = vand.u32 4294901760, %v10019_v63  ;;  %v10458_v0 = vand.u32 4294901760, %v10020_v34  ;;  %v10491_v51 = vld [vmem:[#allocation195_spill] sm:$0xff]  ;;  %v10494_v36 = vld [vmem:[#allocation101_spill] sm:$0xff] }
 0x24a   :  { %5226 = vmatprep.subr.bf16.mxu1 %v5225_v40  ;;  %v5609_v42 = vpack.c.bf16 %v10454_v15, %v10453_v7  ;;  %v5231_v9 = vpack.c.bf16 %v10456_v31, %v10455_v50  ;;  %v10459_v17 = vand.u32 4294901760, %v10179_v29  ;;  %v10460_v54 = vand.u32 4294901760, %v10180_v10  ;;  %v10497_v15 = vld [vmem:[#allocation98_spill] sm:$0xff]  ;;  %v10499_v31 = vld [vmem:[#allocation208_spill] sm:$0xff] }
 0x24b   :  { %5604 = vmatpush1.bf16.msra.mxu0 %v5603_v47  ;;  %v5233_v38 = vpack.c.bf16 %v10458_v0, %v10457_v41  ;;  %v10461_v61 = vand.u32 4294901760, %v10181_v5  ;;  %v10462_v23 = vand.u32 4294901760, %v10182_v16  ;;  %v10463_v26 = vand.u32 4294901760, %v10023_v39  ;;  %v10501_v41 = vld [vmem:[#allocation209_spill] sm:$0xff] }
 0x24c   :  { %5606 = vmatprep.subr.bf16.mxu0 %v5605_v6  ;;  %v5611_v13 = vpack.c.bf16 %v10460_v54, %v10459_v17  ;;  %v10464_v63 = vand.u32 4294901760, %v10024_v52  ;;  %v10465_v34 = vand.u32 4294901760, %v10027_v25  ;;  %v10466_v29 = vand.u32 4294901760, %v10028_v35  ;;  %v10483_v6 = vld [vmem:[#allocation200_spill] sm:$0xff]  ;;  %v10503_v54 = vld [vmem:[#allocation94_spill] sm:$0xff] }
 0x24d   :  { %5228 = vmatpush1.bf16.msra.mxu1 %v5227_v14  ;;  %v5613_v48 = vpack.c.bf16 %v10462_v23, %v10461_v61  ;;  %v10467_v10 = vand.u32 4294901760, %v10017_v57  ;;  %v10468_v5 = vand.u32 4294901760, %v10018_v58  ;;  %v10469_v16 = vand.u32 4294901760, %v10021_v24  ;;  %v10505_v61 = vld [vmem:[#allocation93_spill] sm:$0xff] }
 0x24e   :  { %5230 = vmatprep.subr.bf16.mxu1 %v5229_v56  ;;  %v5235_v59 = vpack.c.bf16 %v10464_v63, %v10463_v26  ;;  %v5237_v3 = vpack.c.bf16 %v10466_v29, %v10465_v34  ;;  %v10470_v39 = vand.u32 4294901760, %v10022_v30  ;;  %v10471_v52 = vand.u32 4294901760, %v10034_v2  ;;  %v10507_v26 = vld [vmem:[#allocation202_spill] sm:$0xff] }
 0x24f   :  { %5608 = vmatpush1.bf16.msra.mxu0 %v5607_v60  ;;  %v5615_v40 = vpack.c.bf16 %v10468_v5, %v10467_v10  ;;  %v10472_v25 = vand.u32 4294901760, %v10035_v18  ;;  %v10473_v35 = vand.u32 4294901760, %v10041_v55  ;;  %v10474_v57 = vand.u32 4294901760, %v10042_v27  ;;  %v10481_v27 = vld [vmem:[#allocation96_spill] sm:$0xff]  ;;  %v10513_v5 = vld [vmem:[#allocation214_spill] sm:$0xff] }
 0x250   :  { %5610 = vmatprep.subr.bf16.mxu0 %v5609_v42  ;;  %v5617_v62 = vpack.c.bf16 %v10470_v39, %v10469_v16  ;;  %v10475_v58 = vand.u32 4294901760, %v10025_v4  ;;  %v10476_v24 = vand.u32 4294901760, %v10026_v43  ;;  %v10477_v30 = vand.u32 4294901760, %v10031_v8  ;;  %v10485_v43 = vld [vmem:[#allocation191_spill] sm:$0xff]  ;;  %v10495_v60 = vld [vmem:[#allocation204_spill] sm:$0xff] }
 0x251   :  { %5232 = vmatpush1.bf16.msra.mxu1 %v5231_v9  ;;  %v5239_v21 = vpack.c.bf16 %v10472_v25, %v10471_v52  ;;  %v5241_v22 = vpack.c.bf16 %v10474_v57, %v10473_v35  ;;  %v10478_v2 = vand.u32 4294901760, %v10033_v33  ;;  %v10479_v18 = vand.u32 4294901760, %v10047_v20  ;;  %v10489_v33 = vld [vmem:[#allocation194_spill] sm:$0xff]  ;;  %v10515_v39 = vld [vmem:[#allocation100_spill] sm:$0xff]  ;;  %v10519_v35 = vld [vmem:[#allocation211_spill] sm:$0xff] }
 0x252   :  { %5234 = vmatprep.subr.bf16.mxu1 %v5233_v38  ;;  %v5619_v47 = vpack.c.bf16 %v10476_v24, %v10475_v58  ;;  %v10480_v55 = vand.u32 4294901760, %v10119_v11  ;;  %v10482_v1 = vand.u32 4294901760, %v10481_v27  ;;  %v10484_v4 = vand.u32 4294901760, %v10483_v6  ;;  %v10493_v11 = vld [vmem:[#allocation103_spill] sm:$0xff]  ;;  %v10517_v52 = vld [vmem:[#allocation206_spill] sm:$0xff]  ;;  %v10529_v27 = vld [vmem:[#allocation52_spill] sm:$0xff] }
 0x253   :  { %5612 = vmatpush1.bf16.msra.mxu0 %v5611_v13  ;;  %v5621_v19 = vpack.c.bf16 %v10478_v2, %v10477_v30  ;;  %v10486_v53 = vand.u32 4294901760, %v10485_v43  ;;  %v10488_v8 = vand.u32 4294901760, %v10487_v44  ;;  %v10490_v14 = vand.u32 4294901760, %v10489_v33  ;;  %v10524_v30 = vld [vmem:[#allocation216_spill] sm:$0xff]  ;;  %v10531_v6 = vld [vmem:[#allocation75_spill] sm:$0xff]  ;;  %v10536_v44 = vld [vmem:[#allocation62_spill] sm:$0xff] }
 0x254   :  { %5614 = vmatprep.subr.bf16.mxu0 %v5613_v48  ;;  %v5243_v49 = vpack.c.bf16 %v10480_v55, %v10479_v18  ;;  %v5245_v37 = vpack.c.bf16 %v10484_v4, %v10482_v1  ;;  %v10492_v20 = vand.u32 4294901760, %v10491_v51  ;;  %v75_v56 = vand.u32 2147483647, %v10493_v11  ;;  %v10530_v1 = vld [vmem:[#allocation105_spill] sm:$0xff]  ;;  %v10532_v4 = vld [vmem:[#allocation24_spill] sm:$0xff]  ;;  %v10534_v43 = vld [vmem:[#allocation219_spill] sm:$0xff] }
 0x255   :  { %5236 = vmatpush1.bf16.msra.mxu1 %v5235_v59  ;;  %v5623_v32 = vpack.c.bf16 %v10488_v8, %v10486_v53  ;;  %v76_v12 = vand.u32 2147483647, %v10494_v36  ;;  %v10496_v7 = vand.u32 4294901760, %v10495_v60  ;;  %v10498_v42 = vand.u32 4294901760, %v10497_v15  ;;  %v10509_v59 = vld [vmem:[#allocation203_spill] sm:$0xff]  ;;  %v10535_v53 = vld [vmem:[#allocation116_spill] sm:$0xff] }
 0x256   :  { %5238 = vmatprep.subr.bf16.mxu1 %v5237_v3  ;;  %v5625_v28 = vpack.c.bf16 %v10492_v20, %v10490_v14  ;;  %v10500_v9 = vand.u32 4294901760, %v10499_v31  ;;  %v10502_v0 = vand.u32 4294901760, %v10501_v41  ;;  %v10504_v13 = vand.u32 4294901760, %v10503_v54  ;;  %v10511_v3 = vld [vmem:[#allocation213_spill] sm:$0xff]  ;;  %v10537_v8 = vld [vmem:[#allocation175_spill] sm:$0xff]  ;;  %v10539_v33 = vld [vmem:[#allocation122_spill] sm:$0xff] }
 0x257   :  { %5616 = vmatpush1.bf16.msra.mxu0 %v5615_v40  ;;  %v5247_v50 = vpack.c.bf16 %v10498_v42, %v10496_v7  ;;  %v77_v17 = vadd.f32 %v76_v12, %v75_v56  ;;  %v10506_v23 = vand.u32 4294901760, %v10505_v61  ;;  %v10508_v63 = vand.u32 4294901760, %v10507_v26  ;;  %v10540_v14 = vld [vmem:[#allocation15_spill] sm:$0xff]  ;;  %v10544_v11 = vld [vmem:[#allocation118_spill] sm:$0xff]  ;;  %v10545_v56 = vld [vmem:[#allocation20_spill] sm:$0xff] }
 0x258   :  { %5618 = vmatprep.subr.bf16.mxu0 %v5617_v62  ;;  %v5249_v38 = vpack.c.bf16 %v10502_v0, %v10500_v9  ;;  %v10510_v34 = vand.u32 4294901760, %v10509_v59  ;;  %v10512_v10 = vand.u32 4294901760, %v10511_v3  ;;  %v10514_v40 = vand.u32 4294901760, %v10513_v5  ;;  %v10541_v51 = vld [vmem:[#allocation71_spill] sm:$0xff]  ;;  %v10547_v12 = vld [vmem:[#allocation181_spill] sm:$0xff]  ;;  %v10550_v15 = vld [vmem:[#allocation18_spill] sm:$0xff] }
 0x259   :  { %5240 = vmatpush1.bf16.msra.mxu1 %v5239_v21  ;;  %v5627_v48 = vpack.c.bf16 %v10506_v23, %v10504_v13  ;;  %78 = vadd.xlane.f32.xlu0 %v77_v17  ;;  %v10516_v62 = vand.u32 4294901760, %v10515_v39  ;;  %v10518_v25 = vand.u32 4294901760, %v10517_v52  ;;  %v10520_v57 = vand.u32 4294901760, %v10519_v35  ;;  %v10542_v20 = vld [vmem:[#allocation95_spill] sm:$0xff]  ;;  %v10548_v60 = vld [vmem:[#allocation17_spill] sm:$0xff]  ;;  %v10555_v41 = vld [vmem:[#allocation86_spill] sm:$0xff] }
 0x25a   :  { %5242 = vmatprep.subr.bf16.mxu1 %v5241_v22  ;;  %v5629_v29 = vpack.c.bf16 %v10510_v34, %v10508_v63  ;;  %v5251_v16 = vpack.c.bf16 %v10514_v40, %v10512_v10  ;;  %v10521_v22 = vld [vmem:[#allocation212_spill] sm:$0xff]  ;;  %v10525_v2 = vand.u32 4294901760, %v10524_v30  ;;  %v10546_v36 = vld [vmem:[#allocation23_spill] sm:$0xff]  ;;  %v10549_v7 = vld [vmem:[#allocation185_spill] sm:$0xff] }
 0x25b   :  { %5620 = vmatpush1.bf16.msra.mxu0 %v5619_v47  ;;  %v5631_v21 = vpack.c.bf16 %v10518_v25, %v10516_v62  ;;  %v10522_v58 = vand.u32 4294901760, %v10521_v22  ;;  %v10523_v47 = vld [vmem:[#allocation97_spill] sm:$0xff]  ;;  %v10553_v31 = vld [vmem:[#allocation187_spill] sm:$0xff]  ;;  %v10559_v54 = vld [vmem:[#allocation220_spill] sm:$0xff] }
 0x25c   :  { %5622 = vmatprep.subr.bf16.mxu0 %v5621_v19  ;;  %v10526_v19 = vld [vmem:[#allocation217_spill] sm:$0xff]  ;;  %v10554_v9 = vld [vmem:[#allocation131_spill] sm:$0xff]  ;;  %v10561_v61 = vld [vmem:[#allocation30_spill] sm:$0xff] }
 0x25d   :  { %5244 = vmatpush1.bf16.msra.mxu1 %v5243_v49  ;;  %v5633_v24 = vpack.c.bf16 %v10522_v58, %v10520_v57  ;;  %v10527_v18 = vand.u32 4294901760, %v10526_v19  ;;  %v10528_v49 = vld [vmem:[#allocation106_spill] sm:$0xff]  ;;  %v10551_v42 = vld [vmem:[#allocation137_spill] sm:$0xff]  ;;  %v10562_v23 = vld [vmem:[#allocation151_spill] sm:$0xff] }
 0x25e   :  { %5246 = vmatprep.subr.bf16.mxu1 %v5245_v37  ;;  %v10533_v37 = vld [vmem:[#allocation85_spill] sm:$0xff]  ;;  %v10564_v26 = vld [vmem:[#allocation35_spill] sm:$0xff]  ;;  %v10566_v59 = vld [vmem:[#allocation46_spill] sm:$0xff] }
 0x25f   :  { %5624 = vmatpush1.bf16.msra.mxu0 %v5623_v32  ;;  %v5635_v55 = vpack.c.bf16 %v10527_v18, %v10525_v2  ;;  %v10538_v32 = vld [vmem:[#allocation82_spill] sm:$0xff]  ;;  %v10556_v0 = vld [vmem:[#allocation25_spill] sm:$0xff]  ;;  %v10572_v5 = vld [vmem:[#allocation48_spill] sm:$0xff] }
 0x260   :  { %5626 = vmatprep.subr.bf16.mxu0 %v5625_v28  ;;  %v10543_v28 = vld [vmem:[#allocation74_spill] sm:$0xff]  ;;  %v10558_v17 = vld [vmem:[#allocation33_spill] sm:$0xff]  ;;  %v10573_v40 = vld [vmem:[#allocation159_spill] sm:$0xff] }
 0x261   :  { %5248 = vmatpush1.bf16.msra.mxu1 %v5247_v50  ;;  %v10552_v50 = vld [vmem:[#allocation28_spill] sm:$0xff]  ;;  %v10560_v13 = vld [vmem:[#allocation141_spill] sm:$0xff]  ;;  %v10569_v3 = vld [vmem:[#allocation154_spill] sm:$0xff] }
 0x262   :  { %5250 = vmatprep.subr.bf16.mxu1 %v5249_v38  ;;  %v10557_v38 = vld [vmem:[#allocation145_spill] sm:$0xff]  ;;  %v10576_v62 = vld [vmem:[#allocation163_spill] sm:$0xff]  ;;  %v10578_v25 = vld [vmem:[#allocation70_spill] sm:$0xff] }
 0x263   :  { %5628 = vmatpush1.bf16.msra.mxu0 %v5627_v48  ;;  %v10563_v48 = vld [vmem:[#allocation43_spill] sm:$0xff]  ;;  %v10565_v63 = vld [vmem:[#allocation37_spill] sm:$0xff]  ;;  %v10581_v57 = vld [vmem:[#allocation172_spill] sm:$0xff] }
 0x264   :  { %5630 = vmatprep.subr.bf16.mxu0 %v5629_v29  ;;  %v10567_v34 = vld [vmem:[#allocation157_spill] sm:$0xff]  ;;  %v10568_v29 = vld [vmem:[#allocation40_spill] sm:$0xff]  ;;  %v10577_v52 = vld [vmem:[#allocation59_spill] sm:$0xff] }
 0x265   :  { %5252 = vmatpush1.bf16.msra.mxu1 %v5251_v16  ;;  %v10570_v10 = vld [vmem:[#allocation161_spill] sm:$0xff]  ;;  %v10574_v16 = vld [vmem:[#allocation166_spill] sm:$0xff]  ;;  %v10580_v35 = vld [vmem:[#allocation63_spill] sm:$0xff] }
 0x266   :  { %5254 = vmatprep.subr.bf16.mxu1 %v10523_v47  ;;  %v10575_v39 = vld [vmem:[#allocation65_spill] sm:$0xff]  ;;  %v10582_v22 = vld [vmem:[#allocation180_spill] sm:$0xff]  ;;  %v10585_v47 = vld [vmem:[#allocation178_spill] sm:$0xff] }
 0x267   :  { %5632 = vmatpush1.bf16.msra.mxu0 %v5631_v21  ;;  %v10579_v21 = vld [vmem:[#allocation72_spill] sm:$0xff]  ;;  %v10586_v30 = vld [vmem:[#allocation189_spill] sm:$0xff]  ;;  %v10588_v19 = vld [vmem:[#allocation183_spill] sm:$0xff] }
 0x268   :  { %5634 = vmatprep.subr.bf16.mxu0 %v5633_v24  ;;  %2707 = vmatmul.mubr.f32.vlgmr.msra.gmra.mrb[2].mxu1 %v10528_v49  ;;  %v10583_v58 = vld [vmem:[#allocation80_spill] sm:$0xff]  ;;  %v10584_v24 = vld [vmem:[#allocation73_spill] sm:$0xff]  ;;  %v10589_v18 = vld [vmem:[#allocation186_spill] sm:$0xff] }
 0x269   :  { %5256 = vmatpush1.bf16.msra.mxu1 %v10529_v27  ;;  %2842 = vmatprep.mubr.f32.mxu1 %v10530_v1  ;;  %v10587_v2 = vld [vmem:[#allocation89_spill] sm:$0xff]  ;;  %v10591_v27 = vld [vmem:[#allocation199_spill] sm:$0xff]  ;;  %v10592_v1 = vld [vmem:[#allocation88_spill] sm:$0xff] }
 0x26a   :  { %5258 = vmatprep.subr.bf16.mxu1 %v10531_v6  ;;  %v10593_v6 = vld [vmem:[#allocation193_spill] sm:$0xff] }
 0x26b   :  { %5636 = vmatpush1.bf16.msra.mxu0 %v5635_v55  ;;  %v10590_v55 = vld [vmem:[#allocation197_spill] sm:$0xff] }
 0x26c   :  { %5638 = vmatprep.subr.bf16.mxu0 %v10532_v4  ;;  %v10594_v4 = vld [vmem:[#allocation99_spill] sm:$0xff] }
 0x26d   :  { %5260 = vmatpush1.bf16.msra.mxu1 %v10533_v37  ;;  %v10595_v37 = vld [vmem:[#allocation207_spill] sm:$0xff] }
 0x26e   :  { %4257 = vmatmul.mubr.f32.vlgmr.msra.gmra.mrb[2].mxu0 %v10534_v43  ;;  %5262 = vmatprep.subr.bf16.mxu1 %v10535_v53  ;;  %v10596_v53 = vld [vmem:[#allocation92_spill] sm:$0xff] }
 0x26f   :  { %5640 = vmatpush1.bf16.msra.mxu0 %v10536_v44  ;;  %4263 = vmatprep.mubr.f32.mxu0 %v10537_v8  ;;  %v10597_v44 = vld [vmem:[#allocation201_spill] sm:$0xff] }
 0x270   :  { %5642 = vmatprep.subr.bf16.mxu0 %v10538_v32  ;;  %v10598_v32 = vld [vmem:[#allocation104_spill] sm:$0xff] }
 0x271   :  { %5264 = vmatpush1.bf16.msra.mxu1 %v10539_v33  ;;  %v10599_v33 = vld [vmem:[#allocation205_spill] sm:$0xff] }
 0x272   :  { %5266 = vmatprep.subr.bf16.mxu1 %v10540_v14  ;;  %4265 = vmatmul.mubr.f32.gmra.mrb[4].mxu0 %v10541_v51  ;;  %v10600_v14 = vld [vmem:[#allocation210_spill] sm:$0xff] }
 0x273   :  { %5644 = vmatpush1.bf16.msra.mxu0 %v10542_v20  ;;  %4271 = vmatprep.mubr.f32.mxu0 %v10543_v28 }
 0x274   :  { %5646 = vmatprep.subr.bf16.mxu0 %v10544_v11 }
 0x275   :  { %5268 = vmatpush1.bf16.msra.mxu1 %v10545_v56 }
 0x276   :  { %5270 = vmatprep.subr.bf16.mxu1 %v10546_v36  ;;  %4273 = vmatmul.mubr.f32.gmra.mrb[6].mxu0 %v10547_v12 }
 0x277   :  { %5648 = vmatpush1.bf16.msra.mxu0 %v10548_v60  ;;  %4279 = vmatprep.mubr.f32.mxu0 %v10549_v7 }
 0x278   :  { %5650 = vmatprep.subr.bf16.mxu0 %v10550_v15 }
 0x279   :  { %5272 = vmatpush1.bf16.msra.mxu1 %v10551_v42 }
 0x27a   :  { %5274 = vmatprep.subr.bf16.mxu1 %v10552_v50  ;;  %4281 = vmatmul.mubr.f32.gmra.mrb[8].mxu0 %v10553_v31 }
 0x27b   :  { %5652 = vmatpush1.bf16.msra.mxu0 %v10554_v9  ;;  %4287 = vmatprep.mubr.f32.mxu0 %v10555_v41 }
 0x27c   :  { %5654 = vmatprep.subr.bf16.mxu0 %v10556_v0 }
 0x27d   :  { %5276 = vmatpush1.bf16.msra.mxu1 %v10557_v38 }
 0x27e   :  { %5278 = vmatprep.subr.bf16.mxu1 %v10558_v17  ;;  %4289 = vmatmul.mubr.f32.gmra.mrb[10].mxu0 %v10559_v54 }
 0x27f   :  { %5656 = vmatpush1.bf16.msra.mxu0 %v10560_v13  ;;  %4424 = vmatprep.mubr.f32.mxu0 %v10406_v46  ;;  %v10571_v46 = vld [vmem:[#allocation57_spill] sm:$0xff] }
 0x280   :  { %5658 = vmatprep.subr.bf16.mxu0 %v10561_v61 }
 0x281   :  { %5280 = vmatpush1.bf16.msra.mxu1 %v10562_v23 }
 0x282   :  { %5282 = vmatprep.subr.bf16.mxu1 %v10563_v48 }
 0x283   :  { %5660 = vmatpush1.bf16.msra.mxu0 %v10564_v26 }
 0x284   :  { %5662 = vmatprep.subr.bf16.mxu0 %v10565_v63 }
 0x285   :  { %5284 = vmatpush1.bf16.msra.mxu1 %v10566_v59 }
 0x286   :  { %5286 = vmatprep.subr.bf16.mxu1 %v10567_v34 }
 0x287   :  { %5664 = vmatpush1.bf16.msra.mxu0 %v10568_v29 }
 0x288   :  { %5666 = vmatprep.subr.bf16.mxu0 %v10569_v3 }
 0x289   :  { %5288 = vmatpush1.bf16.msra.mxu1 %v10570_v10 }
 0x28a   :  { %5290 = vmatprep.subr.bf16.mxu1 %v10571_v46 }
 0x28b   :  { %5668 = vmatpush1.bf16.msra.mxu0 %v10572_v5 }
 0x28c   :  { %5670 = vmatprep.subr.bf16.mxu0 %v10573_v40  ;;  %v10601_v40 = vld [vmem:[#allocation107_spill] sm:$0xff] }
 0x28d   :  { %5292 = vmatpush1.bf16.msra.mxu1 %v10574_v16 }
 0x28e   :  { %5294 = vmatprep.subr.bf16.mxu1 %v10575_v39 }
 0x28f   :  { %5672 = vmatpush1.bf16.msra.mxu0 %v10576_v62 }
 0x290   :  { %5674 = vmatprep.subr.bf16.mxu0 %v10577_v52 }
 0x291   :  { %5296 = vmatpush1.bf16.msra.mxu1 %v10578_v25 }
 0x292   :  { %5298 = vmatprep.subr.bf16.mxu1 %v10579_v21 }
 0x293   :  { %5676 = vmatpush1.bf16.msra.mxu0 %v10580_v35 }
 0x294   :  { %5678 = vmatprep.subr.bf16.mxu0 %v10581_v57 }
 0x295   :  { %5300 = vmatpush1.bf16.msra.mxu1 %v10582_v22 }
 0x296   :  { %5302 = vmatprep.subr.bf16.mxu1 %v10583_v58 }
 0x297   :  { %5680 = vmatpush1.bf16.msra.mxu0 %v10584_v24 }
 0x298   :  { %5682 = vmatprep.subr.bf16.mxu0 %v10585_v47 }
 0x299   :  { %5304 = vmatpush1.bf16.msra.mxu1 %v10586_v30 }
 0x29a   :  { %5306 = vmatprep.subr.bf16.mxu1 %v10587_v2 }
 0x29b   :  { %5684 = vmatpush1.bf16.msra.mxu0 %v10588_v19 }
 0x29c   :  { %5686 = vmatprep.subr.bf16.mxu0 %v10589_v18 }
 0x29d   :  { %5308 = vmatpush1.bf16.msra.mxu1 %v10590_v55 }
 0x29e   :  { %5310 = vmatprep.subr.bf16.mxu1 %v10591_v27 }
 0x29f   :  { %5688 = vmatpush1.bf16.msra.mxu0 %v10592_v1 }
 0x2a0   :  { %5690 = vmatprep.subr.bf16.mxu0 %v10593_v6 }
 0x2a1   :  { %5312 = vmatpush1.bf16.msra.mxu1 %v10594_v4 }
 0x2a2   :  { %5314 = vmatprep.subr.bf16.mxu1 %v10595_v37 }
 0x2a3   :  { %5692 = vmatpush1.bf16.msra.mxu0 %v10596_v53 }
 0x2a4   :  { %5694 = vmatprep.subr.bf16.mxu0 %v10597_v44 }
 0x2a5   :  { %5316 = vmatpush1.bf16.msra.mxu1 %v10598_v32 }
 0x2a7   :  { %5696 = vmatpush1.bf16.msra.mxu0 %v10599_v33 }
 0x2a8   :  { %5698 = vmatprep.subr.bf16.mxu0 %v10600_v14  ;;  %2844 = vmatmul.mubr.f32.vlgmr.msra.gmra.mrb[2].mxu1 %v10528_v49 }
 0x2ab   :  { %5700 = vmatpush1.bf16.msra.mxu0 %v10308_v45 }
 0x2ae   :  { %4426 = vmatmul.mubr.f32.vlgmr.msra.gmra.mrb[2].mxu0 %v10534_v43 }
 0x2af   :  { %4432 = vmatprep.mubr.f32.mxu0 %v10537_v8 }
 0x2b2   :  { %4434 = vmatmul.mubr.f32.gmra.mrb[4].mxu0 %v10541_v51 }
 0x2b3   :  { %4440 = vmatprep.mubr.f32.mxu0 %v10543_v28 }
 0x2b6   :  { %4442 = vmatmul.mubr.f32.gmra.mrb[6].mxu0 %v10547_v12 }
 0x2b7   :  { %4448 = vmatprep.mubr.f32.mxu0 %v10549_v7 }
 0x2ba   :  { %4450 = vmatmul.mubr.f32.gmra.mrb[8].mxu0 %v10553_v31 }
 0x2bb   :  { %4456 = vmatprep.mubr.f32.mxu0 %v10555_v41 }
 0x2be   :  { %4458 = vmatmul.mubr.f32.gmra.mrb[10].mxu0 %v10559_v54 }
 0x2cd   :  { %v89_v49 = vpop.xlane.xlu0 %88 }
 0x2ce   :  { %v103_v45 = vmul.f32 0.00390625, %v89_v49  ;;  %v105_v51 = vmul.f32 %v89_v49, %v89_v49  ;;  %v97_v56 = vpop.xlane.xlu1 %96 }
 0x2d0   :  { %v106_v12 = vmul.f32 0.00390625, %v105_v51 }
 0x2d1   :  { %v92_v20 = vpop.xlane.xlu0 %91 }
 0x2d2   :  { %v104_v43 = vmul.f32 0.00390625, %v92_v20  ;;  %v109_v36 = vmul.f32 %v92_v20, %v92_v20  ;;  %v102_v7 = vpop.xlane.xlu1 %101  ;;  %v107_v15 = vsub.f32 %v97_v56, %v106_v12 }
 0x2d4   :  { %v129_v11 = vsub.f32 %v103_v45, %v104_v43  ;;  %v110_v60 = vmul.f32 0.00390625, %v109_v36  ;;  %v108_v50 = vmul.f32 0.003921569, %v107_v15 }
 0x2d6   :  { %v130_v8 = vmul.f32 %v129_v11, %v129_v11  ;;  %v111_v42 = vsub.f32 %v102_v7, %v110_v60  ;;  %v113_v9 = vmax.f32 %v108_v50, 0.0 }
 0x2d8   :  { %v132_v28 = vsel %vm131_vm0, %v130_v8, 0.0  ;;  %v112_v31 = vmul.f32 0.003921569, %v111_v42  ;;  %5790 = vrsqrt.f32 %v113_v9  ;;  %vm116_vm1 = vcmp.eq.f32.partialorder %v113_v9, inf }
 0x2d9   :  { %133 = vadd.xlane.f32.xlu1 %v132_v28  ;;  %v119_v13 = vand.u32 2147483648, %v113_v9  ;;  %vm118_vm3 = vcmp.eq.f32.partialorder %v113_v9, 0.0 }
 0x2da   :  { %v121_v41 = vmax.f32 %v112_v31, 0.0 }
 0x2dc   :  { %5792 = vrsqrt.f32 %v121_v41  ;;  %vm124_vm2 = vcmp.eq.f32.partialorder %v121_v41, inf  ;;  %v127_v61 = vand.u32 2147483648, %v121_v41  ;;  %vm126_vm4 = vcmp.eq.f32.partialorder %v121_v41, 0.0 }
 0x2e2   :  { %v5791_v0 = vpop.eup %5790 }
 0x2e3   :  { %v115_v17 = vmul.f32 %v5791_v0, %v113_v9 }
 0x2e5   :  { %v117_v23 = vsel %vm116_vm1, %v113_v9, %v115_v17 }
 0x2e6   :  { %v5793_v38 = vpop.eup %5792  ;;  %v120_v26 = vsel %vm118_vm3, %v119_v13, %v117_v23  ;;  %v79_v19 = vpop.xlane.xlu0 %78 }
 0x2e7   :  { %v123_v54 = vmul.f32 %v5793_v38, %v121_v41  ;;  %v80_v27 = vrot.slane %v79_v19, 4 }
 0x2e9   :  { %v125_v48 = vsel %vm124_vm2, %v121_v41, %v123_v54  ;;  %v81_v44 = vadd.f32 %v80_v27, %v79_v19 }
 0x2ea   :  { %v128_v63 = vsel %vm126_vm4, %v127_v61, %v125_v48 }
 0x2eb   :  { %v142_v59 = vsub.f32 %v120_v26, %v128_v63  ;;  %v82_v51 = vrot.slane %v81_v44, 2 }
 0x2ed   :  { %v143_v34 = vmul.f32 %v142_v59, %v142_v59  ;;  %v83_v61 = vadd.f32 %v82_v51, %v81_v44 }
 0x2ef   :  { %v144_v29 = vsel %vm131_vm0, %v143_v34, 0.0  ;;  %v84_v59 = vrot.slane %v83_v61, 1 }
 0x2f0   :  { %145 = vadd.xlane.f32.xlu0 %v144_v29 }
 0x366   :  { %v134_v58 = vpop.xlane.xlu1 %133 }
 0x367   :  { %v135_v1 = vrot.slane %v134_v58, 4 }
 0x369   :  { %v136_v32 = vadd.f32 %v135_v1, %v134_v58 }
 0x36b   :  { %v137_v56 = vrot.slane %v136_v32, 2 }
 0x36d   :  { %v138_v26 = vadd.f32 %v137_v56, %v136_v32 }
 0x37b   :  { %v2845_v3 = vpop.f32.mrb[2].mxu1 }
 0x37c   :  { %v2852_v10 = vand.u32 2147483647, %v2845_v3  ;;  %v2847_v46 = vpop.f32.mrb[3].mxu1  ;;  %v139_v3 = vrot.slane %v138_v26, 1 }
 0x37d   :  { %v2853_v5 = vand.u32 2147483647, %v2847_v46  ;;  %v146_v43 = vpop.xlane.xlu0 %145  ;;  %v85_v46 = vadd.f32 %v84_v59, %v83_v61 }
 0x37e   :  { %v2855_v16 = vadd.f32 %v10601_v40, %v2852_v10  ;;  %v147_v28 = vrot.slane %v146_v43, 4  ;;  %v140_v40 = vadd.f32 %v139_v3, %v138_v26 }
 0x37f   :  { %5771 = vpush %v85_v46 }
 0x380   :  { %v2856_v39 = vadd.f32 %v2855_v16, %v2853_v5  ;;  %v148_v9 = vadd.f32 %v147_v28, %v146_v43  ;;  %5773 = vpush %v140_v40 }
 0x381   :  { %v4427_v62 = vpop.f32.mrb[2].mxu0 }
 0x382   :  { %v4429_v52 = vpop.f32.mrb[3].mxu0  ;;  %2857 = vadd.xlane.f32.xlu1 %v2856_v39  ;;  %v4464_v21 = vmul.f32 %v4427_v62, %v4427_v62  ;;  %v149_v13 = vrot.slane %v148_v9, 2 }
 0x383   :  { %v4465_v24 = vmul.f32 %v4429_v52, %v4429_v52 }
 0x384   :  { %v150_v34 = vadd.f32 %v149_v13, %v148_v9 }
 0x385   :  { %v4435_v25 = vpop.f32.mrb[4].mxu0 }
 0x386   :  { %v4466_v35 = vmul.f32 %v4435_v25, %v4435_v25  ;;  %v4468_v57 = vmul.f32 %v4435_v25, %v4427_v62  ;;  %v4437_v22 = vpop.f32.mrb[5].mxu0  ;;  %v151_v5 = vrot.slane %v150_v34, 1 }
 0x387   :  { %v4467_v47 = vmul.f32 %v4437_v22, %v4437_v22  ;;  %v4469_v30 = vmul.f32 %v4437_v22, %v4429_v52 }
 0x388   :  { %v4486_v2 = vadd.f32 %v4466_v35, %v4464_v21  ;;  %v4476_v45 = vmul.f32 2.0, %v4468_v57  ;;  %v152_v16 = vadd.f32 %v151_v5, %v150_v34 }
 0x389   :  { %v4487_v18 = vadd.f32 %v4467_v47, %v4465_v24  ;;  %v4443_v55 = vpop.f32.mrb[6].mxu0  ;;  %v4477_v12 = vmul.f32 2.0, %v4469_v30 }
 0x38a   :  { %v4470_v6 = vsub.f32 %v4443_v55, %v4464_v21  ;;  %v4445_v4 = vpop.f32.mrb[7].mxu0  ;;  %v4488_v36 = vadd.f32 0.0001, %v4486_v2  ;;  %v4478_v41 = vadd.f32 0.0001, %v4476_v45  ;;  %5775 = vpush %v152_v16 }
 0x38b   :  { %v4471_v37 = vsub.f32 %v4445_v4, %v4465_v24  ;;  %v4489_v42 = vadd.f32 0.0001, %v4487_v18  ;;  %v4479_v23 = vadd.f32 0.0001, %v4477_v12  ;;  %v4510_v4 = vlaneseq }
 0x38d   :  { %v4451_v53 = vpop.f32.mrb[8].mxu0 }
 0x38e   :  { %v4472_v33 = vsub.f32 %v4451_v53, %v4466_v35  ;;  %v4453_v14 = vpop.f32.mrb[9].mxu0 }
 0x38f   :  { %v4473_v49 = vsub.f32 %v4453_v14, %v4467_v47 }
 0x390   :  { %v4490_v20 = vadd.f32 %v4472_v33, %v4470_v6 }
 0x391   :  { %v4491_v11 = vadd.f32 %v4473_v49, %v4471_v37  ;;  %v4459_v8 = vpop.f32.mrb[10].mxu0  ;;  %v4511_v37 = vand.u32 127, %v4510_v4 }
 0x392   :  { %v4492_v60 = vadd.f32 0.0009, %v4490_v20  ;;  %v4474_v7 = vsub.f32 %v4459_v8, %v4468_v57  ;;  %v4461_v15 = vpop.f32.mrb[11].mxu0 }
 0x393   :  { %v4493_v50 = vadd.f32 0.0009, %v4491_v11  ;;  %v4475_v31 = vsub.f32 %v4461_v15, %v4469_v30  ;;  %vm4512_vm5 = vcmp.eq.s32.totalorder %v4511_v37, 0  ;;  %vm4515_vm6 = vcmp.eq.s32.totalorder %v4511_v37, 1 }
 0x394   :  { %v4494_v0 = vmul.f32 %v4492_v60, %v4488_v36  ;;  %v4480_v38 = vmul.f32 2.0, %v4474_v7  ;;  %vm4519_vm7 = vcmp.eq.s32.totalorder %v4511_v37, 2  ;;  %vm4523_vm8 = vcmp.eq.s32.totalorder %v4511_v37, 3 }
 0x395   :  { %v4495_v17 = vmul.f32 %v4493_v50, %v4489_v42  ;;  %v4481_v54 = vmul.f32 2.0, %v4475_v31  ;;  %vm4527_vm9 = vcmp.eq.s32.totalorder %v4511_v37, 4 }
 0x396   :  { %5794 = vrcp.f32 %v4494_v0  ;;  %v4482_v48 = vadd.f32 0.0009, %v4480_v38 }
 0x397   :  { %5796 = vrcp.f32 %v4495_v17  ;;  %v4483_v63 = vadd.f32 0.0009, %v4481_v54 }
 0x398   :  { %v4484_v29 = vmul.f32 %v4482_v48, %v4478_v41 }
 0x399   :  { %v4485_v10 = vmul.f32 %v4483_v63, %v4479_v23 }
 0x3a0   :  { %v5795_v39 = vpop.eup %5794 }
 0x3a1   :  { %v5797_v62 = vpop.eup %5796  ;;  %v4497_v52 = vmul.f32 %v5795_v39, %v4484_v29 }
 0x3a2   :  { %v4499_v25 = vmul.f32 %v5797_v62, %v4485_v10 }
 0x3a4   :  { %v4500_v21 = vadd.f32 %v4499_v25, %v4497_v52 }
 0x3a6   :  { %4501 = vadd.xlane.f32.xlu0 %v4500_v21 }
 0x3b0   :  { %s5772_s3 = spop %5771 }
 0x3b1   :  { %s5774_s11 = spop %5773  ;;  %v4513_v53 = vstv %s5772_s3 }
 0x3b2   :  { %v4516_v44 = vstv %s5774_s11  ;;  %v4514_v32 = vsel %vm4512_vm5, %v4513_v53, 0.0 }
 0x3b3   :  { %v4517_v33 = vsel %vm4515_vm6, %v4516_v44, 0.0 }
 0x3b4   :  { %v4518_v49 = vadd.f32 %v4517_v33, %v4514_v32 }
 0x3bb   :  { %s5776_s12 = spop %5775 }
 0x3bc   :  { %v4520_v14 = vstv %s5776_s12 }
 0x3bd   :  { %v4521_v20 = vsel %vm4519_vm7, %v4520_v14, 0.0 }
 0x3be   :  { %v4522_v11 = vadd.f32 %v4521_v20, %v4518_v49 }
 0x40f   :  { %v2858_v35 = vpop.xlane.xlu1 %2857 }
 0x410   :  { %v2859_v57 = vrot.slane %v2858_v35, 4 }
 0x412   :  { %v2860_v22 = vadd.f32 %v2859_v57, %v2858_v35 }
 0x414   :  { %v2861_v58 = vrot.slane %v2860_v22, 2 }
 0x416   :  { %v2862_v24 = vadd.f32 %v2861_v58, %v2860_v22 }
 0x418   :  { %v2863_v47 = vrot.slane %v2862_v24, 1 }
 0x41a   :  { %v2864_v30 = vadd.f32 %v2863_v47, %v2862_v24 }
 0x41c   :  { %5777 = vpush %v2864_v30 }
 0x433   :  { %v4502_v2 = vpop.xlane.xlu0 %4501 }
 0x434   :  { %v4503_v19 = vrot.slane %v4502_v2, 4 }
 0x436   :  { %v4504_v18 = vadd.f32 %v4503_v19, %v4502_v2 }
 0x438   :  { %v4505_v55 = vrot.slane %v4504_v18, 2 }
 0x43a   :  { %v4506_v27 = vadd.f32 %v4505_v55, %v4504_v18 }
 0x43c   :  { %v4507_v1 = vrot.slane %v4506_v27, 1 }
 0x43e   :  { %v4508_v6 = vadd.f32 %v4507_v1, %v4506_v27 }
 0x440   :  { %5779 = vpush %v4508_v6 }
 0x44d   :  { %s5778_s13 = spop %5777 }
 0x44e   :  { %v4524_v45 = vstv %s5778_s13 }
 0x44f   :  { %v4525_v43 = vsel %vm4523_vm8, %v4524_v45, 0.0 }
 0x450   :  { %v4526_v8 = vadd.f32 %v4525_v43, %v4522_v11 }
 0x471   :  { %s5780_s14 = spop %5779 }
 0x472   :  { %v4528_v51 = vstv %s5780_s14 }
 0x473   :  { %v4529_v56 = vsel %vm4527_vm9, %v4528_v51, 0.0 }
 0x474   :  { %v4530_v28 = vadd.f32 %v4529_v56, %v4526_v8 }
 0x476   :  { %4531 = vst [vmem:[#allocation10] sm:$0xff] %v4530_v28 }
 0x477   :  { %5903 = shalt.err (!%p5900_p8)
}
 0x478   :  { %s5904_s21 = scalar_lea.hbm %s8762_s4, 128 }
 0x479   :  { %p5905_p9 = scmp.ne.s32.totalorder %s8762_s4, %s5904_s21  ;;  %p5908_p10 = scmp.lt.u32.totalorder %s5904_s21, %s8762_s4 }
 0x47b   :  { %p5910_p11 = pnand %p5908_p10, %p5905_p9 }
 0x47d   :  { %5913 = shalt.err (!%p5910_p11)
}
 0x47e   :  { %4541 = dma.vmem_to_hbm [thread:$0]  %s4539_s16, 128, %s8762_s4, [#allocation4]  }
 0x47f   :  { %5920 = dma.done.wait [#allocation4], 128  }
 0x480   :  { %5921 = vsyncadd [#allocation4], 4294967168 }
 0x481   :  { %4545 = vsyncpa [#allocation3], 1 }
 0x482   :  { %4546 = vsyncpa [#allocation6], 1 }
 0x483   :  { %4547 = vsyncpa [#allocation9], 1 }
 0x484   :  { %4548 = vsyncpa [#allocation4], 1 }

</bundles_post_ra>
